<compile_context>
chip_gen: v6e
topology: v6e:2x2x1
jax: 0.10.0
libtpu: 0.0.40
codegen_flags: <defaults>
</compile_context>

<pallas_src>
import functools

import jax
import jax.numpy as jnp
import numpy as np
from jax import lax
from jax.experimental import pallas as pl
from jax.experimental.pallas import tpu as pltpu

_EPS = 1e-5
_LANE = 128          # lane-dense output-channel padding (256 is also reasonable on v6e/v7x)


def _round_up(x, m):
    return ((x + m - 1) // m) * m


# ---------------------------------------------------------------------------
# Pallas kernel: one fused ResNet basic block per grid step (one batch image).
# ---------------------------------------------------------------------------
def _make_block_kernel(*, stride, Wq, M, Lq, has_shortcut, cout_p):
    """conv3x3_s{stride}+BN+ReLU -> conv3x3_s1+BN -> (+residual), all resident in VMEM.

    Layout: flattened "padded raster" of shape (rows, channels).  A 3x3 conv is 9
    row-shifted (M, Cin) @ (Cin, Cout) MXU dots; for stride 2 the input is a 2x2
    phase-split raster so each tap is still a contiguous row slice.
    """

    def conv1_tap_offset(ki, kj):
        if stride == 1:
            return ki * Wq + kj
        # phase (ki % 2, kj % 2), offset (ki // 2, kj // 2) inside that phase.
        return ((ki % 2) * 2 + (kj % 2)) * Lq + (ki // 2) * Wq + (kj // 2)

    # row offset of the "center" pixel (residual path reads the un-shifted input).
    center_off = 3 * Lq if stride == 2 else Wq + 1

    def kernel(x_ref, mask_ref, w1_ref, b1_ref, w2_ref, b2_ref, *rest):
        if has_shortcut:
            wsc_ref, bsc_ref, o_ref, y1p_ref = rest
        else:
            o_ref, y1p_ref = rest

        # ---- conv1 (3x3, stride s) + folded BN1 + ReLU -------------------------------
        acc1 = jnp.zeros((M, cout_p), jnp.float32)
        for ki in range(3):
            for kj in range(3):
                xt = x_ref[pl.ds(conv1_tap_offset(ki, kj), M), :]
                acc1 = acc1 + jnp.dot(xt.astype(jnp.bfloat16), w1_ref[ki * 3 + kj],
                                      preferred_element_type=jnp.float32)
        # mask zeroes the raster's out-of-image columns so they act as conv2's zero pad.
        y1 = jnp.maximum(acc1 + b1_ref[...], 0.0) * mask_ref[...]

        # ---- residual branch (reads the same resident input block) --------------------
        if has_shortcut:
            xr = x_ref[pl.ds(center_off, M), :]
            res = jnp.dot(xr.astype(jnp.bfloat16), wsc_ref[...],
                          preferred_element_type=jnp.float32) + bsc_ref[...]
        else:
            res = x_ref[pl.ds(center_off, M), :]

        # ---- re-pad y1 into a zero-bordered (Ho+2, Wq) raster held in VMEM scratch ----
        y1p_ref[...] = jnp.zeros_like(y1p_ref)
        y1p_ref[pl.ds(Wq + 1, M), :] = y1

        # ---- conv2 (3x3, stride 1) + folded BN2 + residual add (no final activation) --
        acc2 = jnp.zeros((M, cout_p), jnp.float32)
        for ki in range(3):
            for kj in range(3):
                yt = y1p_ref[pl.ds(ki * Wq + kj, M), :]
                acc2 = acc2 + jnp.dot(yt.astype(jnp.bfloat16), w2_ref[ki * 3 + kj],
                                      preferred_element_type=jnp.float32)
        o_ref[...] = (acc2 + b2_ref[...] + res).astype(o_ref.dtype)

    return kernel


# ---------------------------------------------------------------------------
# Wrapper-side helpers (pure layout plumbing, 1x data volume).
# ---------------------------------------------------------------------------
def _fold_bn_into_conv(w_oihw, bn, cin_p, cout_p):
    """Fold eval-mode BN into the conv weights.

    Returns bf16 weights of shape (KH*KW, cin_p, cout_p) and an f32 (1, cout_p) shift.
    """
    gamma, beta, mean, var = bn
    cout, cin, kh, kw = w_oihw.shape
    scale = gamma / jnp.sqrt(var + _EPS)
    shift = beta - mean * scale
    w = jnp.transpose(w_oihw, (2, 3, 1, 0)).reshape(kh * kw, cin, cout)
    w = w * scale[None, None, :]
    w = jnp.pad(w, ((0, 0), (0, cin_p - cin), (0, cout_p - cout)))
    shift = jnp.pad(shift, (0, cout_p - cout)).reshape(1, cout_p)
    return w.astype(jnp.bfloat16), shift.astype(jnp.float32)


def _to_padded_raster(x_nhwc, stride, Hq, Wq):
    """(N, H, W, C) -> (N, n_phase*Hq*Wq, C) flattened zero-padded raster(s), f32."""
    xp = jnp.pad(x_nhwc.astype(jnp.float32), ((0, 0), (1, 1), (1, 1), (0, 0)))
    if stride == 1:
        phases = [xp]
    else:  # 2x2 phase decomposition of the padded image
        phases = [xp[:, a::2, b::2, :] for a in range(2) for b in range(2)]
    padded = [
        jnp.pad(ph, ((0, 0), (0, Hq - ph.shape[1]), (0, Wq - ph.shape[2]), (0, 0)))
        for ph in phases
    ]
    xf = jnp.stack(padded, axis=1)                   # (N, n_phase, Hq, Wq, C)
    N = xf.shape[0]
    C = xf.shape[-1]
    return xf.reshape(N, len(phases) * Hq * Wq, C)


def basic_block_forward(x_nhwc, p, stride, cout_p):
    """One fused ResNetBasicBlock == one pallas_call (grid over the batch)."""
    assert stride in (1, 2)
    has_sc = "sc_w" in p
    N, H, W, cin = x_nhwc.shape
    if not has_sc and cin != cout_p:
        # identity residual: keep the activation channel-padded to the lane-dense width.
        x_nhwc = jnp.pad(x_nhwc, ((0, 0), (0, 0), (0, 0), (0, cout_p - cin)))
        cin = cout_p

    Ho = (H - 1) // stride + 1          # 3x3 conv, pad=1
    Wo = (W - 1) // stride + 1
    Wq = Wo + 2                         # output raster width (incl. 2 spare columns)
    Hq = Ho + 3                         # padded phase height (+1 spare zero row)
    Lq = Hq * Wq                        # rows per phase
    M = Ho * Wq                         # output raster rows per image
    n_phase = stride * stride

    xf = _to_padded_raster(x_nhwc, stride, Hq, Wq)                       # (N, n_phase*Lq, cin)
    mask = jnp.asarray((np.arange(M) % Wq < Wo).astype(np.float32)).reshape(M, 1)

    w1, b1 = _fold_bn_into_conv(p["w1"], p["bn1"], cin, cout_p)
    w2, b2 = _fold_bn_into_conv(p["w2"], p["bn2"], cout_p, cout_p)

    inputs = [xf, mask, w1, b1, w2, b2]
    in_specs = [
        pl.BlockSpec((None, n_phase * Lq, cin), lambda b: (b, 0, 0)),
        pl.BlockSpec((M, 1), lambda b: (0, 0)),
        pl.BlockSpec((9, cin, cout_p), lambda b: (0, 0, 0)),
        pl.BlockSpec((1, cout_p), lambda b: (0, 0)),
        pl.BlockSpec((9, cout_p, cout_p), lambda b: (0, 0, 0)),
        pl.BlockSpec((1, cout_p), lambda b: (0, 0)),
    ]
    if has_sc:
        wsc, bsc = _fold_bn_into_conv(p["sc_w"], p["sc_bn"], cin, cout_p)
        inputs += [wsc[0], bsc]        # 1x1 conv -> (cin, cout_p)
        in_specs += [
            pl.BlockSpec((cin, cout_p), lambda b: (0, 0)),
            pl.BlockSpec((1, cout_p), lambda b: (0, 0)),
        ]

    out = pl.pallas_call(
        _make_block_kernel(stride=stride, Wq=Wq, M=M, Lq=Lq,
                           has_shortcut=has_sc, cout_p=cout_p),
        out_shape=jax.ShapeDtypeStruct((N, M, cout_p), jnp.bfloat16),
        grid=(N,),
        in_specs=in_specs,
        out_specs=pl.BlockSpec((None, M, cout_p), lambda b: (b, 0, 0)),
        scratch_shapes=[pltpu.VMEM((Lq, cout_p), jnp.float32)],
        compiler_params=pltpu.CompilerParams(dimension_semantics=("parallel",)),
    )(*inputs)

    # drop the raster's spare columns; keep channels lane-padded (bf16) for the next block.
    return out.reshape(N, Ho, Wq, cout_p)[:, :, :Wo, :]


def resnet_layer_forward(x_nchw, layer_params, in_channels, out_channels):
    downsampling = 2 if in_channels != out_channels else 1
    cout_p = _round_up(out_channels, _LANE)
    x = jnp.transpose(x_nchw, (0, 2, 3, 1))                 # NCHW -> NHWC
    for b, p in enumerate(layer_params):
        x = basic_block_forward(x, p, downsampling if b == 0 else 1, cout_p)
    x = x[..., :out_channels].astype(jnp.float32)
    return jnp.transpose(x, (0, 3, 1, 2))                   # NHWC -> NCHW


# ---------------------------------------------------------------------------
# Deterministic parameter initialization (fresh synthetic weights).
# ---------------------------------------------------------------------------
def _init_conv(key, cout, cin, k):
    fan_in = cin * k * k
    return jax.random.normal(key, (cout, cin, k, k), jnp.float32) / np.sqrt(fan_in)


def _init_bn(key, c):
    k1, k2 = jax.random.split(key)
    gamma = 1.0 + 0.1 * jax.random.normal(k1, (c,), jnp.float32)
    beta = 0.1 * jax.random.normal(k2, (c,), jnp.float32)
    mean = jnp.zeros((c,), jnp.float32)
    var = jnp.ones((c,), jnp.float32)
    return (gamma, beta, mean, var)


def init_resnet_layer_params(key, in_channels, out_channels, n):
    params = []
    for b in range(n):
        cin = in_channels if b == 0 else out_channels
        key, k1, k2, k3, k4, k5, k6 = jax.random.split(key, 7)
        p = {
            "w1": _init_conv(k1, out_channels, cin, 3),
            "bn1": _init_bn(k2, out_channels),
            "w2": _init_conv(k3, out_channels, out_channels, 3),
            "bn2": _init_bn(k4, out_channels),
        }
        if cin != out_channels:  # shortcut conv1x1 + BN
            p["sc_w"] = _init_conv(k5, out_channels, cin, 1)
            p["sc_bn"] = _init_bn(k6, out_channels)
        params.append(p)
    return params


# ---------------------------------------------------------------------------
# Pure-JAX reference (lax.conv) for correctness checking.
# ---------------------------------------------------------------------------
def _ref_conv_bn(x, w, gamma, beta, mean, var, stride, pad, relu):
    y = lax.conv_general_dilated(
        x, jnp.transpose(w, (2, 3, 1, 0)),
        window_strides=(stride, stride),
        padding=((pad, pad), (pad, pad)),
        dimension_numbers=("NHWC", "HWIO", "NHWC"),
    )
    scale = gamma / jnp.sqrt(var + _EPS)
    y = y * scale + (beta - mean * scale)
    if relu:
        y = jnp.maximum(y, 0.0)
    return y


def _ref_layer(x_nchw, layer_params, in_channels, out_channels):
    downsampling = 2 if in_channels != out_channels else 1
    x = jnp.transpose(x_nchw, (0, 2, 3, 1))
    for b, p in enumerate(layer_params):
        ds = downsampling if b == 0 else 1
        if "sc_w" in p:
            res = _ref_conv_bn(x, p["sc_w"], *p["sc_bn"], ds, 0, False)
        else:
            res = x
        y = _ref_conv_bn(x, p["w1"], *p["bn1"], ds, 1, True)
        y = _ref_conv_bn(y, p["w2"], *p["bn2"], 1, 1, False)
        x = y + res
    return jnp.transpose(x, (0, 3, 1, 2))


# ---------------------------------------------------------------------------
if __name__ == "__main__":
    IN_C, OUT_C, N_BLOCKS = 4, 8, 2
    key = jax.random.PRNGKey(0)
    kx, kp = jax.random.split(key)

    x = jax.random.normal(kx, (2, IN_C, 16, 16), jnp.float32)  # NCHW, like PyTorch
    params = init_resnet_layer_params(kp, IN_C, OUT_C, N_BLOCKS)

    fwd = functools.partial(resnet_layer_forward,
                            in_channels=IN_C, out_channels=OUT_C)
    out = jax.jit(lambda xx: fwd(xx, params))(x)
    out = jax.block_until_ready(out)

    ref = _ref_layer(x, params, IN_C, OUT_C)
    assert out.shape == (2, OUT_C, 8, 8), out.shape
    # bf16 MXU operands / f32 accumulation => slightly looser tolerance than pure f32.
    np.testing.assert_allclose(np.asarray(out), np.asarray(ref), rtol=5e-2, atol=5e-2)

    print("KERNEL_OK")
</pallas_src>

<mosaic_0001>
module attributes {stable_mosaic.version = 11 : i64} {
  func.func @kernel(%arg0: i32, %arg1: memref<1x440x4xf32, #tpu.memory_space<vmem>>, %arg2: memref<80x1xf32, #tpu.memory_space<vmem>>, %arg3: memref<9x4x128xbf16, #tpu.memory_space<vmem>>, %arg4: memref<1x128xf32, #tpu.memory_space<vmem>>, %arg5: memref<9x128x128xbf16, #tpu.memory_space<vmem>>, %arg6: memref<1x128xf32, #tpu.memory_space<vmem>>, %arg7: memref<4x128xbf16, #tpu.memory_space<vmem>>, %arg8: memref<1x128xf32, #tpu.memory_space<vmem>>, %arg9: memref<1x80x128xbf16, #tpu.memory_space<vmem>>, %arg10: memref<110x128xf32, #tpu.memory_space<vmem>>) attributes {dimension_semantics = [#tpu.dimension_semantics<parallel>], iteration_bounds = array<i64: 2>, scalar_prefetch = 0 : i64, scratch_operands = 1 : i64, tpu.core_type = #tpu.core_type<tc>, window_params = [{transform_indices = @transform_0, window_bounds = array<i64: 1, 440, 4>}, {pipeline_mode = #tpu.pipeline_mode<synchronous>, transform_indices = @transform_1, window_bounds = array<i64: 80, 1>}, {pipeline_mode = #tpu.pipeline_mode<synchronous>, transform_indices = @transform_2, window_bounds = array<i64: 9, 4, 128>}, {pipeline_mode = #tpu.pipeline_mode<synchronous>, transform_indices = @transform_3, window_bounds = array<i64: 1, 128>}, {pipeline_mode = #tpu.pipeline_mode<synchronous>, transform_indices = @transform_4, window_bounds = array<i64: 9, 128, 128>}, {pipeline_mode = #tpu.pipeline_mode<synchronous>, transform_indices = @transform_5, window_bounds = array<i64: 1, 128>}, {pipeline_mode = #tpu.pipeline_mode<synchronous>, transform_indices = @transform_6, window_bounds = array<i64: 4, 128>}, {pipeline_mode = #tpu.pipeline_mode<synchronous>, transform_indices = @transform_7, window_bounds = array<i64: 1, 128>}, {transform_indices = @transform_8, window_bounds = array<i64: 1, 80, 128>}]} {
    %cst = arith.constant 0.000000e+00 : f32
    %0 = vector.broadcast %cst : f32 to vector<80x128xf32>
    %c0 = arith.constant 0 : index
    %c0_0 = arith.constant 0 : index
    %c0_1 = arith.constant 0 : index
    %1 = vector.load %arg1[%c0, %c0_0, %c0_1] : memref<1x440x4xf32, #tpu.memory_space<vmem>>, vector<1x80x4xf32>
    %2 = vector.shape_cast %1 : vector<1x80x4xf32> to vector<80x4xf32>
    %3 = arith.truncf %2 : vector<80x4xf32> to vector<80x4xbf16>
    %c0_2 = arith.constant 0 : index
    %c0_3 = arith.constant 0 : index
    %c0_4 = arith.constant 0 : index
    %4 = vector.load %arg3[%c0_2, %c0_3, %c0_4] : memref<9x4x128xbf16, #tpu.memory_space<vmem>>, vector<1x4x128xbf16>
    %5 = vector.shape_cast %4 : vector<1x4x128xbf16> to vector<4x128xbf16>
    %cst_5 = arith.constant dense<0.000000e+00> : vector<80x128xf32>
    %6 = tpu.matmul %3, %5, %cst_5 {dimension_numbers = #tpu.dot_dimension_numbers<[1], [0], [0], [1], [0, 0, 1, 1], [], []>} : vector<80x4xbf16>, vector<4x128xbf16>, vector<80x128xf32> -> vector<80x128xf32>
    %7 = arith.addf %0, %6 : vector<80x128xf32>
    %c0_6 = arith.constant 0 : index
    %c110 = arith.constant 110 : index
    %c0_7 = arith.constant 0 : index
    %8 = vector.load %arg1[%c0_6, %c110, %c0_7] : memref<1x440x4xf32, #tpu.memory_space<vmem>>, vector<1x80x4xf32>
    %9 = vector.shape_cast %8 : vector<1x80x4xf32> to vector<80x4xf32>
    %10 = arith.truncf %9 : vector<80x4xf32> to vector<80x4xbf16>
    %c1 = arith.constant 1 : index
    %c0_8 = arith.constant 0 : index
    %c0_9 = arith.constant 0 : index
    %11 = vector.load %arg3[%c1, %c0_8, %c0_9] : memref<9x4x128xbf16, #tpu.memory_space<vmem>>, vector<1x4x128xbf16>
    %12 = vector.shape_cast %11 : vector<1x4x128xbf16> to vector<4x128xbf16>
    %cst_10 = arith.constant dense<0.000000e+00> : vector<80x128xf32>
    %13 = tpu.matmul %10, %12, %cst_10 {dimension_numbers = #tpu.dot_dimension_numbers<[1], [0], [0], [1], [0, 0, 1, 1], [], []>} : vector<80x4xbf16>, vector<4x128xbf16>, vector<80x128xf32> -> vector<80x128xf32>
    %14 = arith.addf %7, %13 : vector<80x128xf32>
    %c0_11 = arith.constant 0 : index
    %c1_12 = arith.constant 1 : index
    %c0_13 = arith.constant 0 : index
    %15 = vector.load %arg1[%c0_11, %c1_12, %c0_13] : memref<1x440x4xf32, #tpu.memory_space<vmem>>, vector<1x80x4xf32>
    %16 = vector.shape_cast %15 : vector<1x80x4xf32> to vector<80x4xf32>
    %17 = arith.truncf %16 : vector<80x4xf32> to vector<80x4xbf16>
    %c2 = arith.constant 2 : index
    %c0_14 = arith.constant 0 : index
    %c0_15 = arith.constant 0 : index
    %18 = vector.load %arg3[%c2, %c0_14, %c0_15] : memref<9x4x128xbf16, #tpu.memory_space<vmem>>, vector<1x4x128xbf16>
    %19 = vector.shape_cast %18 : vector<1x4x128xbf16> to vector<4x128xbf16>
    %cst_16 = arith.constant dense<0.000000e+00> : vector<80x128xf32>
    %20 = tpu.matmul %17, %19, %cst_16 {dimension_numbers = #tpu.dot_dimension_numbers<[1], [0], [0], [1], [0, 0, 1, 1], [], []>} : vector<80x4xbf16>, vector<4x128xbf16>, vector<80x128xf32> -> vector<80x128xf32>
    %21 = arith.addf %14, %20 : vector<80x128xf32>
    %c0_17 = arith.constant 0 : index
    %c220 = arith.constant 220 : index
    %c0_18 = arith.constant 0 : index
    %22 = vector.load %arg1[%c0_17, %c220, %c0_18] : memref<1x440x4xf32, #tpu.memory_space<vmem>>, vector<1x80x4xf32>
    %23 = vector.shape_cast %22 : vector<1x80x4xf32> to vector<80x4xf32>
    %24 = arith.truncf %23 : vector<80x4xf32> to vector<80x4xbf16>
    %c3 = arith.constant 3 : index
    %c0_19 = arith.constant 0 : index
    %c0_20 = arith.constant 0 : index
    %25 = vector.load %arg3[%c3, %c0_19, %c0_20] : memref<9x4x128xbf16, #tpu.memory_space<vmem>>, vector<1x4x128xbf16>
    %26 = vector.shape_cast %25 : vector<1x4x128xbf16> to vector<4x128xbf16>
    %cst_21 = arith.constant dense<0.000000e+00> : vector<80x128xf32>
    %27 = tpu.matmul %24, %26, %cst_21 {dimension_numbers = #tpu.dot_dimension_numbers<[1], [0], [0], [1], [0, 0, 1, 1], [], []>} : vector<80x4xbf16>, vector<4x128xbf16>, vector<80x128xf32> -> vector<80x128xf32>
    %28 = arith.addf %21, %27 : vector<80x128xf32>
    %c0_22 = arith.constant 0 : index
    %c330 = arith.constant 330 : index
    %c0_23 = arith.constant 0 : index
    %29 = vector.load %arg1[%c0_22, %c330, %c0_23] : memref<1x440x4xf32, #tpu.memory_space<vmem>>, vector<1x80x4xf32>
    %30 = vector.shape_cast %29 : vector<1x80x4xf32> to vector<80x4xf32>
    %31 = arith.truncf %30 : vector<80x4xf32> to vector<80x4xbf16>
    %c4 = arith.constant 4 : index
    %c0_24 = arith.constant 0 : index
    %c0_25 = arith.constant 0 : index
    %32 = vector.load %arg3[%c4, %c0_24, %c0_25] : memref<9x4x128xbf16, #tpu.memory_space<vmem>>, vector<1x4x128xbf16>
    %33 = vector.shape_cast %32 : vector<1x4x128xbf16> to vector<4x128xbf16>
    %cst_26 = arith.constant dense<0.000000e+00> : vector<80x128xf32>
    %34 = tpu.matmul %31, %33, %cst_26 {dimension_numbers = #tpu.dot_dimension_numbers<[1], [0], [0], [1], [0, 0, 1, 1], [], []>} : vector<80x4xbf16>, vector<4x128xbf16>, vector<80x128xf32> -> vector<80x128xf32>
    %35 = arith.addf %28, %34 : vector<80x128xf32>
    %c0_27 = arith.constant 0 : index
    %c221 = arith.constant 221 : index
    %c0_28 = arith.constant 0 : index
    %36 = vector.load %arg1[%c0_27, %c221, %c0_28] : memref<1x440x4xf32, #tpu.memory_space<vmem>>, vector<1x80x4xf32>
    %37 = vector.shape_cast %36 : vector<1x80x4xf32> to vector<80x4xf32>
    %38 = arith.truncf %37 : vector<80x4xf32> to vector<80x4xbf16>
    %c5 = arith.constant 5 : index
    %c0_29 = arith.constant 0 : index
    %c0_30 = arith.constant 0 : index
    %39 = vector.load %arg3[%c5, %c0_29, %c0_30] : memref<9x4x128xbf16, #tpu.memory_space<vmem>>, vector<1x4x128xbf16>
    %40 = vector.shape_cast %39 : vector<1x4x128xbf16> to vector<4x128xbf16>
    %cst_31 = arith.constant dense<0.000000e+00> : vector<80x128xf32>
    %41 = tpu.matmul %38, %40, %cst_31 {dimension_numbers = #tpu.dot_dimension_numbers<[1], [0], [0], [1], [0, 0, 1, 1], [], []>} : vector<80x4xbf16>, vector<4x128xbf16>, vector<80x128xf32> -> vector<80x128xf32>
    %42 = arith.addf %35, %41 : vector<80x128xf32>
    %c0_32 = arith.constant 0 : index
    %c10 = arith.constant 10 : index
    %c0_33 = arith.constant 0 : index
    %43 = vector.load %arg1[%c0_32, %c10, %c0_33] : memref<1x440x4xf32, #tpu.memory_space<vmem>>, vector<1x80x4xf32>
    %44 = vector.shape_cast %43 : vector<1x80x4xf32> to vector<80x4xf32>
    %45 = arith.truncf %44 : vector<80x4xf32> to vector<80x4xbf16>
    %c6 = arith.constant 6 : index
    %c0_34 = arith.constant 0 : index
    %c0_35 = arith.constant 0 : index
    %46 = vector.load %arg3[%c6, %c0_34, %c0_35] : memref<9x4x128xbf16, #tpu.memory_space<vmem>>, vector<1x4x128xbf16>
    %47 = vector.shape_cast %46 : vector<1x4x128xbf16> to vector<4x128xbf16>
    %cst_36 = arith.constant dense<0.000000e+00> : vector<80x128xf32>
    %48 = tpu.matmul %45, %47, %cst_36 {dimension_numbers = #tpu.dot_dimension_numbers<[1], [0], [0], [1], [0, 0, 1, 1], [], []>} : vector<80x4xbf16>, vector<4x128xbf16>, vector<80x128xf32> -> vector<80x128xf32>
    %49 = arith.addf %42, %48 : vector<80x128xf32>
    %c0_37 = arith.constant 0 : index
    %c120 = arith.constant 120 : index
    %c0_38 = arith.constant 0 : index
    %50 = vector.load %arg1[%c0_37, %c120, %c0_38] : memref<1x440x4xf32, #tpu.memory_space<vmem>>, vector<1x80x4xf32>
    %51 = vector.shape_cast %50 : vector<1x80x4xf32> to vector<80x4xf32>
    %52 = arith.truncf %51 : vector<80x4xf32> to vector<80x4xbf16>
    %c7 = arith.constant 7 : index
    %c0_39 = arith.constant 0 : index
    %c0_40 = arith.constant 0 : index
    %53 = vector.load %arg3[%c7, %c0_39, %c0_40] : memref<9x4x128xbf16, #tpu.memory_space<vmem>>, vector<1x4x128xbf16>
    %54 = vector.shape_cast %53 : vector<1x4x128xbf16> to vector<4x128xbf16>
    %cst_41 = arith.constant dense<0.000000e+00> : vector<80x128xf32>
    %55 = tpu.matmul %52, %54, %cst_41 {dimension_numbers = #tpu.dot_dimension_numbers<[1], [0], [0], [1], [0, 0, 1, 1], [], []>} : vector<80x4xbf16>, vector<4x128xbf16>, vector<80x128xf32> -> vector<80x128xf32>
    %56 = arith.addf %49, %55 : vector<80x128xf32>
    %c0_42 = arith.constant 0 : index
    %c11 = arith.constant 11 : index
    %c0_43 = arith.constant 0 : index
    %57 = vector.load %arg1[%c0_42, %c11, %c0_43] : memref<1x440x4xf32, #tpu.memory_space<vmem>>, vector<1x80x4xf32>
    %58 = vector.shape_cast %57 : vector<1x80x4xf32> to vector<80x4xf32>
    %59 = arith.truncf %58 : vector<80x4xf32> to vector<80x4xbf16>
    %c8 = arith.constant 8 : index
    %c0_44 = arith.constant 0 : index
    %c0_45 = arith.constant 0 : index
    %60 = vector.load %arg3[%c8, %c0_44, %c0_45] : memref<9x4x128xbf16, #tpu.memory_space<vmem>>, vector<1x4x128xbf16>
    %61 = vector.shape_cast %60 : vector<1x4x128xbf16> to vector<4x128xbf16>
    %cst_46 = arith.constant dense<0.000000e+00> : vector<80x128xf32>
    %62 = tpu.matmul %59, %61, %cst_46 {dimension_numbers = #tpu.dot_dimension_numbers<[1], [0], [0], [1], [0, 0, 1, 1], [], []>} : vector<80x4xbf16>, vector<4x128xbf16>, vector<80x128xf32> -> vector<80x128xf32>
    %63 = arith.addf %56, %62 : vector<80x128xf32>
    %c0_47 = arith.constant 0 : index
    %c0_48 = arith.constant 0 : index
    %64 = vector.load %arg4[%c0_47, %c0_48] : memref<1x128xf32, #tpu.memory_space<vmem>>, vector<1x128xf32>
    %65 = vector.broadcast %64 : vector<1x128xf32> to vector<80x128xf32>
    %66 = arith.addf %63, %65 : vector<80x128xf32>
    %cst_49 = arith.constant 0.000000e+00 : f32
    %67 = vector.broadcast %cst_49 : f32 to vector<80x128xf32>
    %68 = arith.maximumf %66, %67 : vector<80x128xf32>
    %c0_50 = arith.constant 0 : index
    %c0_51 = arith.constant 0 : index
    %69 = vector.load %arg2[%c0_50, %c0_51] : memref<80x1xf32, #tpu.memory_space<vmem>>, vector<80x1xf32>
    %70 = vector.broadcast %69 : vector<80x1xf32> to vector<80x128xf32>
    %71 = arith.mulf %68, %70 : vector<80x128xf32>
    %c0_52 = arith.constant 0 : index
    %c330_53 = arith.constant 330 : index
    %c0_54 = arith.constant 0 : index
    %72 = vector.load %arg1[%c0_52, %c330_53, %c0_54] : memref<1x440x4xf32, #tpu.memory_space<vmem>>, vector<1x80x4xf32>
    %73 = vector.shape_cast %72 : vector<1x80x4xf32> to vector<80x4xf32>
    %74 = arith.truncf %73 : vector<80x4xf32> to vector<80x4xbf16>
    %c0_55 = arith.constant 0 : index
    %c0_56 = arith.constant 0 : index
    %75 = vector.load %arg7[%c0_55, %c0_56] : memref<4x128xbf16, #tpu.memory_space<vmem>>, vector<4x128xbf16>
    %cst_57 = arith.constant dense<0.000000e+00> : vector<80x128xf32>
    %76 = tpu.matmul %74, %75, %cst_57 {dimension_numbers = #tpu.dot_dimension_numbers<[1], [0], [0], [1], [0, 0, 1, 1], [], []>} : vector<80x4xbf16>, vector<4x128xbf16>, vector<80x128xf32> -> vector<80x128xf32>
    %c0_58 = arith.constant 0 : index
    %c0_59 = arith.constant 0 : index
    %77 = vector.load %arg8[%c0_58, %c0_59] : memref<1x128xf32, #tpu.memory_space<vmem>>, vector<1x128xf32>
    %78 = vector.broadcast %77 : vector<1x128xf32> to vector<80x128xf32>
    %79 = arith.addf %76, %78 : vector<80x128xf32>
    %cst_60 = arith.constant 0.000000e+00 : f32
    %80 = vector.broadcast %cst_60 : f32 to vector<110x128xf32>
    %c0_61 = arith.constant 0 : index
    %c0_62 = arith.constant 0 : index
    %81 = vector.load %arg10[%c0_61, %c0_62] : memref<110x128xf32, #tpu.memory_space<vmem>>, vector<110x128xf32>
    tpu.vector_store %arg10[%c0_61, %c0_62], %80 {strides = array<i32>} : memref<110x128xf32, #tpu.memory_space<vmem>>, vector<110x128xf32>,
    %c11_63 = arith.constant 11 : index
    %c0_64 = arith.constant 0 : index
    %82 = vector.load %arg10[%c11_63, %c0_64] : memref<110x128xf32, #tpu.memory_space<vmem>>, vector<80x128xf32>
    tpu.vector_store %arg10[%c11_63, %c0_64], %71 {strides = array<i32>} : memref<110x128xf32, #tpu.memory_space<vmem>>, vector<80x128xf32>,
    %cst_65 = arith.constant 0.000000e+00 : f32
    %83 = vector.broadcast %cst_65 : f32 to vector<80x128xf32>
    %c0_66 = arith.constant 0 : index
    %c0_67 = arith.constant 0 : index
    %84 = vector.load %arg10[%c0_66, %c0_67] : memref<110x128xf32, #tpu.memory_space<vmem>>, vector<80x128xf32>
    %85 = arith.truncf %84 : vector<80x128xf32> to vector<80x128xbf16>
    %c0_68 = arith.constant 0 : index
    %c0_69 = arith.constant 0 : index
    %c0_70 = arith.constant 0 : index
    %86 = vector.load %arg5[%c0_68, %c0_69, %c0_70] : memref<9x128x128xbf16, #tpu.memory_space<vmem>>, vector<1x128x128xbf16>
    %87 = vector.shape_cast %86 : vector<1x128x128xbf16> to vector<128x128xbf16>
    %cst_71 = arith.constant dense<0.000000e+00> : vector<80x128xf32>
    %88 = tpu.matmul %85, %87, %cst_71 {dimension_numbers = #tpu.dot_dimension_numbers<[1], [0], [0], [1], [0, 0, 1, 1], [], []>} : vector<80x128xbf16>, vector<128x128xbf16>, vector<80x128xf32> -> vector<80x128xf32>
    %89 = arith.addf %83, %88 : vector<80x128xf32>
    %c1_72 = arith.constant 1 : index
    %c0_73 = arith.constant 0 : index
    %90 = vector.load %arg10[%c1_72, %c0_73] : memref<110x128xf32, #tpu.memory_space<vmem>>, vector<80x128xf32>
    %91 = arith.truncf %90 : vector<80x128xf32> to vector<80x128xbf16>
    %c1_74 = arith.constant 1 : index
    %c0_75 = arith.constant 0 : index
    %c0_76 = arith.constant 0 : index
    %92 = vector.load %arg5[%c1_74, %c0_75, %c0_76] : memref<9x128x128xbf16, #tpu.memory_space<vmem>>, vector<1x128x128xbf16>
    %93 = vector.shape_cast %92 : vector<1x128x128xbf16> to vector<128x128xbf16>
    %cst_77 = arith.constant dense<0.000000e+00> : vector<80x128xf32>
    %94 = tpu.matmul %91, %93, %cst_77 {dimension_numbers = #tpu.dot_dimension_numbers<[1], [0], [0], [1], [0, 0, 1, 1], [], []>} : vector<80x128xbf16>, vector<128x128xbf16>, vector<80x128xf32> -> vector<80x128xf32>
    %95 = arith.addf %89, %94 : vector<80x128xf32>
    %c2_78 = arith.constant 2 : index
    %c0_79 = arith.constant 0 : index
    %96 = vector.load %arg10[%c2_78, %c0_79] : memref<110x128xf32, #tpu.memory_space<vmem>>, vector<80x128xf32>
    %97 = arith.truncf %96 : vector<80x128xf32> to vector<80x128xbf16>
    %c2_80 = arith.constant 2 : index
    %c0_81 = arith.constant 0 : index
    %c0_82 = arith.constant 0 : index
    %98 = vector.load %arg5[%c2_80, %c0_81, %c0_82] : memref<9x128x128xbf16, #tpu.memory_space<vmem>>, vector<1x128x128xbf16>
    %99 = vector.shape_cast %98 : vector<1x128x128xbf16> to vector<128x128xbf16>
    %cst_83 = arith.constant dense<0.000000e+00> : vector<80x128xf32>
    %100 = tpu.matmul %97, %99, %cst_83 {dimension_numbers = #tpu.dot_dimension_numbers<[1], [0], [0], [1], [0, 0, 1, 1], [], []>} : vector<80x128xbf16>, vector<128x128xbf16>, vector<80x128xf32> -> vector<80x128xf32>
    %101 = arith.addf %95, %100 : vector<80x128xf32>
    %c10_84 = arith.constant 10 : index
    %c0_85 = arith.constant 0 : index
    %102 = vector.load %arg10[%c10_84, %c0_85] : memref<110x128xf32, #tpu.memory_space<vmem>>, vector<80x128xf32>
    %103 = arith.truncf %102 : vector<80x128xf32> to vector<80x128xbf16>
    %c3_86 = arith.constant 3 : index
    %c0_87 = arith.constant 0 : index
    %c0_88 = arith.constant 0 : index
    %104 = vector.load %arg5[%c3_86, %c0_87, %c0_88] : memref<9x128x128xbf16, #tpu.memory_space<vmem>>, vector<1x128x128xbf16>
    %105 = vector.shape_cast %104 : vector<1x128x128xbf16> to vector<128x128xbf16>
    %cst_89 = arith.constant dense<0.000000e+00> : vector<80x128xf32>
    %106 = tpu.matmul %103, %105, %cst_89 {dimension_numbers = #tpu.dot_dimension_numbers<[1], [0], [0], [1], [0, 0, 1, 1], [], []>} : vector<80x128xbf16>, vector<128x128xbf16>, vector<80x128xf32> -> vector<80x128xf32>
    %107 = arith.addf %101, %106 : vector<80x128xf32>
    %c11_90 = arith.constant 11 : index
    %c0_91 = arith.constant 0 : index
    %108 = vector.load %arg10[%c11_90, %c0_91] : memref<110x128xf32, #tpu.memory_space<vmem>>, vector<80x128xf32>
    %109 = arith.truncf %108 : vector<80x128xf32> to vector<80x128xbf16>
    %c4_92 = arith.constant 4 : index
    %c0_93 = arith.constant 0 : index
    %c0_94 = arith.constant 0 : index
    %110 = vector.load %arg5[%c4_92, %c0_93, %c0_94] : memref<9x128x128xbf16, #tpu.memory_space<vmem>>, vector<1x128x128xbf16>
    %111 = vector.shape_cast %110 : vector<1x128x128xbf16> to vector<128x128xbf16>
    %cst_95 = arith.constant dense<0.000000e+00> : vector<80x128xf32>
    %112 = tpu.matmul %109, %111, %cst_95 {dimension_numbers = #tpu.dot_dimension_numbers<[1], [0], [0], [1], [0, 0, 1, 1], [], []>} : vector<80x128xbf16>, vector<128x128xbf16>, vector<80x128xf32> -> vector<80x128xf32>
    %113 = arith.addf %107, %112 : vector<80x128xf32>
    %c12 = arith.constant 12 : index
    %c0_96 = arith.constant 0 : index
    %114 = vector.load %arg10[%c12, %c0_96] : memref<110x128xf32, #tpu.memory_space<vmem>>, vector<80x128xf32>
    %115 = arith.truncf %114 : vector<80x128xf32> to vector<80x128xbf16>
    %c5_97 = arith.constant 5 : index
    %c0_98 = arith.constant 0 : index
    %c0_99 = arith.constant 0 : index
    %116 = vector.load %arg5[%c5_97, %c0_98, %c0_99] : memref<9x128x128xbf16, #tpu.memory_space<vmem>>, vector<1x128x128xbf16>
    %117 = vector.shape_cast %116 : vector<1x128x128xbf16> to vector<128x128xbf16>
    %cst_100 = arith.constant dense<0.000000e+00> : vector<80x128xf32>
    %118 = tpu.matmul %115, %117, %cst_100 {dimension_numbers = #tpu.dot_dimension_numbers<[1], [0], [0], [1], [0, 0, 1, 1], [], []>} : vector<80x128xbf16>, vector<128x128xbf16>, vector<80x128xf32> -> vector<80x128xf32>
    %119 = arith.addf %113, %118 : vector<80x128xf32>
    %c20 = arith.constant 20 : index
    %c0_101 = arith.constant 0 : index
    %120 = vector.load %arg10[%c20, %c0_101] : memref<110x128xf32, #tpu.memory_space<vmem>>, vector<80x128xf32>
    %121 = arith.truncf %120 : vector<80x128xf32> to vector<80x128xbf16>
    %c6_102 = arith.constant 6 : index
    %c0_103 = arith.constant 0 : index
    %c0_104 = arith.constant 0 : index
    %122 = vector.load %arg5[%c6_102, %c0_103, %c0_104] : memref<9x128x128xbf16, #tpu.memory_space<vmem>>, vector<1x128x128xbf16>
    %123 = vector.shape_cast %122 : vector<1x128x128xbf16> to vector<128x128xbf16>
    %cst_105 = arith.constant dense<0.000000e+00> : vector<80x128xf32>
    %124 = tpu.matmul %121, %123, %cst_105 {dimension_numbers = #tpu.dot_dimension_numbers<[1], [0], [0], [1], [0, 0, 1, 1], [], []>} : vector<80x128xbf16>, vector<128x128xbf16>, vector<80x128xf32> -> vector<80x128xf32>
    %125 = arith.addf %119, %124 : vector<80x128xf32>
    %c21 = arith.constant 21 : index
    %c0_106 = arith.constant 0 : index
    %126 = vector.load %arg10[%c21, %c0_106] : memref<110x128xf32, #tpu.memory_space<vmem>>, vector<80x128xf32>
    %127 = arith.truncf %126 : vector<80x128xf32> to vector<80x128xbf16>
    %c7_107 = arith.constant 7 : index
    %c0_108 = arith.constant 0 : index
    %c0_109 = arith.constant 0 : index
    %128 = vector.load %arg5[%c7_107, %c0_108, %c0_109] : memref<9x128x128xbf16, #tpu.memory_space<vmem>>, vector<1x128x128xbf16>
    %129 = vector.shape_cast %128 : vector<1x128x128xbf16> to vector<128x128xbf16>
    %cst_110 = arith.constant dense<0.000000e+00> : vector<80x128xf32>
    %130 = tpu.matmul %127, %129, %cst_110 {dimension_numbers = #tpu.dot_dimension_numbers<[1], [0], [0], [1], [0, 0, 1, 1], [], []>} : vector<80x128xbf16>, vector<128x128xbf16>, vector<80x128xf32> -> vector<80x128xf32>
    %131 = arith.addf %125, %130 : vector<80x128xf32>
    %c22 = arith.constant 22 : index
    %c0_111 = arith.constant 0 : index
    %132 = vector.load %arg10[%c22, %c0_111] : memref<110x128xf32, #tpu.memory_space<vmem>>, vector<80x128xf32>
    %133 = arith.truncf %132 : vector<80x128xf32> to vector<80x128xbf16>
    %c8_112 = arith.constant 8 : index
    %c0_113 = arith.constant 0 : index
    %c0_114 = arith.constant 0 : index
    %134 = vector.load %arg5[%c8_112, %c0_113, %c0_114] : memref<9x128x128xbf16, #tpu.memory_space<vmem>>, vector<1x128x128xbf16>
    %135 = vector.shape_cast %134 : vector<1x128x128xbf16> to vector<128x128xbf16>
    %cst_115 = arith.constant dense<0.000000e+00> : vector<80x128xf32>
    %136 = tpu.matmul %133, %135, %cst_115 {dimension_numbers = #tpu.dot_dimension_numbers<[1], [0], [0], [1], [0, 0, 1, 1], [], []>} : vector<80x128xbf16>, vector<128x128xbf16>, vector<80x128xf32> -> vector<80x128xf32>
    %137 = arith.addf %131, %136 : vector<80x128xf32>
    %c0_116 = arith.constant 0 : index
    %c0_117 = arith.constant 0 : index
    %138 = vector.load %arg6[%c0_116, %c0_117] : memref<1x128xf32, #tpu.memory_space<vmem>>, vector<1x128xf32>
    %139 = vector.broadcast %138 : vector<1x128xf32> to vector<80x128xf32>
    %140 = arith.addf %137, %139 : vector<80x128xf32>
    %141 = arith.addf %140, %79 : vector<80x128xf32>
    %142 = arith.truncf %141 : vector<80x128xf32> to vector<80x128xbf16>
    %c0_118 = arith.constant 0 : index
    %c0_119 = arith.constant 0 : index
    %c0_120 = arith.constant 0 : index
    %143 = vector.load %arg9[%c0_118, %c0_119, %c0_120] : memref<1x80x128xbf16, #tpu.memory_space<vmem>>, vector<1x80x128xbf16>
    %144 = vector.shape_cast %143 : vector<1x80x128xbf16> to vector<80x128xbf16>
    %145 = vector.shape_cast %142 : vector<80x128xbf16> to vector<1x80x128xbf16>
    tpu.vector_store %arg9[%c0_118, %c0_119, %c0_120], %145 {strides = array<i32>} : memref<1x80x128xbf16, #tpu.memory_space<vmem>>, vector<1x80x128xbf16>,
    return
  }
  func.func @transform_0(%arg0: i32) -> (i32, i32, i32) {
    %c0_i32 = arith.constant 0 : i32
    %c0_i32_0 = arith.constant 0 : i32
    %c0_i32_1 = arith.constant 0 : i32
    return %arg0, %c0_i32, %c0_i32_0 : i32, i32, i32
  }
  func.func @transform_1(%arg0: i32) -> (i32, i32) {
    %c0_i32 = arith.constant 0 : i32
    %c0_i32_0 = arith.constant 0 : i32
    %c0_i32_1 = arith.constant 0 : i32
    return %c0_i32, %c0_i32_0 : i32, i32
  }
  func.func @transform_2(%arg0: i32) -> (i32, i32, i32) {
    %c0_i32 = arith.constant 0 : i32
    %c0_i32_0 = arith.constant 0 : i32
    %c0_i32_1 = arith.constant 0 : i32
    %c0_i32_2 = arith.constant 0 : i32
    return %c0_i32, %c0_i32_0, %c0_i32_1 : i32, i32, i32
  }
  func.func @transform_3(%arg0: i32) -> (i32, i32) {
    %c0_i32 = arith.constant 0 : i32
    %c0_i32_0 = arith.constant 0 : i32
    %c0_i32_1 = arith.constant 0 : i32
    return %c0_i32, %c0_i32_0 : i32, i32
  }
  func.func @transform_4(%arg0: i32) -> (i32, i32, i32) {
    %c0_i32 = arith.constant 0 : i32
    %c0_i32_0 = arith.constant 0 : i32
    %c0_i32_1 = arith.constant 0 : i32
    %c0_i32_2 = arith.constant 0 : i32
    return %c0_i32, %c0_i32_0, %c0_i32_1 : i32, i32, i32
  }
  func.func @transform_5(%arg0: i32) -> (i32, i32) {
    %c0_i32 = arith.constant 0 : i32
    %c0_i32_0 = arith.constant 0 : i32
    %c0_i32_1 = arith.constant 0 : i32
    return %c0_i32, %c0_i32_0 : i32, i32
  }
  func.func @transform_6(%arg0: i32) -> (i32, i32) {
    %c0_i32 = arith.constant 0 : i32
    %c0_i32_0 = arith.constant 0 : i32
    %c0_i32_1 = arith.constant 0 : i32
    return %c0_i32, %c0_i32_0 : i32, i32
  }
  func.func @transform_7(%arg0: i32) -> (i32, i32) {
    %c0_i32 = arith.constant 0 : i32
    %c0_i32_0 = arith.constant 0 : i32
    %c0_i32_1 = arith.constant 0 : i32
    return %c0_i32, %c0_i32_0 : i32, i32
  }
  func.func @transform_8(%arg0: i32) -> (i32, i32, i32) {
    %c0_i32 = arith.constant 0 : i32
    %c0_i32_0 = arith.constant 0 : i32
    %c0_i32_1 = arith.constant 0 : i32
    return %arg0, %c0_i32, %c0_i32_0 : i32, i32, i32
  }
}

module attributes {stable_mosaic.version = 11 : i64} {
  func.func @kernel(%arg0: i32, %arg1: memref<1x110x128xf32, #tpu.memory_space<vmem>>, %arg2: memref<80x1xf32, #tpu.memory_space<vmem>>, %arg3: memref<9x128x128xbf16, #tpu.memory_space<vmem>>, %arg4: memref<1x128xf32, #tpu.memory_space<vmem>>, %arg5: memref<9x128x128xbf16, #tpu.memory_space<vmem>>, %arg6: memref<1x128xf32, #tpu.memory_space<vmem>>, %arg7: memref<1x80x128xbf16, #tpu.memory_space<vmem>>, %arg8: memref<110x128xf32, #tpu.memory_space<vmem>>) attributes {dimension_semantics = [#tpu.dimension_semantics<parallel>], iteration_bounds = array<i64: 2>, scalar_prefetch = 0 : i64, scratch_operands = 1 : i64, tpu.core_type = #tpu.core_type<tc>, window_params = [{transform_indices = @transform_0, window_bounds = array<i64: 1, 110, 128>}, {pipeline_mode = #tpu.pipeline_mode<synchronous>, transform_indices = @transform_1, window_bounds = array<i64: 80, 1>}, {pipeline_mode = #tpu.pipeline_mode<synchronous>, transform_indices = @transform_2, window_bounds = array<i64: 9, 128, 128>}, {pipeline_mode = #tpu.pipeline_mode<synchronous>, transform_indices = @transform_3, window_bounds = array<i64: 1, 128>}, {pipeline_mode = #tpu.pipeline_mode<synchronous>, transform_indices = @transform_4, window_bounds = array<i64: 9, 128, 128>}, {pipeline_mode = #tpu.pipeline_mode<synchronous>, transform_indices = @transform_5, window_bounds = array<i64: 1, 128>}, {transform_indices = @transform_6, window_bounds = array<i64: 1, 80, 128>}]} {
    %cst = arith.constant 0.000000e+00 : f32
    %0 = vector.broadcast %cst : f32 to vector<80x128xf32>
    %c0 = arith.constant 0 : index
    %c0_0 = arith.constant 0 : index
    %c0_1 = arith.constant 0 : index
    %1 = vector.load %arg1[%c0, %c0_0, %c0_1] : memref<1x110x128xf32, #tpu.memory_space<vmem>>, vector<1x80x128xf32>
    %2 = vector.shape_cast %1 : vector<1x80x128xf32> to vector<80x128xf32>
    %3 = arith.truncf %2 : vector<80x128xf32> to vector<80x128xbf16>
    %c0_2 = arith.constant 0 : index
    %c0_3 = arith.constant 0 : index
    %c0_4 = arith.constant 0 : index
    %4 = vector.load %arg3[%c0_2, %c0_3, %c0_4] : memref<9x128x128xbf16, #tpu.memory_space<vmem>>, vector<1x128x128xbf16>
    %5 = vector.shape_cast %4 : vector<1x128x128xbf16> to vector<128x128xbf16>
    %cst_5 = arith.constant dense<0.000000e+00> : vector<80x128xf32>
    %6 = tpu.matmul %3, %5, %cst_5 {dimension_numbers = #tpu.dot_dimension_numbers<[1], [0], [0], [1], [0, 0, 1, 1], [], []>} : vector<80x128xbf16>, vector<128x128xbf16>, vector<80x128xf32> -> vector<80x128xf32>
    %7 = arith.addf %0, %6 : vector<80x128xf32>
    %c0_6 = arith.constant 0 : index
    %c1 = arith.constant 1 : index
    %c0_7 = arith.constant 0 : index
    %8 = vector.load %arg1[%c0_6, %c1, %c0_7] : memref<1x110x128xf32, #tpu.memory_space<vmem>>, vector<1x80x128xf32>
    %9 = vector.shape_cast %8 : vector<1x80x128xf32> to vector<80x128xf32>
    %10 = arith.truncf %9 : vector<80x128xf32> to vector<80x128xbf16>
    %c1_8 = arith.constant 1 : index
    %c0_9 = arith.constant 0 : index
    %c0_10 = arith.constant 0 : index
    %11 = vector.load %arg3[%c1_8, %c0_9, %c0_10] : memref<9x128x128xbf16, #tpu.memory_space<vmem>>, vector<1x128x128xbf16>
    %12 = vector.shape_cast %11 : vector<1x128x128xbf16> to vector<128x128xbf16>
    %cst_11 = arith.constant dense<0.000000e+00> : vector<80x128xf32>
    %13 = tpu.matmul %10, %12, %cst_11 {dimension_numbers = #tpu.dot_dimension_numbers<[1], [0], [0], [1], [0, 0, 1, 1], [], []>} : vector<80x128xbf16>, vector<128x128xbf16>, vector<80x128xf32> -> vector<80x128xf32>
    %14 = arith.addf %7, %13 : vector<80x128xf32>
    %c0_12 = arith.constant 0 : index
    %c2 = arith.constant 2 : index
    %c0_13 = arith.constant 0 : index
    %15 = vector.load %arg1[%c0_12, %c2, %c0_13] : memref<1x110x128xf32, #tpu.memory_space<vmem>>, vector<1x80x128xf32>
    %16 = vector.shape_cast %15 : vector<1x80x128xf32> to vector<80x128xf32>
    %17 = arith.truncf %16 : vector<80x128xf32> to vector<80x128xbf16>
    %c2_14 = arith.constant 2 : index
    %c0_15 = arith.constant 0 : index
    %c0_16 = arith.constant 0 : index
    %18 = vector.load %arg3[%c2_14, %c0_15, %c0_16] : memref<9x128x128xbf16, #tpu.memory_space<vmem>>, vector<1x128x128xbf16>
    %19 = vector.shape_cast %18 : vector<1x128x128xbf16> to vector<128x128xbf16>
    %cst_17 = arith.constant dense<0.000000e+00> : vector<80x128xf32>
    %20 = tpu.matmul %17, %19, %cst_17 {dimension_numbers = #tpu.dot_dimension_numbers<[1], [0], [0], [1], [0, 0, 1, 1], [], []>} : vector<80x128xbf16>, vector<128x128xbf16>, vector<80x128xf32> -> vector<80x128xf32>
    %21 = arith.addf %14, %20 : vector<80x128xf32>
    %c0_18 = arith.constant 0 : index
    %c10 = arith.constant 10 : index
    %c0_19 = arith.constant 0 : index
    %22 = vector.load %arg1[%c0_18, %c10, %c0_19] : memref<1x110x128xf32, #tpu.memory_space<vmem>>, vector<1x80x128xf32>
    %23 = vector.shape_cast %22 : vector<1x80x128xf32> to vector<80x128xf32>
    %24 = arith.truncf %23 : vector<80x128xf32> to vector<80x128xbf16>
    %c3 = arith.constant 3 : index
    %c0_20 = arith.constant 0 : index
    %c0_21 = arith.constant 0 : index
    %25 = vector.load %arg3[%c3, %c0_20, %c0_21] : memref<9x128x128xbf16, #tpu.memory_space<vmem>>, vector<1x128x128xbf16>
    %26 = vector.shape_cast %25 : vector<1x128x128xbf16> to vector<128x128xbf16>
    %cst_22 = arith.constant dense<0.000000e+00> : vector<80x128xf32>
    %27 = tpu.matmul %24, %26, %cst_22 {dimension_numbers = #tpu.dot_dimension_numbers<[1], [0], [0], [1], [0, 0, 1, 1], [], []>} : vector<80x128xbf16>, vector<128x128xbf16>, vector<80x128xf32> -> vector<80x128xf32>
    %28 = arith.addf %21, %27 : vector<80x128xf32>
    %c0_23 = arith.constant 0 : index
    %c11 = arith.constant 11 : index
    %c0_24 = arith.constant 0 : index
    %29 = vector.load %arg1[%c0_23, %c11, %c0_24] : memref<1x110x128xf32, #tpu.memory_space<vmem>>, vector<1x80x128xf32>
    %30 = vector.shape_cast %29 : vector<1x80x128xf32> to vector<80x128xf32>
    %31 = arith.truncf %30 : vector<80x128xf32> to vector<80x128xbf16>
    %c4 = arith.constant 4 : index
    %c0_25 = arith.constant 0 : index
    %c0_26 = arith.constant 0 : index
    %32 = vector.load %arg3[%c4, %c0_25, %c0_26] : memref<9x128x128xbf16, #tpu.memory_space<vmem>>, vector<1x128x128xbf16>
    %33 = vector.shape_cast %32 : vector<1x128x128xbf16> to vector<128x128xbf16>
    %cst_27 = arith.constant dense<0.000000e+00> : vector<80x128xf32>
    %34 = tpu.matmul %31, %33, %cst_27 {dimension_numbers = #tpu.dot_dimension_numbers<[1], [0], [0], [1], [0, 0, 1, 1], [], []>} : vector<80x128xbf16>, vector<128x128xbf16>, vector<80x128xf32> -> vector<80x128xf32>
    %35 = arith.addf %28, %34 : vector<80x128xf32>
    %c0_28 = arith.constant 0 : index
    %c12 = arith.constant 12 : index
    %c0_29 = arith.constant 0 : index
    %36 = vector.load %arg1[%c0_28, %c12, %c0_29] : memref<1x110x128xf32, #tpu.memory_space<vmem>>, vector<1x80x128xf32>
    %37 = vector.shape_cast %36 : vector<1x80x128xf32> to vector<80x128xf32>
    %38 = arith.truncf %37 : vector<80x128xf32> to vector<80x128xbf16>
    %c5 = arith.constant 5 : index
    %c0_30 = arith.constant 0 : index
    %c0_31 = arith.constant 0 : index
    %39 = vector.load %arg3[%c5, %c0_30, %c0_31] : memref<9x128x128xbf16, #tpu.memory_space<vmem>>, vector<1x128x128xbf16>
    %40 = vector.shape_cast %39 : vector<1x128x128xbf16> to vector<128x128xbf16>
    %cst_32 = arith.constant dense<0.000000e+00> : vector<80x128xf32>
    %41 = tpu.matmul %38, %40, %cst_32 {dimension_numbers = #tpu.dot_dimension_numbers<[1], [0], [0], [1], [0, 0, 1, 1], [], []>} : vector<80x128xbf16>, vector<128x128xbf16>, vector<80x128xf32> -> vector<80x128xf32>
    %42 = arith.addf %35, %41 : vector<80x128xf32>
    %c0_33 = arith.constant 0 : index
    %c20 = arith.constant 20 : index
    %c0_34 = arith.constant 0 : index
    %43 = vector.load %arg1[%c0_33, %c20, %c0_34] : memref<1x110x128xf32, #tpu.memory_space<vmem>>, vector<1x80x128xf32>
    %44 = vector.shape_cast %43 : vector<1x80x128xf32> to vector<80x128xf32>
    %45 = arith.truncf %44 : vector<80x128xf32> to vector<80x128xbf16>
    %c6 = arith.constant 6 : index
    %c0_35 = arith.constant 0 : index
    %c0_36 = arith.constant 0 : index
    %46 = vector.load %arg3[%c6, %c0_35, %c0_36] : memref<9x128x128xbf16, #tpu.memory_space<vmem>>, vector<1x128x128xbf16>
    %47 = vector.shape_cast %46 : vector<1x128x128xbf16> to vector<128x128xbf16>
    %cst_37 = arith.constant dense<0.000000e+00> : vector<80x128xf32>
    %48 = tpu.matmul %45, %47, %cst_37 {dimension_numbers = #tpu.dot_dimension_numbers<[1], [0], [0], [1], [0, 0, 1, 1], [], []>} : vector<80x128xbf16>, vector<128x128xbf16>, vector<80x128xf32> -> vector<80x128xf32>
    %49 = arith.addf %42, %48 : vector<80x128xf32>
    %c0_38 = arith.constant 0 : index
    %c21 = arith.constant 21 : index
    %c0_39 = arith.constant 0 : index
    %50 = vector.load %arg1[%c0_38, %c21, %c0_39] : memref<1x110x128xf32, #tpu.memory_space<vmem>>, vector<1x80x128xf32>
    %51 = vector.shape_cast %50 : vector<1x80x128xf32> to vector<80x128xf32>
    %52 = arith.truncf %51 : vector<80x128xf32> to vector<80x128xbf16>
    %c7 = arith.constant 7 : index
    %c0_40 = arith.constant 0 : index
    %c0_41 = arith.constant 0 : index
    %53 = vector.load %arg3[%c7, %c0_40, %c0_41] : memref<9x128x128xbf16, #tpu.memory_space<vmem>>, vector<1x128x128xbf16>
    %54 = vector.shape_cast %53 : vector<1x128x128xbf16> to vector<128x128xbf16>
    %cst_42 = arith.constant dense<0.000000e+00> : vector<80x128xf32>
    %55 = tpu.matmul %52, %54, %cst_42 {dimension_numbers = #tpu.dot_dimension_numbers<[1], [0], [0], [1], [0, 0, 1, 1], [], []>} : vector<80x128xbf16>, vector<128x128xbf16>, vector<80x128xf32> -> vector<80x128xf32>
    %56 = arith.addf %49, %55 : vector<80x128xf32>
    %c0_43 = arith.constant 0 : index
    %c22 = arith.constant 22 : index
    %c0_44 = arith.constant 0 : index
    %57 = vector.load %arg1[%c0_43, %c22, %c0_44] : memref<1x110x128xf32, #tpu.memory_space<vmem>>, vector<1x80x128xf32>
    %58 = vector.shape_cast %57 : vector<1x80x128xf32> to vector<80x128xf32>
    %59 = arith.truncf %58 : vector<80x128xf32> to vector<80x128xbf16>
    %c8 = arith.constant 8 : index
    %c0_45 = arith.constant 0 : index
    %c0_46 = arith.constant 0 : index
    %60 = vector.load %arg3[%c8, %c0_45, %c0_46] : memref<9x128x128xbf16, #tpu.memory_space<vmem>>, vector<1x128x128xbf16>
    %61 = vector.shape_cast %60 : vector<1x128x128xbf16> to vector<128x128xbf16>
    %cst_47 = arith.constant dense<0.000000e+00> : vector<80x128xf32>
    %62 = tpu.matmul %59, %61, %cst_47 {dimension_numbers = #tpu.dot_dimension_numbers<[1], [0], [0], [1], [0, 0, 1, 1], [], []>} : vector<80x128xbf16>, vector<128x128xbf16>, vector<80x128xf32> -> vector<80x128xf32>
    %63 = arith.addf %56, %62 : vector<80x128xf32>
    %c0_48 = arith.constant 0 : index
    %c0_49 = arith.constant 0 : index
    %64 = vector.load %arg4[%c0_48, %c0_49] : memref<1x128xf32, #tpu.memory_space<vmem>>, vector<1x128xf32>
    %65 = vector.broadcast %64 : vector<1x128xf32> to vector<80x128xf32>
    %66 = arith.addf %63, %65 : vector<80x128xf32>
    %cst_50 = arith.constant 0.000000e+00 : f32
    %67 = vector.broadcast %cst_50 : f32 to vector<80x128xf32>
    %68 = arith.maximumf %66, %67 : vector<80x128xf32>
    %c0_51 = arith.constant 0 : index
    %c0_52 = arith.constant 0 : index
    %69 = vector.load %arg2[%c0_51, %c0_52] : memref<80x1xf32, #tpu.memory_space<vmem>>, vector<80x1xf32>
    %70 = vector.broadcast %69 : vector<80x1xf32> to vector<80x128xf32>
    %71 = arith.mulf %68, %70 : vector<80x128xf32>
    %c0_53 = arith.constant 0 : index
    %c11_54 = arith.constant 11 : index
    %c0_55 = arith.constant 0 : index
    %72 = vector.load %arg1[%c0_53, %c11_54, %c0_55] : memref<1x110x128xf32, #tpu.memory_space<vmem>>, vector<1x80x128xf32>
    %73 = vector.shape_cast %72 : vector<1x80x128xf32> to vector<80x128xf32>
    %cst_56 = arith.constant 0.000000e+00 : f32
    %74 = vector.broadcast %cst_56 : f32 to vector<110x128xf32>
    %c0_57 = arith.constant 0 : index
    %c0_58 = arith.constant 0 : index
    %75 = vector.load %arg8[%c0_57, %c0_58] : memref<110x128xf32, #tpu.memory_space<vmem>>, vector<110x128xf32>
    tpu.vector_store %arg8[%c0_57, %c0_58], %74 {strides = array<i32>} : memref<110x128xf32, #tpu.memory_space<vmem>>, vector<110x128xf32>,
    %c11_59 = arith.constant 11 : index
    %c0_60 = arith.constant 0 : index
    %76 = vector.load %arg8[%c11_59, %c0_60] : memref<110x128xf32, #tpu.memory_space<vmem>>, vector<80x128xf32>
    tpu.vector_store %arg8[%c11_59, %c0_60], %71 {strides = array<i32>} : memref<110x128xf32, #tpu.memory_space<vmem>>, vector<80x128xf32>,
    %cst_61 = arith.constant 0.000000e+00 : f32
    %77 = vector.broadcast %cst_61 : f32 to vector<80x128xf32>
    %c0_62 = arith.constant 0 : index
    %c0_63 = arith.constant 0 : index
    %78 = vector.load %arg8[%c0_62, %c0_63] : memref<110x128xf32, #tpu.memory_space<vmem>>, vector<80x128xf32>
    %79 = arith.truncf %78 : vector<80x128xf32> to vector<80x128xbf16>
    %c0_64 = arith.constant 0 : index
    %c0_65 = arith.constant 0 : index
    %c0_66 = arith.constant 0 : index
    %80 = vector.load %arg5[%c0_64, %c0_65, %c0_66] : memref<9x128x128xbf16, #tpu.memory_space<vmem>>, vector<1x128x128xbf16>
    %81 = vector.shape_cast %80 : vector<1x128x128xbf16> to vector<128x128xbf16>
    %cst_67 = arith.constant dense<0.000000e+00> : vector<80x128xf32>
    %82 = tpu.matmul %79, %81, %cst_67 {dimension_numbers = #tpu.dot_dimension_numbers<[1], [0], [0], [1], [0, 0, 1, 1], [], []>} : vector<80x128xbf16>, vector<128x128xbf16>, vector<80x128xf32> -> vector<80x128xf32>
    %83 = arith.addf %77, %82 : vector<80x128xf32>
    %c1_68 = arith.constant 1 : index
    %c0_69 = arith.constant 0 : index
    %84 = vector.load %arg8[%c1_68, %c0_69] : memref<110x128xf32, #tpu.memory_space<vmem>>, vector<80x128xf32>
    %85 = arith.truncf %84 : vector<80x128xf32> to vector<80x128xbf16>
    %c1_70 = arith.constant 1 : index
    %c0_71 = arith.constant 0 : index
    %c0_72 = arith.constant 0 : index
    %86 = vector.load %arg5[%c1_70, %c0_71, %c0_72] : memref<9x128x128xbf16, #tpu.memory_space<vmem>>, vector<1x128x128xbf16>
    %87 = vector.shape_cast %86 : vector<1x128x128xbf16> to vector<128x128xbf16>
    %cst_73 = arith.constant dense<0.000000e+00> : vector<80x128xf32>
    %88 = tpu.matmul %85, %87, %cst_73 {dimension_numbers = #tpu.dot_dimension_numbers<[1], [0], [0], [1], [0, 0, 1, 1], [], []>} : vector<80x128xbf16>, vector<128x128xbf16>, vector<80x128xf32> -> vector<80x128xf32>
    %89 = arith.addf %83, %88 : vector<80x128xf32>
    %c2_74 = arith.constant 2 : index
    %c0_75 = arith.constant 0 : index
    %90 = vector.load %arg8[%c2_74, %c0_75] : memref<110x128xf32, #tpu.memory_space<vmem>>, vector<80x128xf32>
    %91 = arith.truncf %90 : vector<80x128xf32> to vector<80x128xbf16>
    %c2_76 = arith.constant 2 : index
    %c0_77 = arith.constant 0 : index
    %c0_78 = arith.constant 0 : index
    %92 = vector.load %arg5[%c2_76, %c0_77, %c0_78] : memref<9x128x128xbf16, #tpu.memory_space<vmem>>, vector<1x128x128xbf16>
    %93 = vector.shape_cast %92 : vector<1x128x128xbf16> to vector<128x128xbf16>
    %cst_79 = arith.constant dense<0.000000e+00> : vector<80x128xf32>
    %94 = tpu.matmul %91, %93, %cst_79 {dimension_numbers = #tpu.dot_dimension_numbers<[1], [0], [0], [1], [0, 0, 1, 1], [], []>} : vector<80x128xbf16>, vector<128x128xbf16>, vector<80x128xf32> -> vector<80x128xf32>
    %95 = arith.addf %89, %94 : vector<80x128xf32>
    %c10_80 = arith.constant 10 : index
    %c0_81 = arith.constant 0 : index
    %96 = vector.load %arg8[%c10_80, %c0_81] : memref<110x128xf32, #tpu.memory_space<vmem>>, vector<80x128xf32>
    %97 = arith.truncf %96 : vector<80x128xf32> to vector<80x128xbf16>
    %c3_82 = arith.constant 3 : index
    %c0_83 = arith.constant 0 : index
    %c0_84 = arith.constant 0 : index
    %98 = vector.load %arg5[%c3_82, %c0_83, %c0_84] : memref<9x128x128xbf16, #tpu.memory_space<vmem>>, vector<1x128x128xbf16>
    %99 = vector.shape_cast %98 : vector<1x128x128xbf16> to vector<128x128xbf16>
    %cst_85 = arith.constant dense<0.000000e+00> : vector<80x128xf32>
    %100 = tpu.matmul %97, %99, %cst_85 {dimension_numbers = #tpu.dot_dimension_numbers<[1], [0], [0], [1], [0, 0, 1, 1], [], []>} : vector<80x128xbf16>, vector<128x128xbf16>, vector<80x128xf32> -> vector<80x128xf32>
    %101 = arith.addf %95, %100 : vector<80x128xf32>
    %c11_86 = arith.constant 11 : index
    %c0_87 = arith.constant 0 : index
    %102 = vector.load %arg8[%c11_86, %c0_87] : memref<110x128xf32, #tpu.memory_space<vmem>>, vector<80x128xf32>
    %103 = arith.truncf %102 : vector<80x128xf32> to vector<80x128xbf16>
    %c4_88 = arith.constant 4 : index
    %c0_89 = arith.constant 0 : index
    %c0_90 = arith.constant 0 : index
    %104 = vector.load %arg5[%c4_88, %c0_89, %c0_90] : memref<9x128x128xbf16, #tpu.memory_space<vmem>>, vector<1x128x128xbf16>
    %105 = vector.shape_cast %104 : vector<1x128x128xbf16> to vector<128x128xbf16>
    %cst_91 = arith.constant dense<0.000000e+00> : vector<80x128xf32>
    %106 = tpu.matmul %103, %105, %cst_91 {dimension_numbers = #tpu.dot_dimension_numbers<[1], [0], [0], [1], [0, 0, 1, 1], [], []>} : vector<80x128xbf16>, vector<128x128xbf16>, vector<80x128xf32> -> vector<80x128xf32>
    %107 = arith.addf %101, %106 : vector<80x128xf32>
    %c12_92 = arith.constant 12 : index
    %c0_93 = arith.constant 0 : index
    %108 = vector.load %arg8[%c12_92, %c0_93] : memref<110x128xf32, #tpu.memory_space<vmem>>, vector<80x128xf32>
    %109 = arith.truncf %108 : vector<80x128xf32> to vector<80x128xbf16>
    %c5_94 = arith.constant 5 : index
    %c0_95 = arith.constant 0 : index
    %c0_96 = arith.constant 0 : index
    %110 = vector.load %arg5[%c5_94, %c0_95, %c0_96] : memref<9x128x128xbf16, #tpu.memory_space<vmem>>, vector<1x128x128xbf16>
    %111 = vector.shape_cast %110 : vector<1x128x128xbf16> to vector<128x128xbf16>
    %cst_97 = arith.constant dense<0.000000e+00> : vector<80x128xf32>
    %112 = tpu.matmul %109, %111, %cst_97 {dimension_numbers = #tpu.dot_dimension_numbers<[1], [0], [0], [1], [0, 0, 1, 1], [], []>} : vector<80x128xbf16>, vector<128x128xbf16>, vector<80x128xf32> -> vector<80x128xf32>
    %113 = arith.addf %107, %112 : vector<80x128xf32>
    %c20_98 = arith.constant 20 : index
    %c0_99 = arith.constant 0 : index
    %114 = vector.load %arg8[%c20_98, %c0_99] : memref<110x128xf32, #tpu.memory_space<vmem>>, vector<80x128xf32>
    %115 = arith.truncf %114 : vector<80x128xf32> to vector<80x128xbf16>
    %c6_100 = arith.constant 6 : index
    %c0_101 = arith.constant 0 : index
    %c0_102 = arith.constant 0 : index
    %116 = vector.load %arg5[%c6_100, %c0_101, %c0_102] : memref<9x128x128xbf16, #tpu.memory_space<vmem>>, vector<1x128x128xbf16>
    %117 = vector.shape_cast %116 : vector<1x128x128xbf16> to vector<128x128xbf16>
    %cst_103 = arith.constant dense<0.000000e+00> : vector<80x128xf32>
    %118 = tpu.matmul %115, %117, %cst_103 {dimension_numbers = #tpu.dot_dimension_numbers<[1], [0], [0], [1], [0, 0, 1, 1], [], []>} : vector<80x128xbf16>, vector<128x128xbf16>, vector<80x128xf32> -> vector<80x128xf32>
    %119 = arith.addf %113, %118 : vector<80x128xf32>
    %c21_104 = arith.constant 21 : index
    %c0_105 = arith.constant 0 : index
    %120 = vector.load %arg8[%c21_104, %c0_105] : memref<110x128xf32, #tpu.memory_space<vmem>>, vector<80x128xf32>
    %121 = arith.truncf %120 : vector<80x128xf32> to vector<80x128xbf16>
    %c7_106 = arith.constant 7 : index
    %c0_107 = arith.constant 0 : index
    %c0_108 = arith.constant 0 : index
    %122 = vector.load %arg5[%c7_106, %c0_107, %c0_108] : memref<9x128x128xbf16, #tpu.memory_space<vmem>>, vector<1x128x128xbf16>
    %123 = vector.shape_cast %122 : vector<1x128x128xbf16> to vector<128x128xbf16>
    %cst_109 = arith.constant dense<0.000000e+00> : vector<80x128xf32>
    %124 = tpu.matmul %121, %123, %cst_109 {dimension_numbers = #tpu.dot_dimension_numbers<[1], [0], [0], [1], [0, 0, 1, 1], [], []>} : vector<80x128xbf16>, vector<128x128xbf16>, vector<80x128xf32> -> vector<80x128xf32>
    %125 = arith.addf %119, %124 : vector<80x128xf32>
    %c22_110 = arith.constant 22 : index
    %c0_111 = arith.constant 0 : index
    %126 = vector.load %arg8[%c22_110, %c0_111] : memref<110x128xf32, #tpu.memory_space<vmem>>, vector<80x128xf32>
    %127 = arith.truncf %126 : vector<80x128xf32> to vector<80x128xbf16>
    %c8_112 = arith.constant 8 : index
    %c0_113 = arith.constant 0 : index
    %c0_114 = arith.constant 0 : index
    %128 = vector.load %arg5[%c8_112, %c0_113, %c0_114] : memref<9x128x128xbf16, #tpu.memory_space<vmem>>, vector<1x128x128xbf16>
    %129 = vector.shape_cast %128 : vector<1x128x128xbf16> to vector<128x128xbf16>
    %cst_115 = arith.constant dense<0.000000e+00> : vector<80x128xf32>
    %130 = tpu.matmul %127, %129, %cst_115 {dimension_numbers = #tpu.dot_dimension_numbers<[1], [0], [0], [1], [0, 0, 1, 1], [], []>} : vector<80x128xbf16>, vector<128x128xbf16>, vector<80x128xf32> -> vector<80x128xf32>
    %131 = arith.addf %125, %130 : vector<80x128xf32>
    %c0_116 = arith.constant 0 : index
    %c0_117 = arith.constant 0 : index
    %132 = vector.load %arg6[%c0_116, %c0_117] : memref<1x128xf32, #tpu.memory_space<vmem>>, vector<1x128xf32>
    %133 = vector.broadcast %132 : vector<1x128xf32> to vector<80x128xf32>
    %134 = arith.addf %131, %133 : vector<80x128xf32>
    %135 = arith.addf %134, %73 : vector<80x128xf32>
    %136 = arith.truncf %135 : vector<80x128xf32> to vector<80x128xbf16>
    %c0_118 = arith.constant 0 : index
    %c0_119 = arith.constant 0 : index
    %c0_120 = arith.constant 0 : index
    %137 = vector.load %arg7[%c0_118, %c0_119, %c0_120] : memref<1x80x128xbf16, #tpu.memory_space<vmem>>, vector<1x80x128xbf16>
    %138 = vector.shape_cast %137 : vector<1x80x128xbf16> to vector<80x128xbf16>
    %139 = vector.shape_cast %136 : vector<80x128xbf16> to vector<1x80x128xbf16>
    tpu.vector_store %arg7[%c0_118, %c0_119, %c0_120], %139 {strides = array<i32>} : memref<1x80x128xbf16, #tpu.memory_space<vmem>>, vector<1x80x128xbf16>,
    return
  }
  func.func @transform_0(%arg0: i32) -> (i32, i32, i32) {
    %c0_i32 = arith.constant 0 : i32
    %c0_i32_0 = arith.constant 0 : i32
    %c0_i32_1 = arith.constant 0 : i32
    return %arg0, %c0_i32, %c0_i32_0 : i32, i32, i32
  }
  func.func @transform_1(%arg0: i32) -> (i32, i32) {
    %c0_i32 = arith.constant 0 : i32
    %c0_i32_0 = arith.constant 0 : i32
    %c0_i32_1 = arith.constant 0 : i32
    return %c0_i32, %c0_i32_0 : i32, i32
  }
  func.func @transform_2(%arg0: i32) -> (i32, i32, i32) {
    %c0_i32 = arith.constant 0 : i32
    %c0_i32_0 = arith.constant 0 : i32
    %c0_i32_1 = arith.constant 0 : i32
    %c0_i32_2 = arith.constant 0 : i32
    return %c0_i32, %c0_i32_0, %c0_i32_1 : i32, i32, i32
  }
  func.func @transform_3(%arg0: i32) -> (i32, i32) {
    %c0_i32 = arith.constant 0 : i32
    %c0_i32_0 = arith.constant 0 : i32
    %c0_i32_1 = arith.constant 0 : i32
    return %c0_i32, %c0_i32_0 : i32, i32
  }
  func.func @transform_4(%arg0: i32) -> (i32, i32, i32) {
    %c0_i32 = arith.constant 0 : i32
    %c0_i32_0 = arith.constant 0 : i32
    %c0_i32_1 = arith.constant 0 : i32
    %c0_i32_2 = arith.constant 0 : i32
    return %c0_i32, %c0_i32_0, %c0_i32_1 : i32, i32, i32
  }
  func.func @transform_5(%arg0: i32) -> (i32, i32) {
    %c0_i32 = arith.constant 0 : i32
    %c0_i32_0 = arith.constant 0 : i32
    %c0_i32_1 = arith.constant 0 : i32
    return %c0_i32, %c0_i32_0 : i32, i32
  }
  func.func @transform_6(%arg0: i32) -> (i32, i32, i32) {
    %c0_i32 = arith.constant 0 : i32
    %c0_i32_0 = arith.constant 0 : i32
    %c0_i32_1 = arith.constant 0 : i32
    return %arg0, %c0_i32, %c0_i32_0 : i32, i32, i32
  }
}

</mosaic_0001>

<bundles_post_ra>
// kernel: _lambda_.2
= control target key start
LH: loop header
LB: loop body
LE: loop exit
PB: predicated region body
PF: predicated region fallthrough
CT: control target
= control target key end

     0   :  { %s4320_s27 = smov 0   ;;  %s5390_s0 = inlined_call_operand.vmem [shape: f32[2,440,4], index: 0, kind: input, shape index: {}]   ;;  %s5391_s1 = inlined_call_operand.vmem [shape: f32[80,1], index: 1, kind: input, shape index: {}]   ;;  %s5392_s2 = inlined_call_operand.vmem [shape: bf16[9,4,128], index: 2, kind: input, shape index: {}]   ;;  %s5393_s3 = inlined_call_operand.vmem [shape: f32[1,128], index: 3, kind: input, shape index: {}]   ;;  %s5394_s4 = inlined_call_operand.vmem [shape: bf16[9,128,128], index: 4, kind: input, shape index: {}]   ;;  %s5395_s5 = inlined_call_operand.vmem [shape: f32[1,128], index: 5, kind: input, shape index: {}]   ;;  %s5396_s6 = inlined_call_operand.vmem [shape: bf16[4,128], index: 6, kind: input, shape index: {}]   ;;  %s5397_s7 = inlined_call_operand.vmem [shape: f32[1,128], index: 7, kind: input, shape index: {}]   ;;  %s5398_s8 = inlined_call_operand.vmem [shape: bf16[2,80,128], index: 8, kind: output, shape index: {}]  }
   0x1 LB: > { %s3133_s28 = sadd.s32 4294967295, %s4270_s27   ;;  %p3137_p0 = scmp.ge.s32.totalorder %s4270_s27, 1  ;;  %s4270_s27 = sphi %s4320_s27, %s18_s27  }
   0x2   : > { %p262_p1 = scmp.lt.s32.totalorder %s4270_s27, 3 }
   0x4   : > { %p263_p2 = pnand %p3137_p0, %p262_p1 }
   0x5   : > { %p4331_p3 = scmp.lt.s32.totalorder (!%p263_p2), %s3133_s28, 1 }
   0x6   : > { %266 = sbr.rel (%p263_p2) target bundleno = 771 (0x303), region = 52 }
   0xb   : > { %v3140_v0 = vld [vmem:[%s5392_s2 + $0x2] sm:$0x3]  ;;  %vm356_vm0 = vcmask 1041408   ;;  %v4272_v1 = vmov 0.0   ;;  %s5401_s28 = smov (!%p4331_p3, %s3133_s28), 1  ;;  %vm4273_vm1 = vmmov 0  }
   0xc   : > { %3629 = vmatprep.subr.bf16.mxu0 %v4272_v1  ;;  %1531 = vst [vmem:[#allocation2] sm:$0xff] %v4272_v1  ;;  %1532 = vst [vmem:[#allocation2 + $0x8] sm:$0xff] %v4272_v1  ;;  %4173 = vmatprep.subr.bf16.mxu1 %v4272_v1  ;;  %v358_v2 = vsel %vm356_vm0, %v3140_v0, 0  ;;  %s4175_s10 = smul.u32 440, %s5401_s28  ;;  %v3151_v3 = vld [vmem:[%s5392_s2 + $0x4] sm:$0x3] }
   0xd   : > { %1533 = vst [vmem:[#allocation2 + $0x10] sm:$0xff] %v4272_v1  ;;  %1534 = vst [vmem:[#allocation2 + $0x18] sm:$0xff] %v4272_v1  ;;  %3630 = vmatpush3.bf16.msra.mxu0 %v358_v2  ;;  %4174 = vmatpush3.bf16.msra.mxu1 %v358_v2  ;;  %v322_v4 = vld [vmem:[%s5392_s2] sm:$0x3]  ;;  %vm340_vm2 = vcmask 31744   ;;  %v557_v10 = vsel %vm356_vm0, %v3151_v3, 0 }
   0xe   : > { %1535 = vst [vmem:[#allocation2 + $0x20] sm:$0xff] %v4272_v1  ;;  %1536 = vst [vmem:[#allocation2 + $0x28] sm:$0xff] %v4272_v1  ;;  %3631 = vmatprep.mubr.msk.bf16.mxu0 %vm4273_vm1, %v4272_v1  ;;  %3643 = vmatprep.mubr.msk.bf16.mxu1 %vm4273_vm1, %v4272_v1  ;;  %s4368_s15 = scalar_lea.vmem %s5390_s0, %s4175_s10  ;;  %v449_v12 = vsel %vm356_vm0, %v322_v4, 0  ;;  %v3157_v24 = vld [vmem:[%s5392_s2 + $0x6] sm:$0x3]  ;;  %s4176_s23 = smul.u32 40, %s5401_s28 }
   0xf   : > { %1537 = vst [vmem:[#allocation2 + $0x30] sm:$0xff] %v4272_v1  ;;  %1538 = vst [vmem:[#allocation2 + $0x38] sm:$0xff] %v4272_v1  ;;  %3673 = vmatprep.subr.bf16.mxu0 %v4272_v1  ;;  %3651 = vmatprep.subr.bf16.mxu1 %v4272_v1  ;;  %v323_v5 = vld [vmem:[%s4368_s15 + $0x6e] sm:$0xff]  ;;  %v324_v6 = vld [vmem:[%s4368_s15 + $0x76] sm:$0xff]  ;;  %v675_v26 = vsel %vm356_vm0, %v3157_v24, 0 }
  0x10   : > { %1539 = vst [vmem:[#allocation2 + $0x40] sm:$0xff] %v4272_v1  ;;  %1540 = vst [vmem:[#allocation2 + $0x48] sm:$0xff] %v4272_v1  ;;  %v329_v7 = vld [vmem:[%s4368_s15 + $0x9e] sm:$0xff]  ;;  %v333_v8 = vpack.c.bf16 %v324_v6, %v323_v5  ;;  %v330_v9 = vld [vmem:[%s4368_s15 + $0xa6] sm:$0xff]  ;;  %s5344_s26 = scalar_lea.vmem %s5398_s8, %s4176_s23 }
  0x11   : > { %1541 = vst [vmem:[#allocation2 + $0x50] sm:$0xff] %v4272_v1  ;;  %1542 = vst [vmem:[#allocation2 + $0x58] sm:$0xff] %v4272_v1  ;;  %v336_v11 = vpack.c.bf16 %v330_v9, %v329_v7  ;;  %v325_v13 = vld [vmem:[%s4368_s15 + $0x7e] sm:$0xff]  ;;  %v326_v14 = vld [vmem:[%s4368_s15 + $0x86] sm:$0xff] }
  0x12   : > { %1543 = vst [vmem:[#allocation2 + $0x60] sm:$0xff] %v4272_v1  ;;  %3632 = vmatmul.mubr.msk.bf16.vlgmr.msra.gmra.mxu0 %vm340_vm2, %v333_v8  ;;  %v331_v15 = vld [vmem:[%s4368_s15 + $0xae] sm:$0xff]  ;;  %v332_v16 = vld [vmem:[%s4368_s15 + $0xb6] sm:$0xff]  ;;  %v334_v17 = vpack.c.bf16 %v326_v14, %v325_v13  ;;  %v307_v21 = vld [vmem:[%s4368_s15] sm:$0xff] }
  0x13   : > { %3644 = vmatmul.mubr.msk.bf16.vlgmr.msra.gmra.mxu1 %vm340_vm2, %v336_v11  ;;  %3674 = vmatpush3.bf16.msra.mxu0 %v557_v10  ;;  %v337_v18 = vpack.c.bf16 %v332_v16, %v331_v15  ;;  %v327_v19 = vld [vmem:[%s4368_s15 + $0x8e] sm:$0xff]  ;;  %v328_v20 = vld [vmem:[%s4368_s15 + $0x96] sm:$0xff]  ;;  %v524_v27 = vld [vmem:[%s4368_s15 + $0x1] sm:$0xff]  ;;  %v4274_v16 = vmov 0  }
  0x14   : > { %3652 = vmatpush3.bf16.msra.mxu1 %v449_v12  ;;  %3635 = vmatprep.mubr.msk.bf16.mxu0 %vm4273_vm1, %v4272_v1  ;;  %v308_v22 = vld [vmem:[%s4368_s15 + $0x8] sm:$0xff]  ;;  %v335_v23 = vpack.c.bf16 %v328_v20, %v327_v19  ;;  %v309_v29 = vld [vmem:[%s4368_s15 + $0x10] sm:$0xff]  ;;  %v310_v30 = vld [vmem:[%s4368_s15 + $0x18] sm:$0xff] }
  0x15   : > { %3647 = vmatprep.mubr.msk.bf16.mxu1 %vm4273_vm1, %v4272_v1  ;;  %3695 = vmatprep.subr.bf16.mxu1 %v4272_v1  ;;  %v317_v25 = vpack.c.bf16 %v308_v22, %v307_v21  ;;  %v525_v28 = vld [vmem:[%s4368_s15 + $0x9] sm:$0xff]  ;;  %v318_v33 = vpack.c.bf16 %v310_v30, %v309_v29  ;;  %v526_v35 = vld [vmem:[%s4368_s15 + $0x11] sm:$0xff]  ;;  %v527_v36 = vld [vmem:[%s4368_s15 + $0x19] sm:$0xff] }
  0x16   : > { %3717 = vmatprep.subr.bf16.mxu0 %v4272_v1  ;;  %v3163_v31 = vld [vmem:[%s5392_s2 + $0x8] sm:$0x3]  ;;  %v534_v32 = vpack.c.bf16 %v525_v28, %v524_v27  ;;  %v311_v37 = vld [vmem:[%s4368_s15 + $0x20] sm:$0xff]  ;;  %v535_v39 = vpack.c.bf16 %v527_v36, %v526_v35  ;;  %v313_v43 = vld [vmem:[%s4368_s15 + $0x30] sm:$0xff]  ;;  %4188 = vset.pattern.permute.xlu0 %v4274_v16 }
  0x17   : > { %v793_v34 = vsel %vm356_vm0, %v3163_v31, 0  ;;  %v312_v38 = vld [vmem:[%s4368_s15 + $0x28] sm:$0xff]  ;;  %v314_v44 = vld [vmem:[%s4368_s15 + $0x38] sm:$0xff]  ;;  %v315_v49 = vld [vmem:[%s4368_s15 + $0x40] sm:$0xff]  ;;  %4189 = vset.pattern.permute.xlu1 %v4274_v16 }
  0x18   : > { %v319_v40 = vpack.c.bf16 %v312_v38, %v311_v37  ;;  %v528_v41 = vld [vmem:[%s4368_s15 + $0x21] sm:$0xff]  ;;  %v529_v42 = vld [vmem:[%s4368_s15 + $0x29] sm:$0xff]  ;;  %v320_v46 = vpack.c.bf16 %v314_v44, %v313_v43  ;;  %v530_v51 = vld [vmem:[%s4368_s15 + $0x31] sm:$0xff] }
  0x19   : > { %v536_v45 = vpack.c.bf16 %v529_v42, %v528_v41  ;;  %v3169_v47 = vld [vmem:[%s5392_s2 + $0xa] sm:$0x3]  ;;  %v3175_v48 = vld [vmem:[%s5392_s2 + $0xc] sm:$0x3]  ;;  %v531_v52 = vld [vmem:[%s4368_s15 + $0x39] sm:$0xff] }
  0x1a   : > { %3636 = vmatmul.mubr.msk.bf16.gmra.mxu0 %vm340_vm2, %v334_v17  ;;  %v316_v50 = vld [vmem:[%s4368_s15 + $0x48] sm:$0xff]  ;;  %v911_v53 = vsel %vm356_vm0, %v3169_v47, 0  ;;  %v1029_v54 = vsel %vm356_vm0, %v3175_v48, 0  ;;  %v537_v55 = vpack.c.bf16 %v531_v52, %v530_v51  ;;  %v642_v59 = vld [vmem:[%s4368_s15 + $0xdc] sm:$0xff]  ;;  %v761_v0 = vld [vmem:[%s4368_s15 + $0x152] sm:$0xff] }
  0x1b   : > { %3648 = vmatmul.mubr.msk.bf16.gmra.mxu1 %vm340_vm2, %v337_v18  ;;  %3639 = vmatprep.mubr.msk.bf16.mxu0 %vm4273_vm1, %v4272_v1  ;;  %v321_v56 = vpack.c.bf16 %v316_v50, %v315_v49  ;;  %v532_v57 = vld [vmem:[%s4368_s15 + $0x41] sm:$0xff]  ;;  %v533_v58 = vld [vmem:[%s4368_s15 + $0x49] sm:$0xff]  ;;  %v645_v3 = vld [vmem:[%s4368_s15 + $0xf4] sm:$0xff] }
  0x1c   : > { %3653 = vmatprep.mubr.msk.bf16.mxu1 %vm4273_vm1, %v4272_v1  ;;  %v643_v60 = vld [vmem:[%s4368_s15 + $0xe4] sm:$0xff]  ;;  %v538_v61 = vpack.c.bf16 %v533_v58, %v532_v57  ;;  %v644_v2 = vld [vmem:[%s4368_s15 + $0xec] sm:$0xff]  ;;  %v762_v6 = vld [vmem:[%s4368_s15 + $0x15a] sm:$0xff] }
  0x1d   : > { %v652_v62 = vpack.c.bf16 %v643_v60, %v642_v59  ;;  %v760_v63 = vld [vmem:[%s4368_s15 + $0x14a] sm:$0xff]  ;;  %v653_v5 = vpack.c.bf16 %v645_v3, %v644_v2  ;;  %v763_v7 = vld [vmem:[%s4368_s15 + $0x162] sm:$0xff]  ;;  %v765_v14 = vld [vmem:[%s4368_s15 + $0x172] sm:$0xff] }
  0x1e   : > { %v4480_v4 = vpack.c.bf16 %v761_v0, %v760_v63  ;;  %v646_v8 = vld [vmem:[%s4368_s15 + $0xfc] sm:$0xff]  ;;  %v647_v9 = vld [vmem:[%s4368_s15 + $0x104] sm:$0xff]  ;;  %v4494_v10 = vpack.c.bf16 %v763_v7, %v762_v6  ;;  %v648_v13 = vld [vmem:[%s4368_s15 + $0x10c] sm:$0xff] }
  0x1f   : > { %v654_v11 = vpack.c.bf16 %v647_v9, %v646_v8  ;;  %v764_v12 = vld [vmem:[%s4368_s15 + $0x16a] sm:$0xff]  ;;  %v649_v15 = vld [vmem:[%s4368_s15 + $0x114] sm:$0xff]  ;;  %v1377_v17 = vld [vmem:[%s5391_s1] sm:$0xff] }
  0x20   : > { %v4510_v18 = vpack.c.bf16 %v765_v14, %v764_v12  ;;  %1389 = vperm.xlu0 %4188, %v1377_v17   ;;  %v655_v19 = vpack.c.bf16 %v649_v15, %v648_v13  ;;  %v1378_v20 = vld [vmem:[%s5391_s1 + $0x8] sm:$0xff]  ;;  %v766_v21 = vld [vmem:[%s4368_s15 + $0x17a] sm:$0xff]  ;;  %v1383_v30 = vld [vmem:[%s5391_s1 + $0x30] sm:$0xff] }
  0x21   : > { %v767_v22 = vld [vmem:[%s4368_s15 + $0x182] sm:$0xff]  ;;  %v1380_v29 = vld [vmem:[%s5391_s1 + $0x18] sm:$0xff]  ;;  %v768_v31 = vld [vmem:[%s4368_s15 + $0x18a] sm:$0xff] }
  0x22   : > { %3640 = vmatmul.mubr.msk.bf16.gmra.mxu0 %vm340_vm2, %v335_v23  ;;  %v650_v23 = vld [vmem:[%s4368_s15 + $0x11c] sm:$0xff]  ;;  %v651_v24 = vld [vmem:[%s4368_s15 + $0x124] sm:$0xff]  ;;  %v4532_v27 = vpack.c.bf16 %v767_v22, %v766_v21  ;;  %v3181_v38 = vld [vmem:[%s5392_s2 + $0xe] sm:$0x3] }
  0x23   : > { %3654 = vmatmul.mubr.msk.bf16.vlgmr.msra.gmra.mxu1 %vm340_vm2, %v317_v25  ;;  %3675 = vmatprep.mubr.msk.bf16.mxu0 %vm4273_vm1, %v4272_v1  ;;  %v1379_v25 = vld [vmem:[%s5391_s1 + $0x10] sm:$0xff]  ;;  %v656_v28 = vpack.c.bf16 %v651_v24, %v650_v23  ;;  %v1382_v35 = vld [vmem:[%s5391_s1 + $0x28] sm:$0xff]  ;;  %v1385_v36 = vld [vmem:[%s5391_s1 + $0x40] sm:$0xff] }
  0x24   : > { %3696 = vmatpush3.bf16.msra.mxu1 %v675_v26  ;;  %3657 = vmatprep.mubr.msk.bf16.mxu1 %vm4273_vm1, %v4272_v1  ;;  %v1381_v26 = vld [vmem:[%s5391_s1 + $0x20] sm:$0xff]  ;;  %v1384_v41 = vld [vmem:[%s5391_s1 + $0x38] sm:$0xff]  ;;  %v996_v42 = vld [vmem:[%s4368_s15 + $0xa] sm:$0xff] }
  0x25   : > { %3739 = vmatprep.subr.bf16.mxu1 %v4272_v1  ;;  %1394 = vperm.xlu0 %4188, %v1378_v20   ;;  %v997_v43 = vld [vmem:[%s4368_s15 + $0x12] sm:$0xff]  ;;  %v1386_v47 = vld [vmem:[%s5391_s1 + $0x48] sm:$0xff]  ;;  %v998_v51 = vld [vmem:[%s4368_s15 + $0x1a] sm:$0xff] }
  0x26   : > { %1399 = vperm.xlu1 %4189, %v1379_v25   ;;  %v880_v44 = vld [vmem:[%s4368_s15 + $0xed] sm:$0xff]  ;;  %v1006_v48 = vpack.c.bf16 %v997_v43, %v996_v42  ;;  %v999_v52 = vld [vmem:[%s4368_s15 + $0x22] sm:$0xff]  ;;  %v885_v60 = vld [vmem:[%s4368_s15 + $0x115] sm:$0xff] }
  0x27   : > { %v1000_v57 = vld [vmem:[%s4368_s15 + $0x2a] sm:$0xff]  ;;  %v1001_v58 = vld [vmem:[%s4368_s15 + $0x32] sm:$0xff]  ;;  %v1002_v63 = vld [vmem:[%s4368_s15 + $0x3a] sm:$0xff] }
  0x28   : > { %v884_v59 = vld [vmem:[%s4368_s15 + $0x10d] sm:$0xff]  ;;  %v1003_v0 = vld [vmem:[%s4368_s15 + $0x42] sm:$0xff]  ;;  %v1114_v9 = vld [vmem:[%s4368_s15 + $0x78] sm:$0xff] }
  0x29   : > { %1409 = vperm.xlu0 %4188, %v1381_v26   ;;  %v886_v2 = vld [vmem:[%s4368_s15 + $0x11d] sm:$0xff]  ;;  %v887_v3 = vld [vmem:[%s4368_s15 + $0x125] sm:$0xff]  ;;  %v1005_v8 = vld [vmem:[%s4368_s15 + $0x52] sm:$0xff] }
  0x2a   : > { %3676 = vmatmul.mubr.msk.bf16.vlgmr.msra.gmra.mxu0 %vm340_vm2, %v534_v32  ;;  %1404 = vperm.xlu1 %4189, %v1380_v29   ;;  %v769_v32 = vld [vmem:[%s4368_s15 + $0x192] sm:$0xff]  ;;  %v892_v6 = vpack.c.bf16 %v887_v3, %v886_v2  ;;  %v1004_v7 = vld [vmem:[%s4368_s15 + $0x4a] sm:$0xff]  ;;  %v1234_v21 = vld [vmem:[%s4368_s15 + $0x1b] sm:$0xff] }
  0x2b   : > { %3658 = vmatmul.mubr.msk.bf16.gmra.mxu1 %vm340_vm2, %v318_v33  ;;  %3718 = vmatpush3.bf16.msra.mxu0 %v793_v34  ;;  %v878_v33 = vld [vmem:[%s4368_s15 + $0xdd] sm:$0xff]  ;;  %v879_v34 = vld [vmem:[%s4368_s15 + $0xe5] sm:$0xff]  ;;  %v4557_v37 = vpack.c.bf16 %v769_v32, %v768_v31  ;;  %v1010_v12 = vpack.c.bf16 %v1005_v8, %v1004_v7  ;;  %v1233_v15 = vld [vmem:[%s4368_s15 + $0x13] sm:$0xff] }
  0x2c   : > { %3661 = vmatprep.mubr.msk.bf16.mxu1 %vm4273_vm1, %v4272_v1  ;;  %3679 = vmatprep.mubr.msk.bf16.mxu0 %vm4273_vm1, %v4272_v1  ;;  %v1232_v14 = vld [vmem:[%s4368_s15 + $0xb] sm:$0xff]  ;;  %v1235_v22 = vld [vmem:[%s4368_s15 + $0x23] sm:$0xff]  ;;  %v1118_v23 = vld [vmem:[%s4368_s15 + $0x98] sm:$0xff] }
  0x2d   : > { %3761 = vmatprep.subr.bf16.mxu0 %v4272_v1  ;;  %1419 = vperm.xlu0 %4188, %v1383_v30   ;;  %v1116_v16 = vld [vmem:[%s4368_s15 + $0x88] sm:$0xff]  ;;  %v1117_v17 = vld [vmem:[%s4368_s15 + $0x90] sm:$0xff]  ;;  %v1119_v24 = vld [vmem:[%s4368_s15 + $0xa0] sm:$0xff]  ;;  %v1243_v25 = vpack.c.bf16 %v1235_v22, %v1234_v21 }
  0x2e   : > { %1414 = vperm.xlu1 %4189, %v1382_v35   ;;  %v1125_v20 = vpack.c.bf16 %v1117_v17, %v1116_v16  ;;  %v1126_v26 = vpack.c.bf16 %v1119_v24, %v1118_v23  ;;  %v1237_v29 = vld [vmem:[%s4368_s15 + $0x33] sm:$0xff]  ;;  %v1120_v30 = vld [vmem:[%s4368_s15 + $0xa8] sm:$0xff] }
  0x2f   : > { %v1121_v31 = vld [vmem:[%s4368_s15 + $0xb0] sm:$0xff]  ;;  %v1239_v35 = vld [vmem:[%s4368_s15 + $0x43] sm:$0xff] }
  0x30   : > { %v1241_v42 = vld [vmem:[%s4368_s15 + $0x53] sm:$0xff] }
  0x31   : > { %1429 = vperm.xlu0 %4188, %v1385_v36   ;;  %v1122_v36 = vld [vmem:[%s4368_s15 + $0xb8] sm:$0xff] }
  0x32   : > { %3680 = vmatmul.mubr.msk.bf16.gmra.mxu0 %vm340_vm2, %v535_v39  ;;  %v888_v39 = vpack.c.bf16 %v879_v34, %v878_v33  ;;  %1424 = vperm.xlu1 %4189, %v1384_v41   ;;  %v1127_v33 = vpack.c.bf16 %v1121_v31, %v1120_v30  ;;  %v1238_v34 = vld [vmem:[%s4368_s15 + $0x3b] sm:$0xff]  ;;  %v1240_v41 = vld [vmem:[%s4368_s15 + $0x4b] sm:$0xff] }
  0x33   : > { %3662 = vmatmul.mubr.msk.bf16.gmra.mxu1 %vm340_vm2, %v319_v40  ;;  %3683 = vmatprep.mubr.msk.bf16.mxu0 %vm4273_vm1, %v4272_v1  ;;  %v1147_v40 = vsel %vm356_vm0, %v3181_v38, 0  ;;  %v1123_v38 = vld [vmem:[%s4368_s15 + $0xc0] sm:$0xff]  ;;  %v1246_v43 = vpack.c.bf16 %v1241_v42, %v1240_v41 }
  0x34   : > { %3665 = vmatprep.mubr.msk.bf16.mxu1 %vm4273_vm1, %v4272_v1 }
  0x36   : > { %1434 = vperm.xlu1 %4189, %v1386_v47  }
  0x3a   : > { %3684 = vmatmul.mubr.msk.bf16.gmra.mxu0 %vm340_vm2, %v536_v45  ;;  %v881_v45 = vld [vmem:[%s4368_s15 + $0xf5] sm:$0xff] }
  0x3b   : > { %3666 = vmatmul.mubr.msk.bf16.gmra.mxu1 %vm340_vm2, %v320_v46  ;;  %3687 = vmatprep.mubr.msk.bf16.mxu0 %vm4273_vm1, %v4272_v1  ;;  %v3187_v46 = vld [vmem:[%s5392_s2 + $0x10] sm:$0x3]  ;;  %v889_v49 = vpack.c.bf16 %v881_v45, %v880_v44  ;;  %v1447_v44 = vld [vmem:[%s5396_s6] sm:$0x3] }
  0x3c   : > { %3669 = vmatprep.mubr.msk.bf16.mxu1 %vm4273_vm1, %v4272_v1  ;;  %v1265_v50 = vsel %vm356_vm0, %v3187_v46, 0  ;;  %v1456_v45 = vsel %vm356_vm0, %v1447_v44, 0  ;;  %v4190_v46 = vld [vmem:[%s5394_s4 + $0x78] sm:$0xff]  }
  0x42   : > { %3688 = vmatmul.mubr.msk.bf16.gmra.mxu0 %vm340_vm2, %v537_v55  ;;  %v1007_v55 = vpack.c.bf16 %v999_v52, %v998_v51  ;;  %v4192_v52 = vld [vmem:[%s5394_s4 + $0x38] sm:$0xff]  }
  0x43   : > { %3670 = vmatmul.mubr.msk.bf16.gmra.mxu1 %vm340_vm2, %v321_v56  ;;  %3691 = vmatprep.mubr.msk.bf16.mxu0 %vm4273_vm1, %v4272_v1 }
  0x44   : > { %3697 = vmatprep.mubr.msk.bf16.mxu1 %vm4273_vm1, %v4272_v1 }
  0x4a   : > { %3692 = vmatmul.mubr.msk.bf16.gmra.mxu0 %vm340_vm2, %v538_v61  ;;  %v1008_v61 = vpack.c.bf16 %v1001_v58, %v1000_v57 }
  0x4b   : > { %3698 = vmatmul.mubr.msk.bf16.vlgmr.msra.gmra.mxu1 %vm340_vm2, %v652_v62  ;;  %3719 = vmatprep.mubr.msk.bf16.mxu0 %vm4273_vm1, %v4272_v1  ;;  %v891_v62 = vpack.c.bf16 %v885_v60, %v884_v59 }
  0x4c   : > { %3740 = vmatpush3.bf16.msra.mxu1 %v911_v53  ;;  %3701 = vmatprep.mubr.msk.bf16.mxu1 %vm4273_vm1, %v4272_v1  ;;  %v882_v53 = vld [vmem:[%s4368_s15 + $0xfd] sm:$0xff] }
  0x4d   : > { %3783 = vmatprep.subr.bf16.mxu1 %v4272_v1 }
  0x52   : > { %3720 = vmatmul.mubr.msk.bf16.vlgmr.msra.gmra.mxu0 %vm340_vm2, %v4480_v4 }
  0x53   : > { %3702 = vmatmul.mubr.msk.bf16.gmra.mxu1 %vm340_vm2, %v653_v5  ;;  %3762 = vmatpush3.bf16.msra.mxu0 %v1029_v54  ;;  %v883_v54 = vld [vmem:[%s4368_s15 + $0x105] sm:$0xff]  ;;  %v1009_v5 = vpack.c.bf16 %v1003_v0, %v1002_v63 }
  0x54   : > { %3705 = vmatprep.mubr.msk.bf16.mxu1 %vm4273_vm1, %v4272_v1  ;;  %3723 = vmatprep.mubr.msk.bf16.mxu0 %vm4273_vm1, %v4272_v1  ;;  %v890_v56 = vpack.c.bf16 %v883_v54, %v882_v53 }
  0x55   : > { %3805 = vmatprep.subr.bf16.mxu0 %v4272_v1 }
  0x5a   : > { %3724 = vmatmul.mubr.msk.bf16.gmra.mxu0 %vm340_vm2, %v4494_v10 }
  0x5b   : > { %3706 = vmatmul.mubr.msk.bf16.gmra.mxu1 %vm340_vm2, %v654_v11  ;;  %3727 = vmatprep.mubr.msk.bf16.mxu0 %vm4273_vm1, %v4272_v1  ;;  %v1115_v11 = vld [vmem:[%s4368_s15 + $0x80] sm:$0xff] }
  0x5c   : > { %3709 = vmatprep.mubr.msk.bf16.mxu1 %vm4273_vm1, %v4272_v1  ;;  %v1124_v13 = vpack.c.bf16 %v1115_v11, %v1114_v9 }
  0x62   : > { %3728 = vmatmul.mubr.msk.bf16.gmra.mxu0 %vm340_vm2, %v4510_v18 }
  0x63   : > { %3710 = vmatmul.mubr.msk.bf16.gmra.mxu1 %vm340_vm2, %v655_v19  ;;  %3731 = vmatprep.mubr.msk.bf16.mxu0 %vm4273_vm1, %v4272_v1  ;;  %v1242_v19 = vpack.c.bf16 %v1233_v15, %v1232_v14  ;;  %v4743_v15 = vld [vmem:[#allocation2] sm:$0xff] }
  0x64   : > { %3713 = vmatprep.mubr.msk.bf16.mxu1 %vm4273_vm1, %v4272_v1 }
  0x6a   : > { %3732 = vmatmul.mubr.msk.bf16.gmra.mxu0 %vm340_vm2, %v4532_v27 }
  0x6b   : > { %3714 = vmatmul.mubr.msk.bf16.gmra.mxu1 %vm340_vm2, %v656_v28  ;;  %3735 = vmatprep.mubr.msk.bf16.mxu0 %vm4273_vm1, %v4272_v1  ;;  %v1236_v28 = vld [vmem:[%s4368_s15 + $0x2b] sm:$0xff] }
  0x6c   : > { %3741 = vmatprep.mubr.msk.bf16.mxu1 %vm4273_vm1, %v4272_v1  ;;  %v1244_v32 = vpack.c.bf16 %v1237_v29, %v1236_v28  ;;  %v4203_v28 = vld [vmem:[%s5394_s4 + $0x8] sm:$0xff]  }
  0x72   : > { %3736 = vmatmul.mubr.msk.bf16.gmra.mxu0 %vm340_vm2, %v4557_v37 }
  0x73   : > { %3742 = vmatmul.mubr.msk.bf16.vlgmr.msra.gmra.mxu1 %vm340_vm2, %v888_v39  ;;  %3763 = vmatprep.mubr.msk.bf16.mxu0 %vm4273_vm1, %v4272_v1  ;;  %v1245_v39 = vpack.c.bf16 %v1239_v35, %v1238_v34  ;;  %v4204_v35 = vld [vmem:[%s5394_s4 + $0x40] sm:$0xff]  }
  0x74   : > { %3784 = vmatpush3.bf16.msra.mxu1 %v1147_v40  ;;  %3745 = vmatprep.mubr.msk.bf16.mxu1 %vm4273_vm1, %v4272_v1  ;;  %v1128_v40 = vpack.c.bf16 %v1123_v38, %v1122_v36  ;;  %v4205_v36 = vld [vmem:[%s5394_s4] sm:$0xff]  }
  0x75   : > { %3827 = vmatprep.subr.bf16.mxu1 %v4272_v1 }
  0x7a   : > { %3764 = vmatmul.mubr.msk.bf16.vlgmr.msra.gmra.mxu0 %vm340_vm2, %v1006_v48 }
  0x7b   : > { %3746 = vmatmul.mubr.msk.bf16.gmra.mxu1 %vm340_vm2, %v889_v49  ;;  %3806 = vmatpush3.bf16.msra.mxu0 %v1265_v50  ;;  %v4191_v50 = vld [vmem:[%s5394_s4 + $0x70] sm:$0xff]  }
  0x7c   : > { %3749 = vmatprep.mubr.msk.bf16.mxu1 %vm4273_vm1, %v4272_v1  ;;  %3767 = vmatprep.mubr.msk.bf16.mxu0 %vm4273_vm1, %v4272_v1 }
  0x7d   : > { %3849 = vmatprep.subr.bf16.mxu0 %v4272_v1 }
  0x82   : > { %3768 = vmatmul.mubr.msk.bf16.gmra.mxu0 %vm340_vm2, %v1007_v55  ;;  %v4193_v55 = vld [vmem:[%s5394_s4 + $0x68] sm:$0xff]  }
  0x83   : > { %3750 = vmatmul.mubr.msk.bf16.gmra.mxu1 %vm340_vm2, %v890_v56  ;;  %3771 = vmatprep.mubr.msk.bf16.mxu0 %vm4273_vm1, %v4272_v1 }
  0x84   : > { %3753 = vmatprep.mubr.msk.bf16.mxu1 %vm4273_vm1, %v4272_v1 }
  0x8a   : > { %3772 = vmatmul.mubr.msk.bf16.gmra.mxu0 %vm340_vm2, %v1008_v61  ;;  %v4195_v61 = vld [vmem:[%s5394_s4 + $0x60] sm:$0xff]  }
  0x8b   : > { %3754 = vmatmul.mubr.msk.bf16.gmra.mxu1 %vm340_vm2, %v891_v62  ;;  %3775 = vmatprep.mubr.msk.bf16.mxu0 %vm4273_vm1, %v4272_v1  ;;  %v4196_v62 = vld [vmem:[%s5394_s4 + $0x28] sm:$0xff]  }
  0x8c   : > { %3757 = vmatprep.mubr.msk.bf16.mxu1 %vm4273_vm1, %v4272_v1 }
  0x92   : > { %3776 = vmatmul.mubr.msk.bf16.gmra.mxu0 %vm340_vm2, %v1009_v5  ;;  %v4197_v5 = vld [vmem:[%s5394_s4 + $0x58] sm:$0xff]  }
  0x93   : > { %3758 = vmatmul.mubr.msk.bf16.gmra.mxu1 %vm340_vm2, %v892_v6  ;;  %3779 = vmatprep.mubr.msk.bf16.mxu0 %vm4273_vm1, %v4272_v1  ;;  %v4198_v6 = vld [vmem:[%s5394_s4 + $0x20] sm:$0xff]  }
  0x94   : > { %3785 = vmatprep.mubr.msk.bf16.mxu1 %vm4273_vm1, %v4272_v1 }
  0x9a   : > { %3780 = vmatmul.mubr.msk.bf16.gmra.mxu0 %vm340_vm2, %v1010_v12  ;;  %v4200_v12 = vld [vmem:[%s5394_s4 + $0x18] sm:$0xff]  }
  0x9b   : > { %3786 = vmatmul.mubr.msk.bf16.vlgmr.msra.gmra.mxu1 %vm340_vm2, %v1124_v13  ;;  %3807 = vmatprep.mubr.msk.bf16.mxu0 %vm4273_vm1, %v4272_v1 }
  0x9c   : > { %3789 = vmatprep.mubr.msk.bf16.mxu1 %vm4273_vm1, %v4272_v1  ;;  %3828 = vmatpush3.bf16.msra.mxu1 %v1456_v45 }
  0x9d   : > { %3885 = vmatprep.subr.bf16.mxu1 %v4272_v1 }
  0xa2   : > { %3808 = vmatmul.mubr.msk.bf16.vlgmr.msra.gmra.mxu0 %vm340_vm2, %v1242_v19  ;;  %v4199_v19 = vld [vmem:[%s5394_s4 + $0x50] sm:$0xff]  }
  0xa3   : > { %3790 = vmatmul.mubr.msk.bf16.gmra.mxu1 %vm340_vm2, %v1125_v20  ;;  %3811 = vmatprep.mubr.msk.bf16.mxu0 %vm4273_vm1, %v4272_v1 }
  0xa4   : > { %3793 = vmatprep.mubr.msk.bf16.mxu1 %vm4273_vm1, %v4272_v1  ;;  %3850 = vmatpush3.bf16.msra.mxu0 %v4190_v46 }
  0xa5   : > { %3851 = vmatprep.subr.bf16.mxu0 %v4272_v1 }
  0xa8   : > { %3852 = vmatpush3.bf16.msra.mxu0 %v4191_v50 }
  0xa9   : > { %3853 = vmatprep.subr.bf16.mxu0 %v4272_v1 }
  0xaa   : > { %3812 = vmatmul.mubr.msk.bf16.gmra.mxu0 %vm340_vm2, %v1243_v25 }
  0xab   : > { %3794 = vmatmul.mubr.msk.bf16.gmra.mxu1 %vm340_vm2, %v1126_v26  ;;  %3815 = vmatprep.mubr.msk.bf16.mxu0 %vm4273_vm1, %v4272_v1  ;;  %v4202_v26 = vld [vmem:[%s5394_s4 + $0x48] sm:$0xff]  }
  0xac   : > { %3797 = vmatprep.mubr.msk.bf16.mxu1 %vm4273_vm1, %v4272_v1  ;;  %3854 = vmatpush3.bf16.msra.mxu0 %v4193_v55 }
  0xad   : > { %3855 = vmatprep.subr.bf16.mxu0 %v4272_v1 }
  0xb0   : > { %3856 = vmatpush3.bf16.msra.mxu0 %v4195_v61 }
  0xb1   : > { %3857 = vmatprep.subr.bf16.mxu0 %v4272_v1 }
  0xb2   : > { %3816 = vmatmul.mubr.msk.bf16.gmra.mxu0 %vm340_vm2, %v1244_v32 }
  0xb3   : > { %3798 = vmatmul.mubr.msk.bf16.gmra.mxu1 %vm340_vm2, %v1127_v33  ;;  %3819 = vmatprep.mubr.msk.bf16.mxu0 %vm4273_vm1, %v4272_v1 }
  0xb4   : > { %3801 = vmatprep.mubr.msk.bf16.mxu1 %vm4273_vm1, %v4272_v1  ;;  %3858 = vmatpush3.bf16.msra.mxu0 %v4197_v5 }
  0xb5   : > { %3859 = vmatprep.subr.bf16.mxu0 %v4272_v1 }
  0xb8   : > { %3860 = vmatpush3.bf16.msra.mxu0 %v4199_v19 }
  0xb9   : > { %3861 = vmatprep.subr.bf16.mxu0 %v4743_v15 }
  0xba   : > { %3820 = vmatmul.mubr.msk.bf16.gmra.mxu0 %vm340_vm2, %v1245_v39 }
  0xbb   : > { %3802 = vmatmul.mubr.msk.bf16.gmra.mxu1 %vm340_vm2, %v1128_v40  ;;  %3823 = vmatprep.mubr.msk.bf16.mxu0 %vm4273_vm1, %v4272_v1 }
  0xbc   : > { %3829 = vmatprep.mubr.msk.bf16.mxu1 %vm4273_vm1, %v4272_v1  ;;  %3862 = vmatpush3.bf16.msra.mxu0 %v4202_v26 }
  0xbd   : > { %3863 = vmatprep.subr.bf16.mxu0 %v4743_v15 }
  0xc0   : > { %3864 = vmatpush3.bf16.msra.mxu0 %v4204_v35 }
  0xc1   : > { %3921 = vmatprep.subr.bf16.mxu0 %v4743_v15 }
  0xc2   : > { %3824 = vmatmul.mubr.msk.bf16.gmra.mxu0 %vm340_vm2, %v1246_v43 }
  0xc3   : > { %3865 = vmatprep.mubr.msk.bf16.mxu0 %vm4273_vm1, %v4272_v1  ;;  %3830 = vmatmul.mubr.msk.bf16.vlgmr.msra.gmra.mxu1 %vm340_vm2, %v4480_v4 }
  0xc4   : > { %3833 = vmatprep.mubr.msk.bf16.mxu1 %vm4273_vm1, %v4272_v1  ;;  %3886 = vmatpush3.bf16.msra.mxu1 %v4192_v52 }
  0xc5   : > { %3887 = vmatprep.subr.bf16.mxu1 %v4272_v1 }
  0xcb   : > { %3834 = vmatmul.mubr.msk.bf16.gmra.mxu1 %vm340_vm2, %v4494_v10  ;;  %v4194_v10 = vld [vmem:[%s5394_s4 + $0x30] sm:$0xff]  }
  0xcc   : > { %3837 = vmatprep.mubr.msk.bf16.mxu1 %vm4273_vm1, %v4272_v1  ;;  %3888 = vmatpush3.bf16.msra.mxu1 %v4194_v10 }
  0xcd   : > { %3889 = vmatprep.subr.bf16.mxu1 %v4272_v1 }
  0xd0   : > { %3890 = vmatpush3.bf16.msra.mxu1 %v4196_v62 }
  0xd1   : > { %3891 = vmatprep.subr.bf16.mxu1 %v4272_v1 }
  0xd2   : > { %v394_v47 = vpop.f32.mrf.mxu0 }
  0xd3   : > { %v4690_v48 = vpop.f32.mrf.mxu1  ;;  %3838 = vmatmul.mubr.msk.bf16.gmra.mxu1 %vm340_vm2, %v4510_v18 }
  0xd4   : > { %v3633_v49 = vpop.f32.mrf.mxu0  ;;  %3841 = vmatprep.mubr.msk.bf16.mxu1 %vm4273_vm1, %v4272_v1  ;;  %3892 = vmatpush3.bf16.msra.mxu1 %v4198_v6 }
  0xd5   : > { %v3645_v51 = vpop.f32.mrf.mxu1  ;;  %3893 = vmatprep.subr.bf16.mxu1 %v4272_v1 }
  0xd6   : > { %v397_v4 = vpop.f32.mrf.mxu0 }
  0xd7   : > { %v4700_v53 = vpop.f32.mrf.mxu1 }
  0xd8   : > { %v3634_v54 = vpop.f32.mrf.mxu0  ;;  %3894 = vmatpush3.bf16.msra.mxu1 %v4200_v12 }
  0xd9   : > { %v3646_v56 = vpop.f32.mrf.mxu1  ;;  %3895 = vmatprep.subr.bf16.mxu1 %v4743_v15 }
  0xda   : > { %v402_v57 = vpop.f32.mrf.mxu0 }
  0xdb   : > { %v4712_v58 = vpop.f32.mrf.mxu1  ;;  %3842 = vmatmul.mubr.msk.bf16.gmra.mxu1 %vm340_vm2, %v4532_v27  ;;  %v4201_v27 = vld [vmem:[%s5394_s4 + $0x10] sm:$0xff]  }
  0xdc   : > { %v3637_v59 = vpop.f32.mrf.mxu0  ;;  %3845 = vmatprep.mubr.msk.bf16.mxu1 %vm4273_vm1, %v4743_v15  ;;  %3896 = vmatpush3.bf16.msra.mxu1 %v4201_v27 }
  0xdd   : > { %v3649_v60 = vpop.f32.mrf.mxu1  ;;  %3897 = vmatprep.subr.bf16.mxu1 %v4743_v15 }
  0xde   : > { %v405_v63 = vpop.f32.mrf.mxu0 }
  0xdf   : > { %v4724_v0 = vpop.f32.mrf.mxu1 }
  0xe0   : > { %v3638_v2 = vpop.f32.mrf.mxu0  ;;  %3898 = vmatpush3.bf16.msra.mxu1 %v4203_v28 }
  0xe1   : > { %v3650_v3 = vpop.f32.mrf.mxu1  ;;  %3899 = vmatprep.subr.bf16.mxu1 %v4743_v15 }
  0xe2   : > { %v410_v18 = vpop.f32.mrf.mxu0 }
  0xe3   : > { %v485_v7 = vpop.f32.mrf.mxu1  ;;  %3846 = vmatmul.mubr.msk.bf16.gmra.mxu1 %vm340_vm2, %v4557_v37 }
  0xe4   : > { %v486_v8 = vadd.f32 %v485_v7, %v394_v47  ;;  %v3641_v9 = vpop.f32.mrf.mxu0  ;;  %3901 = vmatprep.mubr.msk.bf16.mxu1 %vm4273_vm1, %v4743_v15  ;;  %3900 = vmatpush3.bf16.msra.mxu1 %v4205_v36 }
  0xe5   : > { %v3655_v11 = vpop.f32.mrf.mxu1  ;;  %3957 = vmatprep.subr.bf16.mxu1 %v4743_v15 }
  0xe6   : > { %v413_v13 = vpop.f32.mrf.mxu0 }
  0xe7   : > { %v488_v14 = vpop.f32.mrf.mxu1 }
  0xe8   : > { %v489_v16 = vadd.f32 %v488_v14, %v397_v4  ;;  %v3642_v17 = vpop.f32.mrf.mxu0 }
  0xe9   : > { %v3656_v1 = vpop.f32.mrf.mxu1 }
  0xea   : > { %v593_v20 = vpop.f32.mrf.mxu0 }
  0xeb   : > { %v493_v21 = vpop.f32.mrf.mxu1  ;;  %v4754_v22 = vadd.f32 %v593_v20, %v486_v8 }
  0xec   : > { %v494_v23 = vadd.f32 %v493_v21, %v402_v57  ;;  %v3677_v24 = vpop.f32.mrf.mxu0 }
  0xed   : > { %v3659_v25 = vpop.f32.mrf.mxu1 }
  0xee   : > { %v596_v29 = vpop.f32.mrf.mxu0 }
  0xef   : > { %v496_v30 = vpop.f32.mrf.mxu1  ;;  %v633_v31 = vadd.f32 %v596_v29, %v489_v16 }
  0xf0   : > { %v497_v32 = vadd.f32 %v496_v30, %v405_v63  ;;  %v3678_v33 = vpop.f32.mrf.mxu0 }
  0xf1   : > { %v3660_v34 = vpop.f32.mrf.mxu1 }
  0xf2   : > { %v601_v37 = vpop.f32.mrf.mxu0 }
  0xf3   : > { %v501_v38 = vpop.f32.mrf.mxu1  ;;  %v634_v39 = vadd.f32 %v601_v37, %v494_v23 }
  0xf4   : > { %v502_v40 = vadd.f32 %v501_v38, %v410_v18  ;;  %v3681_v41 = vpop.f32.mrf.mxu0 }
  0xf5   : > { %v3663_v42 = vpop.f32.mrf.mxu1 }
  0xf6   : > { %v604_v43 = vpop.f32.mrf.mxu0 }
  0xf7   : > { %v504_v44 = vpop.f32.mrf.mxu1  ;;  %v635_v45 = vadd.f32 %v604_v43, %v497_v32 }
  0xf8   : > { %v505_v46 = vadd.f32 %v504_v44, %v413_v13  ;;  %v3682_v47 = vpop.f32.mrf.mxu0 }
  0xf9   : > { %v3664_v49 = vpop.f32.mrf.mxu1 }
  0xfa   : > { %v609_v50 = vpop.f32.mrf.mxu0 }
  0xfb   : > { %v509_v51 = vpop.f32.mrf.mxu1  ;;  %v636_v52 = vadd.f32 %v609_v50, %v502_v40 }
  0xfc   : > { %v510_v4 = vadd.f32 %v509_v51, %v4690_v48  ;;  %v3685_v54 = vpop.f32.mrf.mxu0 }
  0xfd   : > { %v3667_v55 = vpop.f32.mrf.mxu1 }
  0xfe   : > { %v612_v56 = vpop.f32.mrf.mxu0 }
  0xff   : > { %v512_v10 = vpop.f32.mrf.mxu1  ;;  %v637_v57 = vadd.f32 %v612_v56, %v505_v46 }
 0x100   : > { %v513_v59 = vadd.f32 %v512_v10, %v4700_v53  ;;  %v3686_v60 = vpop.f32.mrf.mxu0 }
 0x101   : > { %v3668_v61 = vpop.f32.mrf.mxu1 }
 0x102   : > { %v617_v62 = vpop.f32.mrf.mxu0 }
 0x103   : > { %v517_v63 = vpop.f32.mrf.mxu1  ;;  %v638_v2 = vadd.f32 %v617_v62, %v510_v4 }
 0x104   : > { %v518_v3 = vadd.f32 %v517_v63, %v4712_v58  ;;  %v3689_v5 = vpop.f32.mrf.mxu0 }
 0x105   : > { %v3671_v6 = vpop.f32.mrf.mxu1 }
 0x106   : > { %v620_v18 = vpop.f32.mrf.mxu0 }
 0x107   : > { %v520_v7 = vpop.f32.mrf.mxu1  ;;  %v639_v8 = vadd.f32 %v620_v18, %v513_v59 }
 0x108   : > { %v521_v48 = vadd.f32 %v520_v7, %v4724_v0  ;;  %v3690_v9 = vpop.f32.mrf.mxu0 }
 0x109   : > { %v3672_v11 = vpop.f32.mrf.mxu1 }
 0x10a   : > { %v625_v12 = vpop.f32.mrf.mxu0 }
 0x10b   : > { %v640_v13 = vadd.f32 %v625_v12, %v518_v3  ;;  %v711_v14 = vpop.f32.mrf.mxu1 }
 0x10c   : > { %v750_v53 = vadd.f32 %v711_v14, %v4754_v22  ;;  %v3693_v16 = vpop.f32.mrf.mxu0 }
 0x10d   : > { %v3699_v17 = vpop.f32.mrf.mxu1 }
 0x10e   : > { %v628_v1 = vpop.f32.mrf.mxu0 }
 0x10f   : > { %v641_v19 = vadd.f32 %v628_v1, %v521_v48  ;;  %v714_v27 = vpop.f32.mrf.mxu1 }
 0x110   : > { %v751_v58 = vadd.f32 %v714_v27, %v633_v31  ;;  %v3694_v20 = vpop.f32.mrf.mxu0 }
 0x111   : > { %v3700_v21 = vpop.f32.mrf.mxu1 }
 0x112   : > { %v829_v23 = vpop.f32.mrf.mxu0 }
 0x113   : > { %v719_v24 = vpop.f32.mrf.mxu1  ;;  %v4783_v25 = vadd.f32 %v829_v23, %v750_v53 }
 0x114   : > { %v752_v0 = vadd.f32 %v719_v24, %v634_v39  ;;  %v3721_v26 = vpop.f32.mrf.mxu0 }
 0x115   : > { %v3703_v28 = vpop.f32.mrf.mxu1 }
 0x116   : > { %v832_v29 = vpop.f32.mrf.mxu0 }
 0x117   : > { %v722_v30 = vpop.f32.mrf.mxu1  ;;  %v4785_v32 = vadd.f32 %v832_v29, %v751_v58 }
 0x118   : > { %v753_v22 = vadd.f32 %v722_v30, %v635_v45  ;;  %v3722_v33 = vpop.f32.mrf.mxu0 }
 0x119   : > { %v3704_v34 = vpop.f32.mrf.mxu1 }
 0x11a   : > { %v837_v35 = vpop.f32.mrf.mxu0 }
 0x11b   : > { %v727_v36 = vpop.f32.mrf.mxu1  ;;  %v4787_v37 = vadd.f32 %v837_v35, %v752_v0 }
 0x11c   : > { %v754_v31 = vadd.f32 %v727_v36, %v636_v52  ;;  %v3725_v38 = vpop.f32.mrf.mxu0 }
 0x11d   : > { %v3707_v40 = vpop.f32.mrf.mxu1 }
 0x11e   : > { %v840_v41 = vpop.f32.mrf.mxu0 }
 0x11f   : > { %v730_v42 = vpop.f32.mrf.mxu1  ;;  %v4789_v43 = vadd.f32 %v840_v41, %v753_v22 }
 0x120   : > { %v755_v39 = vadd.f32 %v730_v42, %v637_v57  ;;  %v3726_v44 = vpop.f32.mrf.mxu0 }
 0x121   : > { %v3708_v46 = vpop.f32.mrf.mxu1 }
 0x122   : > { %v845_v47 = vpop.f32.mrf.mxu0 }
 0x123   : > { %v735_v49 = vpop.f32.mrf.mxu1  ;;  %v4791_v50 = vadd.f32 %v845_v47, %v754_v31 }
 0x124   : > { %v756_v45 = vadd.f32 %v735_v49, %v638_v2  ;;  %v3729_v51 = vpop.f32.mrf.mxu0 }
 0x125   : > { %v3711_v4 = vpop.f32.mrf.mxu1 }
 0x126   : > { %v848_v54 = vpop.f32.mrf.mxu0 }
 0x127   : > { %v738_v55 = vpop.f32.mrf.mxu1  ;;  %v4793_v56 = vadd.f32 %v848_v54, %v755_v39 }
 0x128   : > { %v757_v52 = vadd.f32 %v738_v55, %v639_v8  ;;  %v3730_v10 = vpop.f32.mrf.mxu0 }
 0x129   : > { %v3712_v59 = vpop.f32.mrf.mxu1 }
 0x12a   : > { %v853_v60 = vpop.f32.mrf.mxu0 }
 0x12b   : > { %v743_v61 = vpop.f32.mrf.mxu1  ;;  %v4795_v62 = vadd.f32 %v853_v60, %v756_v45 }
 0x12c   : > { %v758_v57 = vadd.f32 %v743_v61, %v640_v13  ;;  %v3733_v63 = vpop.f32.mrf.mxu0 }
 0x12d   : > { %v3715_v3 = vpop.f32.mrf.mxu1 }
 0x12e   : > { %v856_v5 = vpop.f32.mrf.mxu0 }
 0x12f   : > { %v746_v6 = vpop.f32.mrf.mxu1  ;;  %v4797_v18 = vadd.f32 %v856_v5, %v757_v52 }
 0x130   : > { %v759_v2 = vadd.f32 %v746_v6, %v641_v19  ;;  %v3734_v7 = vpop.f32.mrf.mxu0 }
 0x131   : > { %v3716_v48 = vpop.f32.mrf.mxu1 }
 0x132   : > { %v861_v9 = vpop.f32.mrf.mxu0 }
 0x133   : > { %v4799_v11 = vadd.f32 %v861_v9, %v758_v57  ;;  %v947_v8 = vpop.f32.mrf.mxu1  ;;  %v4832_v9 = vld [vmem:[%s5393_s3] ss:$0 sm:$0xff] }
 0x134   : > { %v3737_v12 = vpop.f32.mrf.mxu0  ;;  %v986_v60 = vadd.f32 %v947_v8, %v4783_v25 }
 0x135   : > { %v3743_v14 = vpop.f32.mrf.mxu1 }
 0x136   : > { %v864_v53 = vpop.f32.mrf.mxu0 }
 0x137   : > { %v4801_v16 = vadd.f32 %v864_v53, %v759_v2  ;;  %v950_v17 = vpop.f32.mrf.mxu1 }
 0x138   : > { %v3738_v13 = vpop.f32.mrf.mxu0  ;;  %v987_v6 = vadd.f32 %v950_v17, %v4785_v32 }
 0x139   : > { %v3744_v1 = vpop.f32.mrf.mxu1 }
 0x13a   : > { %v1065_v27 = vpop.f32.mrf.mxu0 }
 0x13b   : > { %v955_v58 = vpop.f32.mrf.mxu1  ;;  %v1104_v63 = vadd.f32 %v1065_v27, %v986_v60 }
 0x13c   : > { %v3765_v20 = vpop.f32.mrf.mxu0  ;;  %v988_v8 = vadd.f32 %v955_v58, %v4787_v37 }
 0x13d   : > { %v3747_v21 = vpop.f32.mrf.mxu1  ;;  %v1390_v20 = vpop.permute.xlu0 %1389 }
 0x13e   : > { %v1068_v23 = vpop.f32.mrf.mxu0 }
 0x13f   : > { %v958_v19 = vpop.f32.mrf.mxu1  ;;  %v1105_v12 = vadd.f32 %v1068_v23, %v987_v6 }
 0x140   : > { %v3766_v24 = vpop.f32.mrf.mxu0 }
 0x141   : > { %v3748_v0 = vpop.f32.mrf.mxu1 }
 0x142   : > { %v1073_v26 = vpop.f32.mrf.mxu0 }
 0x143   : > { %v4803_v28 = vpop.f32.mrf.mxu1  ;;  %v1106_v17 = vadd.f32 %v1073_v26, %v988_v8  ;;  %v1395_v26 = vpop.permute.xlu0 %1394 }
 0x144   : > { %v3769_v29 = vpop.f32.mrf.mxu0 }
 0x145   : > { %v3751_v30 = vpop.f32.mrf.mxu1 }
 0x146   : > { %v1076_v22 = vpop.f32.mrf.mxu0  ;;  %v989_v30 = vadd.f32 %v958_v19, %v4789_v43 }
 0x147   : > { %v4805_v33 = vpop.f32.mrf.mxu1 }
 0x148   : > { %v3770_v34 = vpop.f32.mrf.mxu0  ;;  %v1107_v58 = vadd.f32 %v1076_v22, %v989_v30 }
 0x149   : > { %v3752_v35 = vpop.f32.mrf.mxu1 }
 0x14a   : > { %v4807_v36 = vpop.f32.mrf.mxu0 }
 0x14b   : > { %v4809_v31 = vpop.f32.mrf.mxu1 }
 0x14c   : > { %v3773_v38 = vpop.f32.mrf.mxu0 }
 0x14d   : > { %v3755_v40 = vpop.f32.mrf.mxu1 }
 0x14e   : > { %v4811_v41 = vpop.f32.mrf.mxu0 }
 0x14f   : > { %v4813_v42 = vpop.f32.mrf.mxu1 }
 0x150   : > { %v3774_v39 = vpop.f32.mrf.mxu0 }
 0x151   : > { %v3756_v44 = vpop.f32.mrf.mxu1 }
 0x152   : > { %v4815_v46 = vpop.f32.mrf.mxu0 }
 0x153   : > { %v4817_v47 = vpop.f32.mrf.mxu1 }
 0x154   : > { %v3777_v49 = vpop.f32.mrf.mxu0 }
 0x155   : > { %v3759_v45 = vpop.f32.mrf.mxu1 }
 0x156   : > { %v4819_v51 = vpop.f32.mrf.mxu0  ;;  %v990_v45 = vadd.f32 %v4803_v28, %v4791_v50  ;;  %v991_v50 = vadd.f32 %v4805_v33, %v4793_v56 }
 0x157   : > { %v4821_v4 = vpop.f32.mrf.mxu1 }
 0x158   : > { %v3778_v54 = vpop.f32.mrf.mxu0  ;;  %v1108_v22 = vadd.f32 %v4807_v36, %v990_v45  ;;  %v1109_v36 = vadd.f32 %v4811_v41, %v991_v50  ;;  %v994_v50 = vadd.f32 %v4817_v47, %v4799_v11  ;;  %v4211_v11 = vld [vmem:[%s5394_s4 + $0xa0] sm:$0xff]  }
 0x159   : > { %v3760_v55 = vpop.f32.mrf.mxu1 }
 0x15a   : > { %v4823_v52 = vpop.f32.mrf.mxu0 }
 0x15b   : > { %v1183_v10 = vpop.f32.mrf.mxu1  ;;  %v1112_v47 = vadd.f32 %v4823_v52, %v994_v50 }
 0x15c   : > { %v3781_v59 = vpop.f32.mrf.mxu0  ;;  %v1222_v2 = vadd.f32 %v1183_v10, %v1104_v63  ;;  %v1400_v10 = vpop.permute.xlu1 %1399 }
 0x15d   : > { %v3787_v61 = vpop.f32.mrf.mxu1 }
 0x15e   : > { %v4826_v57 = vpop.f32.mrf.mxu0 }
 0x15f   : > { %v1186_v3 = vpop.f32.mrf.mxu1 }
 0x160   : > { %v3782_v5 = vpop.f32.mrf.mxu0  ;;  %v1223_v13 = vadd.f32 %v1186_v3, %v1105_v12 }
 0x161   : > { %v3788_v7 = vpop.f32.mrf.mxu1  ;;  %v1586_v5 = vld [vmem:[#allocation2 + $0x1] sm:$0xff] }
 0x162   : > { %v1301_v48 = vpop.f32.mrf.mxu0 }
 0x163   : > { %v1191_v14 = vpop.f32.mrf.mxu1  ;;  %v1340_v53 = vadd.f32 %v1301_v48, %v1222_v2 }
 0x164   : > { %v3809_v25 = vpop.f32.mrf.mxu0  ;;  %v1224_v34 = vadd.f32 %v1191_v14, %v1106_v17 }
 0x165   : > { %v1357_v1 = vadd.f32 %v4832_v9, %v1340_v53  ;;  %v3791_v27 = vpop.f32.mrf.mxu1  ;;  %v4206_v25 = vld [vmem:[%s5394_s4 + $0xb8] sm:$0xff]  }
 0x166   : > { %v1304_v32 = vpop.f32.mrf.mxu0  ;;  %v992_v27 = vadd.f32 %v4809_v31, %v4795_v62  ;;  %v4207_v62 = vld [vmem:[%s5394_s4 + $0xb0] sm:$0xff]  }
 0x167   : > { %v1367_v21 = vmax.f32 %v1357_v1, 0.0  ;;  %v1194_v24 = vpop.f32.mrf.mxu1  ;;  %v1341_v0 = vadd.f32 %v1304_v32, %v1223_v13  ;;  %v4208_v32 = vld [vmem:[%s5394_s4 + $0xf8] sm:$0xff]  }
 0x168   : > { %v3810_v29 = vpop.f32.mrf.mxu0  ;;  %v1225_v54 = vadd.f32 %v1194_v24, %v1107_v58  ;;  %v1110_v31 = vadd.f32 %v4815_v46, %v992_v27  ;;  %v1410_v58 = vpop.permute.xlu0 %1409  ;;  %v4210_v46 = vld [vmem:[%s5394_s4 + $0xf0] sm:$0xff]  }
 0x169   : > { %v4837_v23 = vmul.f32 %v1390_v20, %v1367_v21  ;;  %v1358_v35 = vadd.f32 %v4832_v9, %v1341_v0  ;;  %v3792_v38 = vpop.f32.mrf.mxu1  ;;  %v1405_v20 = vpop.permute.xlu1 %1404 }
 0x16a   : > { %v1309_v37 = vpop.f32.mrf.mxu0 }
 0x16b   : > { %1545 = vst [vmem:[#allocation2 + $0xb] sm:$0xff] %v4837_v23  ;;  %v1368_v40 = vmax.f32 %v1358_v35, 0.0  ;;  %v1199_v39 = vpop.f32.mrf.mxu1  ;;  %v1342_v44 = vadd.f32 %v1309_v37, %v1224_v34  ;;  %v993_v37 = vadd.f32 %v4813_v42, %v4797_v18 }
 0x16c   : > { %v3813_v49 = vpop.f32.mrf.mxu0  ;;  %v1226_v6 = vadd.f32 %v1199_v39, %v1108_v22 }
 0x16d   : > { %v4843_v43 = vmul.f32 %v1395_v26, %v1368_v40  ;;  %v1359_v19 = vadd.f32 %v4832_v9, %v1342_v44  ;;  %v3795_v55 = vpop.f32.mrf.mxu1  ;;  %v1111_v18 = vadd.f32 %v4819_v51, %v993_v37 }
 0x16e   : > { %v1312_v59 = vpop.f32.mrf.mxu0 }
 0x16f   : > { %1546 = vst [vmem:[#allocation2 + $0x13] sm:$0xff] %v4843_v43  ;;  %v1369_v60 = vmax.f32 %v1359_v19, 0.0  ;;  %v1202_v61 = vpop.f32.mrf.mxu1  ;;  %v1343_v63 = vadd.f32 %v1312_v59, %v1225_v54  ;;  %v2196_v3 = vpack.c.bf16 %v4843_v43, %v4837_v23  ;;  %v4209_v54 = vld [vmem:[%s5394_s4 + $0xa8] sm:$0xff]   ;;  %v4242_v23 = vld [vmem:[%s5394_s4 + $0x1f0] sm:$0xff]  }
 0x170   : > { %v3814_v28 = vpop.f32.mrf.mxu0  ;;  %v1227_v17 = vadd.f32 %v1202_v61, %v1109_v36  ;;  %v4212_v36 = vld [vmem:[%s5394_s4 + $0xe8] sm:$0xff]  }
 0x171   : > { %v4852_v2 = vmul.f32 %v1400_v10, %v1369_v60  ;;  %v1360_v7 = vadd.f32 %v4832_v9, %v1343_v63  ;;  %v3796_v48 = vpop.f32.mrf.mxu1  ;;  %v1415_v28 = vpop.permute.xlu1 %1414 }
 0x172   : > { %v1317_v12 = vpop.f32.mrf.mxu0  ;;  %v1587_v14 = vld [vmem:[#allocation2 + $0x9] sm:$0xff] }
 0x173   : > { %v1556_v53 = vld [vmem:[#allocation2 + $0x8] sm:$0xff]  ;;  %1547 = vst [vmem:[#allocation2 + $0x1b] sm:$0xff] %v4852_v2  ;;  %v1370_v56 = vmax.f32 %v1360_v7, 0.0  ;;  %v1207_v33 = vpop.f32.mrf.mxu1  ;;  %v1344_v8 = vadd.f32 %v1317_v12, %v1226_v6  ;;  %v1596_v13 = vpack.c.bf16 %v1587_v14, %v1586_v5 }
 0x174   : > { %v1565_v1 = vpack.c.bf16 %v1556_v53, %v4743_v15  ;;  %v3817_v41 = vpop.f32.mrf.mxu0  ;;  %v1228_v39 = vadd.f32 %v1207_v33, %v1110_v31  ;;  %v995_v33 = vadd.f32 %v4821_v4, %v4801_v16  ;;  %v4214_v16 = vld [vmem:[%s5394_s4 + $0xe0] sm:$0xff]  }
 0x175   : > { %v4866_v21 = vmul.f32 %v1405_v20, %v1370_v56  ;;  %v1361_v24 = vadd.f32 %v4832_v9, %v1344_v8  ;;  %v3799_v0 = vpop.f32.mrf.mxu1  ;;  %3866 = vmatmul.mubr.bf16.vlgmr.msra.gmra.mxu0 %v1596_v13  ;;  %v1420_v8 = vpop.permute.xlu0 %1419 }
 0x176   : > { %3902 = vmatmul.mubr.bf16.vlgmr.msra.gmra.mxu1 %v1565_v1  ;;  %3922 = vmatpush3.bf16.msra.mxu0 %v4206_v25  ;;  %v1320_v29 = vpop.f32.mrf.mxu0  ;;  %v1588_v45 = vld [vmem:[#allocation2 + $0x11] sm:$0xff]  ;;  %v1113_v4 = vadd.f32 %v4826_v57, %v995_v33 }
 0x177   : > { %3869 = vmatprep.mubr.msk.bf16.mxu0 %vm4273_vm1, %v4743_v15  ;;  %1548 = vst [vmem:[#allocation2 + $0x23] sm:$0xff] %v4866_v21  ;;  %v1371_v30 = vmax.f32 %v1361_v24, 0.0  ;;  %v1210_v34 = vpop.f32.mrf.mxu1  ;;  %v1345_v35 = vadd.f32 %v1320_v29, %v1227_v17  ;;  %3923 = vmatprep.subr.bf16.mxu0 %v4743_v15  ;;  %v2197_v38 = vpack.c.bf16 %v4866_v21, %v4852_v2  ;;  %v1557_v55 = vld [vmem:[#allocation2 + $0x10] sm:$0xff] }
 0x178   : > { %3905 = vmatprep.mubr.msk.bf16.mxu1 %vm4273_vm1, %v4743_v15  ;;  %v3818_v40 = vpop.f32.mrf.mxu0  ;;  %3958 = vmatpush3.bf16.msra.mxu1 %v4208_v32  ;;  %v1229_v51 = vadd.f32 %v1210_v34, %v1111_v18  ;;  %v4213_v32 = vld [vmem:[%s5394_s4 + $0x98] sm:$0xff]  }
 0x179   : > { %v4886_v44 = vmul.f32 %v1410_v58, %v1371_v30  ;;  %v1362_v26 = vadd.f32 %v4832_v9, %v1345_v35  ;;  %v3800_v49 = vpop.f32.mrf.mxu1  ;;  %3959 = vmatprep.subr.bf16.mxu1 %v4743_v15  ;;  %v1425_v35 = vpop.permute.xlu1 %1424 }
 0x17a   : > { %v1325_v42 = vpop.f32.mrf.mxu0  ;;  %3924 = vmatpush3.bf16.msra.mxu0 %v4207_v62  ;;  %v1589_v19 = vld [vmem:[#allocation2 + $0x19] sm:$0xff]  ;;  %v1430_v18 = vpop.permute.xlu0 %1429 }
 0x17b   : > { %v1558_v10 = vld [vmem:[#allocation2 + $0x18] sm:$0xff]  ;;  %1549 = vst [vmem:[#allocation2 + $0x2b] sm:$0xff] %v4886_v44  ;;  %v1372_v59 = vmax.f32 %v1362_v26, 0.0  ;;  %v1215_v22 = vpop.f32.mrf.mxu1  ;;  %v1346_v60 = vadd.f32 %v1325_v42, %v1228_v39  ;;  %v1597_v61 = vpack.c.bf16 %v1589_v19, %v1588_v45  ;;  %3925 = vmatprep.subr.bf16.mxu0 %v4743_v15  ;;  %v4215_v39 = vld [vmem:[%s5394_s4 + $0x90] sm:$0xff]  }
 0x17c   : > { %v1566_v63 = vpack.c.bf16 %v1558_v10, %v1557_v55  ;;  %v3821_v5 = vpop.f32.mrf.mxu0  ;;  %3960 = vmatpush3.bf16.msra.mxu1 %v4210_v46  ;;  %v1230_v52 = vadd.f32 %v1215_v22, %v1112_v47  ;;  %v4216_v26 = vld [vmem:[%s5394_s4 + $0xd8] sm:$0xff]   ;;  %v4218_v22 = vld [vmem:[%s5394_s4 + $0x88] sm:$0xff]  }
 0x17d   : > { %v4898_v6 = vmul.f32 %v1415_v28, %v1372_v59  ;;  %v1363_v7 = vadd.f32 %v4832_v9, %v1346_v60  ;;  %v3803_v48 = vpop.f32.mrf.mxu1  ;;  %3870 = vmatmul.mubr.bf16.gmra.mxu0 %v1597_v61  ;;  %3961 = vmatprep.subr.bf16.mxu1 %v4743_v15  ;;  %v4217_v59 = vld [vmem:[%s5394_s4 + $0xd0] sm:$0xff]  }
 0x17e   : > { %3906 = vmatmul.mubr.bf16.gmra.mxu1 %v1566_v63  ;;  %v1328_v12 = vpop.f32.mrf.mxu0  ;;  %3926 = vmatpush3.bf16.msra.mxu0 %v4209_v54  ;;  %v1590_v41 = vld [vmem:[#allocation2 + $0x21] sm:$0xff] }
 0x17f   : > { %3873 = vmatprep.mubr.msk.bf16.mxu0 %vm4273_vm1, %v4743_v15  ;;  %1550 = vst [vmem:[#allocation2 + $0x33] sm:$0xff] %v4898_v6  ;;  %v1373_v14 = vmax.f32 %v1363_v7, 0.0  ;;  %v1218_v53 = vpop.f32.mrf.mxu1  ;;  %v1347_v25 = vadd.f32 %v1328_v12, %v1229_v51  ;;  %3927 = vmatprep.subr.bf16.mxu0 %v4743_v15  ;;  %v2198_v56 = vpack.c.bf16 %v4898_v6, %v4886_v44  ;;  %v1559_v0 = vld [vmem:[#allocation2 + $0x20] sm:$0xff]  ;;  %v4219_v7 = vld [vmem:[%s5394_s4 + $0xc8] sm:$0xff]   ;;  %v4249_v6 = vld [vmem:[%s5394_s4 + $0x1d0] sm:$0xff]  }
 0x180   : > { %3909 = vmatprep.mubr.msk.bf16.mxu1 %vm4273_vm1, %v4743_v15  ;;  %v3822_v13 = vpop.f32.mrf.mxu0  ;;  %3962 = vmatpush3.bf16.msra.mxu1 %v4212_v36  ;;  %v1231_v58 = vadd.f32 %v1218_v53, %v1113_v4  ;;  %v4220_v48 = vld [vmem:[%s5394_s4 + $0x80] sm:$0xff]  }
 0x181   : > { %v4919_v1 = vmul.f32 %v1420_v8, %v1373_v14  ;;  %v1364_v27 = vadd.f32 %v4832_v9, %v1347_v25  ;;  %v3804_v20 = vpop.f32.mrf.mxu1  ;;  %3963 = vmatprep.subr.bf16.mxu1 %v4743_v15  ;;  %v4221_v14 = vld [vmem:[%s5394_s4 + $0xc0] sm:$0xff]  }
 0x182   : > { %v1333_v17 = vpop.f32.mrf.mxu0  ;;  %3928 = vmatpush3.bf16.msra.mxu0 %v4211_v11  ;;  %v1591_v24 = vld [vmem:[#allocation2 + $0x29] sm:$0xff]  ;;  %v5121_v43 = vld [vmem:[#allocation2 + $0x1c] sm:$0xff] }
 0x183   : > { %v1560_v29 = vld [vmem:[#allocation2 + $0x28] sm:$0xff]  ;;  %1551 = vst [vmem:[#allocation2 + $0x3b] sm:$0xff] %v4919_v1  ;;  %v1374_v62 = vmax.f32 %v1364_v27, 0.0  ;;  %v1348_v31 = vadd.f32 %v1333_v17, %v1230_v52  ;;  %v1598_v30 = vpack.c.bf16 %v1591_v24, %v1590_v41  ;;  %3929 = vmatprep.subr.bf16.mxu0 %v4743_v15  ;;  %v4970_v36 = vpop.f32.mrf.mxu1  ;;  %v4222_v17 = vld [vmem:[%s5394_s4 + $0x138] sm:$0xff]  }
 0x184   : > { %v1567_v34 = vpack.c.bf16 %v1560_v29, %v1559_v0  ;;  %v3825_v37 = vpop.f32.mrf.mxu0  ;;  %3964 = vmatpush3.bf16.msra.mxu1 %v4214_v16  ;;  %v1860_v41 = vld [vmem:[#allocation2 + $0x2] sm:$0xff]  ;;  %v2024_v16 = vld [vmem:[#allocation2 + $0x12] sm:$0xff] }
 0x185   : > { %v4932_v40 = vmul.f32 %v1425_v35, %v1374_v62  ;;  %v1365_v57 = vadd.f32 %v4832_v9, %v1348_v31  ;;  %3874 = vmatmul.mubr.bf16.gmra.mxu0 %v1598_v30  ;;  %3965 = vmatprep.subr.bf16.mxu1 %v4743_v15  ;;  %v3831_v11 = vpop.f32.mrf.mxu1  ;;  %v4224_v62 = vld [vmem:[%s5394_s4 + $0x178] sm:$0xff]   ;;  %v4223_v30 = vld [vmem:[%s5394_s4 + $0x130] sm:$0xff]   ;;  %v2026_v37 = vld [vmem:[#allocation2 + $0x22] sm:$0xff] }
 0x186   : > { %3910 = vmatmul.mubr.bf16.gmra.mxu1 %v1567_v34  ;;  %v1336_v46 = vpop.f32.mrf.mxu0  ;;  %3930 = vmatpush3.bf16.msra.mxu0 %v4213_v32  ;;  %v1592_v10 = vld [vmem:[#allocation2 + $0x31] sm:$0xff]  ;;  %v1863_v35 = vld [vmem:[#allocation2 + $0x1a] sm:$0xff] }
 0x187   : > { %1552 = vst [vmem:[#allocation2 + $0x43] sm:$0xff] %v4932_v40  ;;  %v1375_v49 = vmax.f32 %v1365_v57, 0.0  ;;  %v1349_v45 = vadd.f32 %v1336_v46, %v1231_v58  ;;  %3877 = vmatprep.mubr.msk.bf16.mxu0 %vm4273_vm1, %v4743_v15  ;;  %3913 = vmatprep.mubr.msk.bf16.mxu1 %vm4273_vm1, %v4743_v15  ;;  %v2199_v54 = vpack.c.bf16 %v4932_v40, %v4919_v1  ;;  %v1561_v61 = vld [vmem:[#allocation2 + $0x30] sm:$0xff]  ;;  %v4984_v8 = vpop.f32.mrf.mxu1  ;;  %v4225_v46 = vld [vmem:[%s5394_s4 + $0x128] sm:$0xff]   ;;  %v4253_v40 = vld [vmem:[%s5394_s4 + $0x1c0] sm:$0xff]  }
 0x188   : > { %v3826_v42 = vpop.f32.mrf.mxu0  ;;  %3931 = vmatprep.subr.bf16.mxu0 %v4743_v15  ;;  %3966 = vmatpush3.bf16.msra.mxu1 %v4216_v26  ;;  %v1861_v32 = vld [vmem:[#allocation2 + $0xa] sm:$0xff]  ;;  %v1871_v26 = vpack.c.bf16 %v1863_v35, %v2024_v16 }
 0x189   : > { %v4950_v19 = vmul.f32 %v1430_v18, %v1375_v49  ;;  %v1366_v55 = vadd.f32 %v4832_v9, %v1349_v45  ;;  %3967 = vmatprep.subr.bf16.mxu1 %v4743_v15  ;;  %v1435_v9 = vpop.permute.xlu1 %1434  ;;  %v3832_v27 = vpop.f32.mrf.mxu1  ;;  %v1870_v0 = vpack.c.bf16 %v1861_v32, %v1860_v41  ;;  %v2033_v29 = vpack.c.bf16 %v2024_v16, %v1861_v32  ;;  %v4226_v58 = vld [vmem:[%s5394_s4 + $0x170] sm:$0xff]   ;;  %v4228_v18 = vld [vmem:[%s5394_s4 + $0x168] sm:$0xff]   ;;  %v4227_v42 = vld [vmem:[%s5394_s4 + $0x120] sm:$0xff]  }
 0x18a   : > { %v1593_v60 = vld [vmem:[#allocation2 + $0x39] sm:$0xff]  ;;  %3932 = vmatpush3.bf16.msra.mxu0 %v4215_v39  ;;  %v2034_v49 = vpack.c.bf16 %v2026_v37, %v1863_v35  ;;  %v4235_v41 = vld [vmem:[%s5394_s4 + $0x148] sm:$0xff]  }
 0x18b   : > { %v1562_v63 = vld [vmem:[#allocation2 + $0x38] sm:$0xff]  ;;  %1553 = vst [vmem:[#allocation2 + $0x4b] sm:$0xff] %v4950_v19  ;;  %v1376_v50 = vmax.f32 %v1366_v55, 0.0  ;;  %v1599_v28 = vpack.c.bf16 %v1593_v60, %v1592_v10  ;;  %3933 = vmatprep.subr.bf16.mxu0 %v4743_v15  ;;  %v4990_v20 = vpop.f32.mrf.mxu1  ;;  %v1865_v10 = vld [vmem:[#allocation2 + $0x2a] sm:$0xff]  ;;  %v4236_v32 = vld [vmem:[%s5394_s4 + $0x100] sm:$0xff]  }
 0x18c   : > { %v1568_v5 = vpack.c.bf16 %v1562_v63, %v1561_v61  ;;  %3968 = vmatpush3.bf16.msra.mxu1 %v4217_v59  ;;  %v2028_v59 = vld [vmem:[#allocation2 + $0x32] sm:$0xff]  ;;  %v4230_v61 = vld [vmem:[%s5394_s4 + $0x160] sm:$0xff]  }
 0x18d   : > { %v4962_v51 = vmul.f32 %v1435_v9, %v1376_v50  ;;  %3878 = vmatmul.mubr.bf16.gmra.mxu0 %v1599_v28  ;;  %3969 = vmatprep.subr.bf16.mxu1 %v4743_v15  ;;  %v3835_v4 = vpop.f32.mrf.mxu1  ;;  %v4229_v60 = vld [vmem:[%s5394_s4 + $0x118] sm:$0xff]   ;;  %v1872_v50 = vpack.c.bf16 %v1865_v10, %v2026_v37  ;;  %v2035_v28 = vpack.c.bf16 %v2028_v59, %v1865_v10  ;;  %v4231_v9 = vld [vmem:[%s5394_s4 + $0x110] sm:$0xff]  }
 0x18e   : > { %3914 = vmatmul.mubr.bf16.gmra.mxu1 %v1568_v5  ;;  %3934 = vmatpush3.bf16.msra.mxu0 %v4218_v22  ;;  %v1594_v47 = vld [vmem:[#allocation2 + $0x41] sm:$0xff]  ;;  %v4240_v37 = vld [vmem:[%s5394_s4 + $0x1f8] sm:$0xff]   ;;  %v5146_v21 = vld [vmem:[#allocation2 + $0x2c] sm:$0xff] }
 0x18f   : > { %1554 = vst [vmem:[#allocation2 + $0x53] sm:$0xff] %v4962_v51  ;;  %3881 = vmatprep.mubr.msk.bf16.mxu0 %vm4273_vm1, %v4743_v15  ;;  %3917 = vmatprep.mubr.msk.bf16.mxu1 %vm4273_vm1, %v4743_v15  ;;  %v2200_v12 = vpack.c.bf16 %v4962_v51, %v4950_v19  ;;  %v1563_v25 = vld [vmem:[#allocation2 + $0x40] sm:$0xff]  ;;  %v4998_v24 = vpop.f32.mrf.mxu1  ;;  %v5143_v2 = vld [vmem:[#allocation2 + $0x34] sm:$0xff] }
 0x190   : > { %3935 = vmatprep.subr.bf16.mxu0 %v4743_v15  ;;  %3970 = vmatpush3.bf16.msra.mxu1 %v4219_v7  ;;  %v4232_v7 = vld [vmem:[%s5394_s4 + $0x158] sm:$0xff]   ;;  %v4255_v19 = vld [vmem:[%s5394_s4 + $0x230] sm:$0xff]  }
 0x191   : > { %3971 = vmatprep.subr.bf16.mxu1 %v4743_v15  ;;  %v3836_v31 = vpop.f32.mrf.mxu1  ;;  %v1867_v11 = vld [vmem:[#allocation2 + $0x3a] sm:$0xff]  ;;  %v2678_v51 = vld [vmem:[#allocation2 + $0x2d] sm:$0xff] }
 0x192   : > { %v1595_v53 = vld [vmem:[#allocation2 + $0x49] sm:$0xff]  ;;  %3936 = vmatpush3.bf16.msra.mxu0 %v4220_v48  ;;  %v4248_v10 = vld [vmem:[%s5394_s4 + $0x1d8] sm:$0xff]  }
 0x193   : > { %v1564_v33 = vld [vmem:[#allocation2 + $0x48] sm:$0xff]  ;;  %v1600_v13 = vpack.c.bf16 %v1595_v53, %v1594_v47  ;;  %3993 = vmatprep.subr.bf16.mxu0 %v4743_v15  ;;  %v5008_v34 = vpop.f32.mrf.mxu1  ;;  %v4233_v53 = vld [vmem:[%s5394_s4 + $0x150] sm:$0xff]   ;;  %v5175_v44 = vld [vmem:[#allocation2 + $0x3c] sm:$0xff] }
 0x194   : > { %v1569_v52 = vpack.c.bf16 %v1564_v33, %v1563_v25  ;;  %3972 = vmatpush3.bf16.msra.mxu1 %v4221_v14  ;;  %v2030_v47 = vld [vmem:[#allocation2 + $0x42] sm:$0xff]  ;;  %v1869_v16 = vld [vmem:[#allocation2 + $0x4a] sm:$0xff] }
 0x195   : > { %3882 = vmatmul.mubr.bf16.gmra.mxu0 %v1600_v13  ;;  %4029 = vmatprep.subr.bf16.mxu1 %v4743_v15  ;;  %v3839_v57 = vpop.f32.mrf.mxu1  ;;  %v4234_v25 = vld [vmem:[%s5394_s4 + $0x108] sm:$0xff]   ;;  %v1873_v13 = vpack.c.bf16 %v1867_v11, %v2028_v59 }
 0x196   : > { %3918 = vmatmul.mubr.bf16.gmra.mxu1 %v1569_v52  ;;  %3937 = vmatprep.mubr.msk.bf16.mxu0 %vm4273_vm1, %v4743_v15  ;;  %v2036_v52 = vpack.c.bf16 %v2030_v47, %v1867_v11  ;;  %v2032_v4 = vld [vmem:[#allocation2 + $0x52] sm:$0xff]  ;;  %v5115_v57 = vld [vmem:[#allocation2 + $0x24] sm:$0xff] }
 0x197   : > { %3973 = vmatprep.mubr.msk.bf16.mxu1 %vm4273_vm1, %v4743_v15  ;;  %v5020_v39 = vpop.f32.mrf.mxu1  ;;  %v2349_v31 = vld [vmem:[#allocation2 + $0xc] sm:$0xff]  ;;  %v5171_v59 = vld [vmem:[#allocation2 + $0x44] sm:$0xff]  ;;  %v5200_v1 = vld [vmem:[#allocation2 + $0x54] sm:$0xff] }
 0x199   : > { %v3840_v45 = vpop.f32.mrf.mxu1 }
 0x19a   : > { %v4246_v45 = vld [vmem:[%s5394_s4 + $0x1e0] sm:$0xff]  }
 0x19b   : > { %v5031_v55 = vpop.f32.mrf.mxu1 }
 0x19d   : > { %3938 = vmatmul.mubr.bf16.vlgmr.msra.gmra.mxu0 %v1870_v0  ;;  %v3843_v22 = vpop.f32.mrf.mxu1  ;;  %v1874_v0 = vpack.c.bf16 %v1869_v16, %v2030_v47  ;;  %v4256_v47 = vld [vmem:[%s5394_s4 + $0x228] sm:$0xff]  }
 0x19e   : > { %3974 = vmatmul.mubr.bf16.vlgmr.msra.gmra.mxu1 %v2033_v29  ;;  %3994 = vmatpush3.bf16.msra.mxu0 %v4222_v17  ;;  %v4237_v17 = vld [vmem:[%s5394_s4 + $0x140] sm:$0xff]   ;;  %v2037_v29 = vpack.c.bf16 %v2032_v4, %v1869_v16  ;;  %v2362_v22 = vpack.c.bf16 %v5171_v59, %v5175_v44  ;;  %v4259_v16 = vld [vmem:[%s5394_s4 + $0x210] sm:$0xff]  }
 0x19f   : > { %3941 = vmatprep.mubr.msk.bf16.mxu0 %vm4273_vm1, %v4743_v15  ;;  %3995 = vmatprep.subr.bf16.mxu0 %v4743_v15  ;;  %v5044_v63 = vpop.f32.mrf.mxu1  ;;  %v2682_v4 = vld [vmem:[#allocation2 + $0x4d] sm:$0xff] }
 0x1a0   : > { %3977 = vmatprep.mubr.msk.bf16.mxu1 %vm4273_vm1, %v4743_v15  ;;  %4030 = vmatpush3.bf16.msra.mxu1 %v4224_v62  ;;  %v5086_v62 = vld [vmem:[#allocation2] sm:$0xff] }
 0x1a1   : > { %4031 = vmatprep.subr.bf16.mxu1 %v4743_v15  ;;  %v3844_v5 = vpop.f32.mrf.mxu1 }
 0x1a2   : > { %3996 = vmatpush3.bf16.msra.mxu0 %v4223_v30  ;;  %v4238_v30 = vld [vmem:[%s5394_s4 + $0x1b8] sm:$0xff]  }
 0x1a3   : > { %3997 = vmatprep.subr.bf16.mxu0 %v4743_v15  ;;  %v5053_v48 = vpop.f32.mrf.mxu1  ;;  %v2675_v5 = vld [vmem:[#allocation2 + $0x15] sm:$0xff] }
 0x1a4   : > { %4032 = vmatpush3.bf16.msra.mxu1 %v4226_v58  ;;  %v4239_v58 = vld [vmem:[%s5394_s4 + $0x1b0] sm:$0xff]  }
 0x1a5   : > { %3942 = vmatmul.mubr.bf16.gmra.mxu0 %v1871_v26  ;;  %4033 = vmatprep.subr.bf16.mxu1 %v4743_v15  ;;  %v3847_v14 = vpop.f32.mrf.mxu1  ;;  %v4244_v26 = vld [vmem:[%s5394_s4 + $0x1e8] sm:$0xff]  }
 0x1a6   : > { %3978 = vmatmul.mubr.bf16.gmra.mxu1 %v2034_v49  ;;  %3998 = vmatpush3.bf16.msra.mxu0 %v4225_v46  ;;  %v2360_v46 = vpack.c.bf16 %v5115_v57, %v5121_v43  ;;  %v4243_v49 = vld [vmem:[%s5394_s4 + $0x1a0] sm:$0xff]   ;;  %v2523_v14 = vpack.c.bf16 %v5146_v21, %v5115_v57 }
 0x1a7   : > { %3945 = vmatprep.mubr.msk.bf16.mxu0 %vm4273_vm1, %v4743_v15  ;;  %3999 = vmatprep.subr.bf16.mxu0 %v4743_v15  ;;  %v5067_v33 = vpop.f32.mrf.mxu1 }
 0x1a8   : > { %3981 = vmatprep.mubr.msk.bf16.mxu1 %vm4273_vm1, %v4743_v15  ;;  %4034 = vmatpush3.bf16.msra.mxu1 %v4228_v18  ;;  %v2361_v18 = vpack.c.bf16 %v5143_v2, %v5146_v21  ;;  %v2842_v21 = vld [vmem:[#allocation2 + $0x36] sm:$0xff] }
 0x1a9   : > { %4035 = vmatprep.subr.bf16.mxu1 %v4743_v15  ;;  %v3848_v27 = vpop.f32.mrf.mxu1 }
 0x1aa   : > { %4000 = vmatpush3.bf16.msra.mxu0 %v4227_v42  ;;  %v4247_v42 = vld [vmem:[%s5394_s4 + $0x190] sm:$0xff]   ;;  %v4258_v27 = vld [vmem:[%s5394_s4 + $0x218] sm:$0xff]  }
 0x1ab   : > { %4001 = vmatprep.subr.bf16.mxu0 %v4743_v15 }
 0x1ac   : > { %4036 = vmatpush3.bf16.msra.mxu1 %v4230_v61  ;;  %v4252_v61 = vld [vmem:[%s5394_s4 + $0x180] sm:$0xff]  }
 0x1ad   : > { %3946 = vmatmul.mubr.bf16.gmra.mxu0 %v1872_v50  ;;  %4037 = vmatprep.subr.bf16.mxu1 %v4743_v15  ;;  %v2357_v50 = vld [vmem:[#allocation2 + $0x4c] sm:$0xff] }
 0x1ae   : > { %3982 = vmatmul.mubr.bf16.gmra.mxu1 %v2035_v28  ;;  %4002 = vmatpush3.bf16.msra.mxu0 %v4229_v60  ;;  %v4251_v60 = vld [vmem:[%s5394_s4 + $0x1c8] sm:$0xff]   ;;  %v2676_v28 = vld [vmem:[#allocation2 + $0x1d] sm:$0xff] }
 0x1af   : > { %3949 = vmatprep.mubr.msk.bf16.mxu0 %vm4273_vm1, %v4743_v15  ;;  %3985 = vmatprep.mubr.msk.bf16.mxu1 %vm4273_vm1, %v4743_v15  ;;  %v2685_v11 = vpack.c.bf16 %v2676_v28, %v2675_v5 }
 0x1b0   : > { %4003 = vmatprep.subr.bf16.mxu0 %v4743_v15  ;;  %4038 = vmatpush3.bf16.msra.mxu1 %v4232_v7 }
 0x1b1   : > { %4039 = vmatprep.subr.bf16.mxu1 %v4743_v15 }
 0x1b2   : > { %4004 = vmatpush3.bf16.msra.mxu0 %v4231_v9  ;;  %v4254_v9 = vld [vmem:[%s5394_s4 + $0x238] sm:$0xff]  }
 0x1b3   : > { %4005 = vmatprep.subr.bf16.mxu0 %v4743_v15 }
 0x1b4   : > { %4040 = vmatpush3.bf16.msra.mxu1 %v4233_v53 }
 0x1b5   : > { %3950 = vmatmul.mubr.bf16.gmra.mxu0 %v1873_v13  ;;  %4041 = vmatprep.subr.bf16.mxu1 %v4743_v15  ;;  %v2680_v13 = vld [vmem:[#allocation2 + $0x3d] sm:$0xff] }
 0x1b6   : > { %3986 = vmatmul.mubr.bf16.gmra.mxu1 %v2036_v52  ;;  %4006 = vmatpush3.bf16.msra.mxu0 %v4234_v25  ;;  %v4257_v25 = vld [vmem:[%s5394_s4 + $0x220] sm:$0xff]   ;;  %v2679_v52 = vld [vmem:[#allocation2 + $0x35] sm:$0xff] }
 0x1b7   : > { %3953 = vmatprep.mubr.msk.bf16.mxu0 %vm4273_vm1, %v4743_v15  ;;  %3989 = vmatprep.mubr.msk.bf16.mxu1 %vm4273_vm1, %v4743_v15 }
 0x1b8   : > { %4007 = vmatprep.subr.bf16.mxu0 %v4743_v15  ;;  %4042 = vmatpush3.bf16.msra.mxu1 %v4235_v41  ;;  %v5095_v15 = vld [vmem:[#allocation2 + $0x14] sm:$0xff]  ;;  %v2524_v41 = vpack.c.bf16 %v5175_v44, %v5143_v2  ;;  %v2843_v2 = vld [vmem:[#allocation2 + $0x3e] sm:$0xff] }
 0x1b9   : > { %4043 = vmatprep.subr.bf16.mxu1 %v5086_v62  ;;  %v2359_v35 = vpack.c.bf16 %v5095_v15, %v2349_v31  ;;  %v2522_v7 = vpack.c.bf16 %v5121_v43, %v5095_v15  ;;  %v4261_v31 = vld [vmem:[%s5394_s4 + $0x200] sm:$0xff]   ;;  %v2838_v43 = vld [vmem:[#allocation2 + $0x16] sm:$0xff] }
 0x1ba   : > { %4008 = vmatpush3.bf16.msra.mxu0 %v4236_v32  ;;  %v2687_v32 = vpack.c.bf16 %v2680_v13, %v2679_v52 }
 0x1bb   : > { %4065 = vmatprep.subr.bf16.mxu0 %v5086_v62 }
 0x1bc   : > { %4044 = vmatpush3.bf16.msra.mxu1 %v4237_v17  ;;  %v2681_v17 = vld [vmem:[#allocation2 + $0x45] sm:$0xff] }
 0x1bd   : > { %3954 = vmatmul.mubr.bf16.gmra.mxu0 %v1874_v0  ;;  %4101 = vmatprep.subr.bf16.mxu1 %v5086_v62  ;;  %v4260_v0 = vld [vmem:[%s5394_s4 + $0x208] sm:$0xff]   ;;  %v2688_v15 = vpack.c.bf16 %v2682_v4, %v2681_v17 }
 0x1be   : > { %3990 = vmatmul.mubr.bf16.gmra.mxu1 %v2037_v29  ;;  %4009 = vmatprep.mubr.msk.bf16.mxu0 %vm4273_vm1, %v5086_v62  ;;  %v2525_v29 = vpack.c.bf16 %v2357_v50, %v5171_v59  ;;  %v2847_v59 = vld [vmem:[#allocation2 + $0x5e] sm:$0xff] }
 0x1bf   : > { %4045 = vmatprep.mubr.msk.bf16.mxu1 %vm4273_vm1, %v5086_v62 }
 0x1c5   : > { %4010 = vmatmul.mubr.bf16.vlgmr.msra.gmra.mxu0 %v2196_v3  ;;  %v4241_v3 = vld [vmem:[%s5394_s4 + $0x1a8] sm:$0xff]  }
 0x1c6   : > { %4046 = vmatmul.mubr.bf16.vlgmr.msra.gmra.mxu1 %v2359_v35  ;;  %4066 = vmatpush3.bf16.msra.mxu0 %v4238_v30  ;;  %v2521_v30 = vld [vmem:[#allocation2 + $0x5c] sm:$0xff] }
 0x1c7   : > { %4013 = vmatprep.mubr.msk.bf16.mxu0 %vm4273_vm1, %v5086_v62  ;;  %4067 = vmatprep.subr.bf16.mxu0 %v5086_v62  ;;  %v2683_v35 = vld [vmem:[#allocation2 + $0x55] sm:$0xff] }
 0x1c8   : > { %4049 = vmatprep.mubr.msk.bf16.mxu1 %vm4273_vm1, %v5086_v62  ;;  %4102 = vmatpush3.bf16.msra.mxu1 %v4240_v37  ;;  %v2684_v37 = vld [vmem:[#allocation2 + $0x5d] sm:$0xff] }
 0x1c9   : > { %4103 = vmatprep.subr.bf16.mxu1 %v5086_v62  ;;  %v2689_v57 = vpack.c.bf16 %v2684_v37, %v2683_v35 }
 0x1ca   : > { %4068 = vmatpush3.bf16.msra.mxu0 %v4239_v58  ;;  %v2526_v58 = vpack.c.bf16 %v2521_v30, %v5200_v1 }
 0x1cb   : > { %4069 = vmatprep.subr.bf16.mxu0 %v5086_v62 }
 0x1cc   : > { %4104 = vmatpush3.bf16.msra.mxu1 %v4242_v23  ;;  %v2839_v23 = vld [vmem:[#allocation2 + $0x1e] sm:$0xff] }
 0x1cd   : > { %4014 = vmatmul.mubr.bf16.gmra.mxu0 %v2197_v38  ;;  %4105 = vmatprep.subr.bf16.mxu1 %v5086_v62  ;;  %v4245_v38 = vld [vmem:[%s5394_s4 + $0x198] sm:$0xff]  }
 0x1ce   : > { %4050 = vmatmul.mubr.bf16.gmra.mxu1 %v2360_v46  ;;  %4070 = vmatpush3.bf16.msra.mxu0 %v4241_v3  ;;  %v2848_v3 = vpack.c.bf16 %v2839_v23, %v2838_v43  ;;  %v2841_v46 = vld [vmem:[#allocation2 + $0x2e] sm:$0xff] }
 0x1cf   : > { %4017 = vmatprep.mubr.msk.bf16.mxu0 %vm4273_vm1, %v5086_v62  ;;  %4071 = vmatprep.subr.bf16.mxu0 %v5086_v62 }
 0x1d0   : > { %4053 = vmatprep.mubr.msk.bf16.mxu1 %vm4273_vm1, %v5086_v62  ;;  %4106 = vmatpush3.bf16.msra.mxu1 %v4244_v26  ;;  %v2840_v26 = vld [vmem:[#allocation2 + $0x26] sm:$0xff] }
 0x1d1   : > { %4107 = vmatprep.subr.bf16.mxu1 %v5086_v62 }
 0x1d2   : > { %4072 = vmatpush3.bf16.msra.mxu0 %v4243_v49  ;;  %v2849_v49 = vpack.c.bf16 %v2841_v46, %v2840_v26 }
 0x1d3   : > { %4073 = vmatprep.subr.bf16.mxu0 %v5086_v62 }
 0x1d4   : > { %4108 = vmatpush3.bf16.msra.mxu1 %v4246_v45  ;;  %v2845_v45 = vld [vmem:[#allocation2 + $0x4e] sm:$0xff] }
 0x1d5   : > { %4018 = vmatmul.mubr.bf16.gmra.mxu0 %v2198_v56  ;;  %4109 = vmatprep.subr.bf16.mxu1 %v5086_v62  ;;  %v4250_v56 = vld [vmem:[%s5394_s4 + $0x188] sm:$0xff]  }
 0x1d6   : > { %4054 = vmatmul.mubr.bf16.gmra.mxu1 %v2361_v18  ;;  %4074 = vmatpush3.bf16.msra.mxu0 %v4245_v38  ;;  %v2850_v38 = vpack.c.bf16 %v2843_v2, %v2842_v21  ;;  %v2844_v18 = vld [vmem:[#allocation2 + $0x46] sm:$0xff] }
 0x1d7   : > { %4021 = vmatprep.mubr.msk.bf16.mxu0 %vm4273_vm1, %v5086_v62  ;;  %4057 = vmatprep.mubr.msk.bf16.mxu1 %vm4273_vm1, %v5086_v62 }
 0x1d8   : > { %4075 = vmatprep.subr.bf16.mxu0 %v5086_v62  ;;  %4110 = vmatpush3.bf16.msra.mxu1 %v4248_v10  ;;  %v2846_v10 = vld [vmem:[#allocation2 + $0x56] sm:$0xff] }
 0x1d9   : > { %4111 = vmatprep.subr.bf16.mxu1 %v5086_v62  ;;  %v2852_v44 = vpack.c.bf16 %v2847_v59, %v2846_v10 }
 0x1da   : > { %4076 = vmatpush3.bf16.msra.mxu0 %v4247_v42  ;;  %v2851_v42 = vpack.c.bf16 %v2845_v45, %v2844_v18 }
 0x1db   : > { %4077 = vmatprep.subr.bf16.mxu0 %v5086_v62 }
 0x1dc   : > { %4112 = vmatpush3.bf16.msra.mxu1 %v4249_v6 }
 0x1dd   : > { %4022 = vmatmul.mubr.bf16.gmra.mxu0 %v2199_v54  ;;  %4113 = vmatprep.subr.bf16.mxu1 %v5086_v62  ;;  %v2363_v54 = vpack.c.bf16 %v5200_v1, %v2357_v50 }
 0x1de   : > { %4058 = vmatmul.mubr.bf16.gmra.mxu1 %v2362_v22  ;;  %4078 = vmatpush3.bf16.msra.mxu0 %v4250_v56 }
 0x1df   : > { %4025 = vmatprep.mubr.msk.bf16.mxu0 %vm4273_vm1, %v5086_v62  ;;  %4061 = vmatprep.mubr.msk.bf16.mxu1 %vm4273_vm1, %v5086_v62 }
 0x1e0   : > { %4079 = vmatprep.subr.bf16.mxu0 %v5086_v62  ;;  %4114 = vmatpush3.bf16.msra.mxu1 %v4251_v60 }
 0x1e1   : > { %4115 = vmatprep.subr.bf16.mxu1 %v5086_v62 }
 0x1e2   : > { %4080 = vmatpush3.bf16.msra.mxu0 %v4252_v61 }
 0x1e3   : > { %4137 = vmatprep.subr.bf16.mxu0 %v5086_v62 }
 0x1e4   : > { %4116 = vmatpush3.bf16.msra.mxu1 %v4253_v40 }
 0x1e5   : > { %4026 = vmatmul.mubr.bf16.gmra.mxu0 %v2200_v12  ;;  %v2677_v12 = vld [vmem:[#allocation2 + $0x25] sm:$0xff] }
 0x1e6   : > { %4062 = vmatmul.mubr.bf16.gmra.mxu1 %v2363_v54  ;;  %4081 = vmatprep.mubr.msk.bf16.mxu0 %vm4273_vm1, %v5086_v62  ;;  %v2686_v53 = vpack.c.bf16 %v2678_v51, %v2677_v12 }
 0x1e7   : > { %4117 = vmatprep.mubr.msk.bf16.mxu1 %vm4273_vm1, %v5086_v62 }
 0x1ed   : > { %4082 = vmatmul.mubr.bf16.vlgmr.msra.gmra.mxu0 %v2522_v7 }
 0x1ee   : > { %4118 = vmatmul.mubr.bf16.vlgmr.msra.gmra.mxu1 %v2685_v11  ;;  %4138 = vmatpush3.bf16.msra.mxu0 %v4254_v9 }
 0x1ef   : > { %4085 = vmatprep.mubr.msk.bf16.mxu0 %vm4273_vm1, %v5086_v62  ;;  %4139 = vmatprep.subr.bf16.mxu0 %v5086_v62 }
 0x1f0   : > { %4121 = vmatprep.mubr.msk.bf16.mxu1 %vm4273_vm1, %v5086_v62 }
 0x1f2   : > { %4140 = vmatpush3.bf16.msra.mxu0 %v4255_v19 }
 0x1f3   : > { %4141 = vmatprep.subr.bf16.mxu0 %v5086_v62 }
 0x1f5   : > { %4086 = vmatmul.mubr.bf16.gmra.mxu0 %v2523_v14 }
 0x1f6   : > { %4122 = vmatmul.mubr.bf16.gmra.mxu1 %v2686_v53  ;;  %4142 = vmatpush3.bf16.msra.mxu0 %v4256_v47 }
 0x1f7   : > { %4089 = vmatprep.mubr.msk.bf16.mxu0 %vm4273_vm1, %v5086_v62  ;;  %4143 = vmatprep.subr.bf16.mxu0 %v5086_v62 }
 0x1f8   : > { %4125 = vmatprep.mubr.msk.bf16.mxu1 %vm4273_vm1, %v5086_v62 }
 0x1fa   : > { %4144 = vmatpush3.bf16.msra.mxu0 %v4257_v25 }
 0x1fb   : > { %4145 = vmatprep.subr.bf16.mxu0 %v5086_v62 }
 0x1fd   : > { %4090 = vmatmul.mubr.bf16.gmra.mxu0 %v2524_v41 }
 0x1fe   : > { %4126 = vmatmul.mubr.bf16.gmra.mxu1 %v2687_v32  ;;  %4146 = vmatpush3.bf16.msra.mxu0 %v4258_v27 }
 0x1ff   : > { %4093 = vmatprep.mubr.msk.bf16.mxu0 %vm4273_vm1, %v5086_v62  ;;  %4129 = vmatprep.mubr.msk.bf16.mxu1 %vm4273_vm1, %v5086_v62 }
 0x200   : > { %4147 = vmatprep.subr.bf16.mxu0 %v5086_v62 }
 0x202   : > { %4148 = vmatpush3.bf16.msra.mxu0 %v4259_v16 }
 0x203   : > { %4149 = vmatprep.subr.bf16.mxu0 %v5086_v62 }
 0x205   : > { %4094 = vmatmul.mubr.bf16.gmra.mxu0 %v2525_v29 }
 0x206   : > { %4130 = vmatmul.mubr.bf16.gmra.mxu1 %v2688_v15  ;;  %4150 = vmatpush3.bf16.msra.mxu0 %v4260_v0 }
 0x207   : > { %4097 = vmatprep.mubr.msk.bf16.mxu0 %vm4273_vm1, %v5086_v62  ;;  %4133 = vmatprep.mubr.msk.bf16.mxu1 %vm4273_vm1, %v5086_v62 }
 0x208   : > { %4151 = vmatprep.subr.bf16.mxu0 %v5086_v62 }
 0x20a   : > { %4152 = vmatpush3.bf16.msra.mxu0 %v4261_v31 }
 0x20d   : > { %4098 = vmatmul.mubr.bf16.gmra.mxu0 %v2526_v58 }
 0x20e   : > { %4134 = vmatmul.mubr.bf16.gmra.mxu1 %v2689_v57  ;;  %4153 = vmatprep.mubr.msk.bf16.mxu0 %vm4273_vm1, %v5086_v62 }
 0x215   : > { %4154 = vmatmul.mubr.bf16.vlgmr.msra.gmra.mxu0 %v2848_v3 }
 0x216   : > { %4157 = vmatprep.mubr.msk.bf16.mxu0 %vm4273_vm1, %v5086_v62 }
 0x21d   : > { %4158 = vmatmul.mubr.bf16.gmra.mxu0 %v2849_v49 }
 0x21e   : > { %4161 = vmatprep.mubr.msk.bf16.mxu0 %vm4273_vm1, %v5086_v62 }
 0x225   : > { %4162 = vmatmul.mubr.bf16.gmra.mxu0 %v2850_v38 }
 0x226   : > { %4165 = vmatprep.mubr.msk.bf16.mxu0 %vm4273_vm1, %v5086_v62 }
 0x22d   : > { %4166 = vmatmul.mubr.bf16.gmra.mxu0 %v2851_v42 }
 0x22e   : > { %4169 = vmatprep.mubr.msk.bf16.mxu0 %vm4273_vm1, %v5086_v62 }
 0x235   : > { %v1700_v6 = vpop.f32.mrf.mxu0  ;;  %4170 = vmatmul.mubr.bf16.gmra.mxu0 %v2852_v44 }
 0x236   : > { %v1821_v56 = vpop.f32.mrf.mxu1 }
 0x237   : > { %v1822_v22 = vadd.f32 %v1821_v56, %v1700_v6  ;;  %v3867_v60 = vpop.f32.mrf.mxu0 }
 0x238   : > { %v3903_v61 = vpop.f32.mrf.mxu1 }
 0x239   : > { %v1703_v50 = vpop.f32.mrf.mxu0 }
 0x23a   : > { %v1824_v1 = vpop.f32.mrf.mxu1 }
 0x23b   : > { %v1825_v40 = vadd.f32 %v1824_v1, %v1703_v50  ;;  %v3868_v54 = vpop.f32.mrf.mxu0 }
 0x23c   : > { %v3904_v28 = vpop.f32.mrf.mxu1 }
 0x23d   : > { %v1708_v5 = vpop.f32.mrf.mxu0 }
 0x23e   : > { %v1829_v9 = vpop.f32.mrf.mxu1 }
 0x23f   : > { %v1830_v7 = vadd.f32 %v1829_v9, %v1708_v5  ;;  %v3871_v11 = vpop.f32.mrf.mxu0 }
 0x240   : > { %v3907_v19 = vpop.f32.mrf.mxu1 }
 0x241   : > { %v1711_v62 = vpop.f32.mrf.mxu0 }
 0x242   : > { %v1832_v51 = vpop.f32.mrf.mxu1 }
 0x243   : > { %v1833_v12 = vadd.f32 %v1832_v51, %v1711_v62  ;;  %v3872_v47 = vpop.f32.mrf.mxu0 }
 0x244   : > { %v3908_v14 = vpop.f32.mrf.mxu1 }
 0x245   : > { %v1716_v53 = vpop.f32.mrf.mxu0 }
 0x246   : > { %v1837_v25 = vpop.f32.mrf.mxu1 }
 0x247   : > { %v1838_v13 = vadd.f32 %v1837_v25, %v1716_v53  ;;  %v3875_v52 = vpop.f32.mrf.mxu0 }
 0x248   : > { %v3911_v27 = vpop.f32.mrf.mxu1 }
 0x249   : > { %v1719_v41 = vpop.f32.mrf.mxu0 }
 0x24a   : > { %v1840_v32 = vpop.f32.mrf.mxu1 }
 0x24b   : > { %v1841_v16 = vadd.f32 %v1840_v32, %v1719_v41  ;;  %v3876_v4 = vpop.f32.mrf.mxu0 }
 0x24c   : > { %v3912_v17 = vpop.f32.mrf.mxu1 }
 0x24d   : > { %v1724_v0 = vpop.f32.mrf.mxu0 }
 0x24e   : > { %v1845_v29 = vpop.f32.mrf.mxu1 }
 0x24f   : > { %v1846_v15 = vadd.f32 %v1845_v29, %v1724_v0  ;;  %v3879_v31 = vpop.f32.mrf.mxu0 }
 0x250   : > { %v3915_v30 = vpop.f32.mrf.mxu1 }
 0x251   : > { %v1727_v35 = vpop.f32.mrf.mxu0 }
 0x252   : > { %v1848_v37 = vpop.f32.mrf.mxu1 }
 0x253   : > { %v1849_v58 = vadd.f32 %v1848_v37, %v1727_v35  ;;  %v3880_v57 = vpop.f32.mrf.mxu0 }
 0x254   : > { %v3916_v23 = vpop.f32.mrf.mxu1 }
 0x255   : > { %v1732_v43 = vpop.f32.mrf.mxu0 }
 0x256   : > { %v1853_v3 = vpop.f32.mrf.mxu1 }
 0x257   : > { %v1854_v46 = vadd.f32 %v1853_v3, %v1732_v43  ;;  %v3883_v26 = vpop.f32.mrf.mxu0 }
 0x258   : > { %v3919_v49 = vpop.f32.mrf.mxu1 }
 0x259   : > { %v1735_v2 = vpop.f32.mrf.mxu0 }
 0x25a   : > { %v1856_v21 = vpop.f32.mrf.mxu1 }
 0x25b   : > { %v1857_v38 = vadd.f32 %v1856_v21, %v1735_v2  ;;  %v3884_v45 = vpop.f32.mrf.mxu0 }
 0x25c   : > { %v3920_v18 = vpop.f32.mrf.mxu1 }
 0x25d   : > { %v1974_v42 = vpop.f32.mrf.mxu0 }
 0x25e   : > { %v2137_v10 = vpop.f32.mrf.mxu1  ;;  %v2013_v59 = vadd.f32 %v1974_v42, %v1822_v22 }
 0x25f   : > { %v3939_v44 = vpop.f32.mrf.mxu0 }
 0x260   : > { %v3975_v6 = vpop.f32.mrf.mxu1  ;;  %v2176_v56 = vadd.f32 %v2137_v10, %v2013_v59 }
 0x261   : > { %v1977_v60 = vpop.f32.mrf.mxu0 }
 0x262   : > { %v2140_v61 = vpop.f32.mrf.mxu1  ;;  %v2014_v50 = vadd.f32 %v1977_v60, %v1825_v40 }
 0x263   : > { %v3940_v1 = vpop.f32.mrf.mxu0 }
 0x264   : > { %v3976_v54 = vpop.f32.mrf.mxu1  ;;  %v2177_v28 = vadd.f32 %v2140_v61, %v2014_v50 }
 0x265   : > { %v1982_v5 = vpop.f32.mrf.mxu0 }
 0x266   : > { %v2145_v9 = vpop.f32.mrf.mxu1  ;;  %v2015_v11 = vadd.f32 %v1982_v5, %v1830_v7 }
 0x267   : > { %v3943_v19 = vpop.f32.mrf.mxu0 }
 0x268   : > { %v3979_v62 = vpop.f32.mrf.mxu1  ;;  %v2178_v51 = vadd.f32 %v2145_v9, %v2015_v11 }
 0x269   : > { %v1985_v47 = vpop.f32.mrf.mxu0 }
 0x26a   : > { %v2148_v14 = vpop.f32.mrf.mxu1  ;;  %v2016_v53 = vadd.f32 %v1985_v47, %v1833_v12 }
 0x26b   : > { %v3944_v25 = vpop.f32.mrf.mxu0 }
 0x26c   : > { %v3980_v22 = vpop.f32.mrf.mxu1  ;;  %v2179_v52 = vadd.f32 %v2148_v14, %v2016_v53 }
 0x26d   : > { %v1990_v27 = vpop.f32.mrf.mxu0 }
 0x26e   : > { %v2153_v41 = vpop.f32.mrf.mxu1  ;;  %v2017_v32 = vadd.f32 %v1990_v27, %v1838_v13 }
 0x26f   : > { %v3947_v4 = vpop.f32.mrf.mxu0 }
 0x270   : > { %v3983_v40 = vpop.f32.mrf.mxu1  ;;  %v2180_v17 = vadd.f32 %v2153_v41, %v2017_v32 }
 0x271   : > { %v1993_v0 = vpop.f32.mrf.mxu0 }
 0x272   : > { %v2156_v29 = vpop.f32.mrf.mxu1  ;;  %v2018_v31 = vadd.f32 %v1993_v0, %v1841_v16 }
 0x273   : > { %v3948_v30 = vpop.f32.mrf.mxu0 }
 0x274   : > { %v3984_v7 = vpop.f32.mrf.mxu1  ;;  %v2181_v35 = vadd.f32 %v2156_v29, %v2018_v31 }
 0x275   : > { %v1998_v37 = vpop.f32.mrf.mxu0 }
 0x276   : > { %v2161_v57 = vpop.f32.mrf.mxu1  ;;  %v2019_v23 = vadd.f32 %v1998_v37, %v1846_v15 }
 0x277   : > { %v3951_v43 = vpop.f32.mrf.mxu0 }
 0x278   : > { %v3987_v12 = vpop.f32.mrf.mxu1  ;;  %v2182_v3 = vadd.f32 %v2161_v57, %v2019_v23 }
 0x279   : > { %v2001_v26 = vpop.f32.mrf.mxu0 }
 0x27a   : > { %v2164_v49 = vpop.f32.mrf.mxu1  ;;  %v2020_v2 = vadd.f32 %v2001_v26, %v1849_v58 }
 0x27b   : > { %v3952_v21 = vpop.f32.mrf.mxu0 }
 0x27c   : > { %v3988_v13 = vpop.f32.mrf.mxu1  ;;  %v2183_v45 = vadd.f32 %v2164_v49, %v2020_v2 }
 0x27d   : > { %v2006_v18 = vpop.f32.mrf.mxu0 }
 0x27e   : > { %v2169_v42 = vpop.f32.mrf.mxu1  ;;  %v2021_v10 = vadd.f32 %v2006_v18, %v1854_v46 }
 0x27f   : > { %v3955_v59 = vpop.f32.mrf.mxu0 }
 0x280   : > { %v3991_v16 = vpop.f32.mrf.mxu1  ;;  %v2184_v44 = vadd.f32 %v2169_v42, %v2021_v10 }
 0x281   : > { %v2009_v6 = vpop.f32.mrf.mxu0 }
 0x282   : > { %v2172_v60 = vpop.f32.mrf.mxu1  ;;  %v2022_v61 = vadd.f32 %v2009_v6, %v1857_v38 }
 0x283   : > { %v3956_v50 = vpop.f32.mrf.mxu0 }
 0x284   : > { %v3992_v15 = vpop.f32.mrf.mxu1  ;;  %v2185_v1 = vadd.f32 %v2172_v60, %v2022_v61 }
 0x285   : > { %v2300_v54 = vpop.f32.mrf.mxu0 }
 0x286   : > { %v2463_v5 = vpop.f32.mrf.mxu1  ;;  %v2339_v9 = vadd.f32 %v2300_v54, %v2176_v56 }
 0x287   : > { %v4011_v11 = vpop.f32.mrf.mxu0 }
 0x288   : > { %v4047_v58 = vpop.f32.mrf.mxu1  ;;  %v5282_v19 = vadd.f32 %v2463_v5, %v2339_v9 }
 0x289   : > { %v2303_v62 = vpop.f32.mrf.mxu0 }
 0x28a   : > { %v2466_v47 = vpop.f32.mrf.mxu1  ;;  %v2340_v14 = vadd.f32 %v2303_v62, %v2177_v28 }
 0x28b   : > { %v4012_v46 = vpop.f32.mrf.mxu0 }
 0x28c   : > { %v4048_v53 = vpop.f32.mrf.mxu1  ;;  %v5284_v25 = vadd.f32 %v2466_v47, %v2340_v14 }
 0x28d   : > { %v2308_v22 = vpop.f32.mrf.mxu0 }
 0x28e   : > { %v2471_v27 = vpop.f32.mrf.mxu1  ;;  %v2341_v38 = vadd.f32 %v2308_v22, %v2178_v51 }
 0x28f   : > { %v4015_v41 = vpop.f32.mrf.mxu0 }
 0x290   : > { %v4051_v32 = vpop.f32.mrf.mxu1  ;;  %v5286_v4 = vadd.f32 %v2471_v27, %v2341_v38 }
 0x291   : > { %v2311_v40 = vpop.f32.mrf.mxu0 }
 0x292   : > { %v2474_v56 = vpop.f32.mrf.mxu1  ;;  %v2342_v0 = vadd.f32 %v2311_v40, %v2179_v52 }
 0x293   : > { %v4016_v29 = vpop.f32.mrf.mxu0 }
 0x294   : > { %v4052_v31 = vpop.f32.mrf.mxu1  ;;  %v5288_v30 = vadd.f32 %v2474_v56, %v2342_v0 }
 0x295   : > { %v2316_v7 = vpop.f32.mrf.mxu0 }
 0x296   : > { %v2479_v28 = vpop.f32.mrf.mxu1  ;;  %v2343_v37 = vadd.f32 %v2316_v7, %v2180_v17 }
 0x297   : > { %v4019_v57 = vpop.f32.mrf.mxu0 }
 0x298   : > { %v4055_v23 = vpop.f32.mrf.mxu1  ;;  %v5290_v43 = vadd.f32 %v2479_v28, %v2343_v37 }
 0x299   : > { %v2319_v12 = vpop.f32.mrf.mxu0 }
 0x29a   : > { %v2482_v51 = vpop.f32.mrf.mxu1  ;;  %v2344_v26 = vadd.f32 %v2319_v12, %v2181_v35 }
 0x29b   : > { %v4020_v49 = vpop.f32.mrf.mxu0 }
 0x29c   : > { %v4056_v2 = vpop.f32.mrf.mxu1  ;;  %v5292_v21 = vadd.f32 %v2482_v51, %v2344_v26 }
 0x29d   : > { %v2324_v13 = vpop.f32.mrf.mxu0 }
 0x29e   : > { %v2487_v52 = vpop.f32.mrf.mxu1  ;;  %v2345_v18 = vadd.f32 %v2324_v13, %v2182_v3 }
 0x29f   : > { %v4023_v42 = vpop.f32.mrf.mxu0 }
 0x2a0   : > { %v4059_v10 = vpop.f32.mrf.mxu1  ;;  %v5294_v59 = vadd.f32 %v2487_v52, %v2345_v18 }
 0x2a1   : > { %v2327_v16 = vpop.f32.mrf.mxu0 }
 0x2a2   : > { %v2490_v17 = vpop.f32.mrf.mxu1  ;;  %v2346_v6 = vadd.f32 %v2327_v16, %v2183_v45 }
 0x2a3   : > { %v4024_v60 = vpop.f32.mrf.mxu0 }
 0x2a4   : > { %v4060_v61 = vpop.f32.mrf.mxu1  ;;  %v5296_v50 = vadd.f32 %v2490_v17, %v2346_v6 }
 0x2a5   : > { %v2332_v15 = vpop.f32.mrf.mxu0 }
 0x2a6   : > { %v2495_v35 = vpop.f32.mrf.mxu1  ;;  %v2347_v54 = vadd.f32 %v2332_v15, %v2184_v44 }
 0x2a7   : > { %v4027_v5 = vpop.f32.mrf.mxu0 }
 0x2a8   : > { %v4063_v9 = vpop.f32.mrf.mxu1  ;;  %v5298_v11 = vadd.f32 %v2495_v35, %v2347_v54 }
 0x2a9   : > { %v2335_v58 = vpop.f32.mrf.mxu0 }
 0x2aa   : > { %v2498_v3 = vpop.f32.mrf.mxu1  ;;  %v2348_v62 = vadd.f32 %v2335_v58, %v2185_v1 }
 0x2ab   : > { %v4028_v47 = vpop.f32.mrf.mxu0 }
 0x2ac   : > { %v4064_v14 = vpop.f32.mrf.mxu1  ;;  %v5300_v46 = vadd.f32 %v2498_v3, %v2348_v62 }
 0x2ad   : > { %v2626_v53 = vpop.f32.mrf.mxu0  ;;  %v5323_v14 = vld [vmem:[%s5397_s7] ss:$0 sm:$0xff] }
 0x2ae   : > { %v2789_v45 = vpop.f32.mrf.mxu1  ;;  %v2665_v54 = vadd.f32 %v2626_v53, %v5282_v19  ;;  %v5328_v19 = vld [vmem:[%s5395_s5] ss:$0 sm:$0xff] }
 0x2af   : > { %v4083_v22 = vpop.f32.mrf.mxu0 }
 0x2b0   : > { %v4119_v27 = vpop.f32.mrf.mxu1  ;;  %v2828_v62 = vadd.f32 %v2789_v45, %v2665_v54 }
 0x2b1   : > { %v2629_v38 = vpop.f32.mrf.mxu0 }
 0x2b2   : > { %v2792_v41 = vpop.f32.mrf.mxu1  ;;  %v2666_v47 = vadd.f32 %v2629_v38, %v5284_v25 }
 0x2b3   : > { %v4084_v32 = vpop.f32.mrf.mxu0 }
 0x2b4   : > { %v4120_v40 = vpop.f32.mrf.mxu1  ;;  %v1493_v32 = vadd.f32 %v5323_v14, %v4970_v36 }
 0x2b5   : > { %v2634_v44 = vpop.f32.mrf.mxu0  ;;  %v2829_v40 = vadd.f32 %v2792_v41, %v2666_v47 }
 0x2b6   : > { %v2797_v56 = vpop.f32.mrf.mxu1  ;;  %v2667_v45 = vadd.f32 %v2634_v44, %v5286_v4  ;;  %v1501_v4 = vadd.f32 %v5323_v14, %v4990_v20  ;;  %v1504_v20 = vadd.f32 %v5323_v14, %v4998_v24 }
 0x2b7   : > { %v4087_v0 = vpop.f32.mrf.mxu0 }
 0x2b8   : > { %v4123_v29 = vpop.f32.mrf.mxu1 }
 0x2b9   : > { %v2637_v31 = vpop.f32.mrf.mxu0 }
 0x2ba   : > { %v2800_v7 = vpop.f32.mrf.mxu1 }
 0x2bb   : > { %v4088_v28 = vpop.f32.mrf.mxu0 }
 0x2bc   : > { %v4124_v1 = vpop.f32.mrf.mxu1 }
 0x2bd   : > { %v2642_v37 = vpop.f32.mrf.mxu0  ;;  %v1496_v1 = vadd.f32 %v5323_v14, %v4984_v8 }
 0x2be   : > { %v2805_v57 = vpop.f32.mrf.mxu1  ;;  %v2669_v8 = vadd.f32 %v2642_v37, %v5290_v43  ;;  %v1509_v37 = vadd.f32 %v5323_v14, %v5008_v34 }
 0x2bf   : > { %v4091_v23 = vpop.f32.mrf.mxu0 }
 0x2c0   : > { %v4127_v12 = vpop.f32.mrf.mxu1  ;;  %v2830_v23 = vadd.f32 %v2797_v56, %v2667_v45  ;;  %v1517_v45 = vadd.f32 %v5323_v14, %v5031_v55 }
 0x2c1   : > { %v2645_v51 = vpop.f32.mrf.mxu0  ;;  %v2668_v12 = vadd.f32 %v2637_v31, %v5288_v30 }
 0x2c2   : > { %v5302_v26 = vpop.f32.mrf.mxu1 }
 0x2c3   : > { %v4092_v49 = vpop.f32.mrf.mxu0 }
 0x2c4   : > { %v4128_v2 = vpop.f32.mrf.mxu1 }
 0x2c5   : > { %v2650_v13 = vpop.f32.mrf.mxu0 }
 0x2c6   : > { %v5304_v52 = vpop.f32.mrf.mxu1  ;;  %v2671_v47 = vadd.f32 %v2650_v13, %v5294_v59 }
 0x2c7   : > { %v4095_v18 = vpop.f32.mrf.mxu0 }
 0x2c8   : > { %v4131_v42 = vpop.f32.mrf.mxu1  ;;  %v2831_v18 = vadd.f32 %v2800_v7, %v2668_v12 }
 0x2c9   : > { %v5306_v10 = vpop.f32.mrf.mxu0 }
 0x2ca   : > { %v5308_v16 = vpop.f32.mrf.mxu1  ;;  %v2672_v34 = vadd.f32 %v5306_v10, %v5296_v50 }
 0x2cb   : > { %v4096_v17 = vpop.f32.mrf.mxu0 }
 0x2cc   : > { %v4132_v6 = vpop.f32.mrf.mxu1 }
 0x2cd   : > { %v5310_v60 = vpop.f32.mrf.mxu0 }
 0x2ce   : > { %v5312_v61 = vpop.f32.mrf.mxu1 }
 0x2cf   : > { %v4099_v15 = vpop.f32.mrf.mxu0 }
 0x2d0   : > { %v4135_v35 = vpop.f32.mrf.mxu1  ;;  %v2832_v15 = vadd.f32 %v2805_v57, %v2669_v8 }
 0x2d1   : > { %v5315_v5 = vpop.f32.mrf.mxu0  ;;  %v2670_v35 = vadd.f32 %v2645_v51, %v5292_v21 }
 0x2d2   : > { %v5317_v9 = vpop.f32.mrf.mxu1 }
 0x2d3   : > { %v4100_v58 = vpop.f32.mrf.mxu0 }
 0x2d4   : > { %v4136_v3 = vpop.f32.mrf.mxu1 }
 0x2d5   : > { %v2952_v22 = vpop.f32.mrf.mxu0 }
 0x2d6   : > { %v2991_v53 = vadd.f32 %v2952_v22, %v2828_v62  ;;  %v2833_v62 = vadd.f32 %v5302_v26, %v2670_v35 }
 0x2d7   : > { %v4155_v27 = vpop.f32.mrf.mxu0 }
 0x2d8   : > { %v3008_v25 = vadd.f32 %v5328_v19, %v2991_v53  ;;  %v1512_v27 = vadd.f32 %v5323_v14, %v5020_v39 }
 0x2d9   : > { %v2955_v38 = vpop.f32.mrf.mxu0 }
 0x2da   : > { %v3018_v0 = vadd.f32 %v3008_v25, %v1493_v32  ;;  %v2992_v29 = vadd.f32 %v2955_v38, %v2829_v40  ;;  %v2834_v32 = vadd.f32 %v5304_v52, %v2671_v47  ;;  %v2835_v38 = vadd.f32 %v5308_v16, %v2672_v34 }
 0x2db   : > { %v4156_v28 = vpop.f32.mrf.mxu0  ;;  %v2674_v16 = vadd.f32 %v5315_v5, %v5300_v46  ;;  %v1528_v5 = vadd.f32 %v5323_v14, %v5067_v33 }
 0x2dc   : > { %v3009_v49 = vadd.f32 %v5328_v19, %v2992_v29 }
 0x2dd   : > { %v2960_v2 = vpop.f32.mrf.mxu0 }
 0x2de   : > { %v3019_v36 = vadd.f32 %v3009_v49, %v1496_v1  ;;  %v2993_v41 = vadd.f32 %v2960_v2, %v2830_v23  ;;  %v1520_v1 = vadd.f32 %v5323_v14, %v5044_v63  ;;  %v1525_v2 = vadd.f32 %v5323_v14, %v5053_v48 }
 0x2df   : > { %v4159_v44 = vpop.f32.mrf.mxu0 }
 0x2e0   : > { %v3426_v56 = vpack.c.bf16 %v3019_v36, %v3018_v0  ;;  %v3010_v30 = vadd.f32 %v5328_v19, %v2993_v41  ;;  %v2673_v0 = vadd.f32 %v5310_v60, %v5298_v11  ;;  %v2837_v36 = vadd.f32 %v5317_v9, %v2674_v16 }
 0x2e1   : > { %v2963_v31 = vpop.f32.mrf.mxu0 }
 0x2e2   : > { %3427 = vst [vmem:[%s5344_s26] sm:$0xff] %v3426_v56   ;;  %v3020_v42 = vadd.f32 %v3010_v30, %v1501_v4  ;;  %v2994_v17 = vadd.f32 %v2963_v31, %v2831_v18  ;;  %v2836_v55 = vadd.f32 %v5312_v61, %v2673_v0 }
 0x2e3   : > { %v4160_v6 = vpop.f32.mrf.mxu0 }
 0x2e4   : > { %v3011_v54 = vadd.f32 %v5328_v19, %v2994_v17 }
 0x2e5   : > { %v2968_v7 = vpop.f32.mrf.mxu0 }
 0x2e6   : > { %v3021_v58 = vadd.f32 %v3011_v54, %v1504_v20  ;;  %v2995_v43 = vadd.f32 %v2968_v7, %v2832_v15 }
 0x2e7   : > { %v4163_v3 = vpop.f32.mrf.mxu0 }
 0x2e8   : > { %v3431_v22 = vpack.c.bf16 %v3021_v58, %v3020_v42  ;;  %v3012_v53 = vadd.f32 %v5328_v19, %v2995_v43 }
 0x2e9   : > { %v2971_v24 = vpop.f32.mrf.mxu0 }
 0x2ea   : > { %3448 = vst [vmem:[%s5344_s26 + $0x8] sm:$0xff] %v3431_v22   ;;  %v3022_v57 = vadd.f32 %v3012_v53, %v1509_v37  ;;  %v2996_v21 = vadd.f32 %v2971_v24, %v2833_v62 }
 0x2eb   : > { %v4164_v51 = vpop.f32.mrf.mxu0 }
 0x2ec   : > { %v3013_v26 = vadd.f32 %v5328_v19, %v2996_v21 }
 0x2ed   : > { %v2976_v59 = vpop.f32.mrf.mxu0 }
 0x2ee   : > { %v3023_v13 = vadd.f32 %v3013_v26, %v1512_v27  ;;  %v2997_v40 = vadd.f32 %v2976_v59, %v2834_v32 }
 0x2ef   : > { %v4167_v25 = vpop.f32.mrf.mxu0 }
 0x2f0   : > { %v3436_v39 = vpack.c.bf16 %v3023_v13, %v3022_v57  ;;  %v3014_v52 = vadd.f32 %v5328_v19, %v2997_v40 }
 0x2f1   : > { %v2979_v29 = vpop.f32.mrf.mxu0 }
 0x2f2   : > { %3449 = vst [vmem:[%s5344_s26 + $0x10] sm:$0xff] %v3436_v39   ;;  %v3024_v50 = vadd.f32 %v3014_v52, %v1517_v45  ;;  %v2998_v10 = vadd.f32 %v2979_v29, %v2835_v38 }
 0x2f3   : > { %v4168_v28 = vpop.f32.mrf.mxu0 }
 0x2f4   : > { %v3015_v23 = vadd.f32 %v5328_v19, %v2998_v10 }
 0x2f5   : > { %v2984_v11 = vpop.f32.mrf.mxu0 }
 0x2f6   : > { %v3025_v60 = vadd.f32 %v3015_v23, %v1520_v1  ;;  %v2999_v12 = vadd.f32 %v2984_v11, %v2836_v55 }
 0x2f7   : > { %v4171_v49 = vpop.f32.mrf.mxu0 }
 0x2f8   : > { %v3441_v41 = vpack.c.bf16 %v3025_v60, %v3024_v50  ;;  %v3016_v63 = vadd.f32 %v5328_v19, %v2999_v12 }
 0x2f9   : > { %v2987_v4 = vpop.f32.mrf.mxu0 }
 0x2fa   : > { %3450 = vst [vmem:[%s5344_s26 + $0x18] sm:$0xff] %v3441_v41   ;;  %v3026_v61 = vadd.f32 %v3016_v63, %v1525_v2  ;;  %v3000_v44 = vadd.f32 %v2987_v4, %v2837_v36 }
 0x2fb   : > { %v4172_v46 = vpop.f32.mrf.mxu0 }
 0x2fc   : > { %v3017_v18 = vadd.f32 %v5328_v19, %v3000_v44 }
 0x2fe   : > { %v3027_v8 = vadd.f32 %v3017_v18, %v1528_v5 }
 0x300   : > { %v3446_v56 = vpack.c.bf16 %v3027_v8, %v3026_v61 }
 0x302   : > { %3451 = vst [vmem:[%s5344_s26 + $0x20] sm:$0xff] %v3446_v56  }
 0x303 PF: > { %s18_s27 = sadd.s32 1, %s4270_s27  }
 0x304   : > { %p15_p4 = scmp.ge.s32.totalorder %s18_s27, 4  }
 0x306   :  { %17 = sbr.rel (!%p15_p4) target bundleno = 1 (0x1), region = 98 }

// kernel: _lambda_.3
= control target key start
LH: loop header
LB: loop body
LE: loop exit
PB: predicated region body
PF: predicated region fallthrough
CT: control target
= control target key end

     0   :  { %s4957_s21 = smov 0   ;;  %s6174_s0 = inlined_call_operand.vmem [shape: f32[2,110,128], index: 0, kind: input, shape index: {}]   ;;  %s6175_s1 = inlined_call_operand.vmem [shape: f32[80,1], index: 1, kind: input, shape index: {}]   ;;  %s6176_s2 = inlined_call_operand.vmem [shape: bf16[9,128,128], index: 2, kind: input, shape index: {}]   ;;  %s6177_s3 = inlined_call_operand.vmem [shape: f32[1,128], index: 3, kind: input, shape index: {}]   ;;  %s6178_s4 = inlined_call_operand.vmem [shape: bf16[9,128,128], index: 4, kind: input, shape index: {}]   ;;  %s6179_s5 = inlined_call_operand.vmem [shape: f32[1,128], index: 5, kind: input, shape index: {}]   ;;  %s6180_s6 = inlined_call_operand.vmem [shape: bf16[2,80,128], index: 6, kind: output, shape index: {}]  }
   0x1 LB: > { %s3398_s22 = sadd.s32 4294967295, %s4917_s21   ;;  %p3402_p0 = scmp.ge.s32.totalorder %s4917_s21, 1  ;;  %s4917_s21 = sphi %s4957_s21, %s16_s21  }
   0x2   : > { %p212_p1 = scmp.lt.s32.totalorder %s4917_s21, 3 }
   0x4   : > { %p213_p2 = pnand %p3402_p0, %p212_p1 }
   0x5   : > { %p242_p3 = scmp.lt.s32.totalorder (!%p213_p2), %s3398_s22, 1 }
   0x6   : > { %216 = sbr.rel (%p213_p2) target bundleno = 813 (0x32d), region = 44 }
   0xb   : > { %v4755_v0 = vld [vmem:[%s6176_s2 + $0x78] sm:$0xff]   ;;  %v4919_v1 = vmov 0.0   ;;  %v4757_v3 = vld [vmem:[%s6176_s2 + $0x70] sm:$0xff]   ;;  %vm4920_vm0 = vmmov 0   ;;  %v4759_v5 = vld [vmem:[%s6176_s2 + $0x68] sm:$0xff]   ;;  %s6182_s22 = smov (!%p242_p3, %s3398_s22), 1 }
   0xc   : > { %4092 = vmatprep.subr.bf16.mxu0 %v4919_v1  ;;  %1796 = vst [vmem:[#allocation2] sm:$0xff] %v4919_v1  ;;  %1797 = vst [vmem:[#allocation2 + $0x8] sm:$0xff] %v4919_v1  ;;  %4128 = vmatprep.subr.bf16.mxu1 %v4919_v1  ;;  %v4756_v2 = vld [vmem:[%s6176_s2 + $0x38] sm:$0xff]   ;;  %v4758_v4 = vld [vmem:[%s6176_s2 + $0x30] sm:$0xff]   ;;  %s4740_s19 = smul.u32 112, %s6182_s22 }
   0xd   : > { %1798 = vst [vmem:[#allocation2 + $0x10] sm:$0xff] %v4919_v1  ;;  %1799 = vst [vmem:[#allocation2 + $0x18] sm:$0xff] %v4919_v1  ;;  %4093 = vmatpush3.bf16.msra.mxu0 %v4755_v0  ;;  %4108 = vmatprep.mubr.msk.bf16.mxu0 %vm4920_vm0, %v4919_v1  ;;  %v4760_v6 = vld [vmem:[%s6176_s2 + $0x28] sm:$0xff]   ;;  %v4761_v7 = vld [vmem:[%s6176_s2 + $0x60] sm:$0xff]   ;;  %s4741_s20 = smul.u32 40, %s6182_s22 }
   0xe   : > { %1800 = vst [vmem:[#allocation2 + $0x20] sm:$0xff] %v4919_v1  ;;  %1801 = vst [vmem:[#allocation2 + $0x28] sm:$0xff] %v4919_v1  ;;  %4129 = vmatpush3.bf16.msra.mxu1 %v4756_v2  ;;  %4094 = vmatprep.subr.bf16.mxu0 %v4919_v1  ;;  %v4762_v8 = vld [vmem:[%s6176_s2 + $0x20] sm:$0xff]   ;;  %v4763_v9 = vld [vmem:[%s6176_s2 + $0x58] sm:$0xff]   ;;  %s5040_s28 = scalar_lea.vmem %s6174_s0, %s4740_s19 }
   0xf   : > { %1802 = vst [vmem:[#allocation2 + $0x30] sm:$0xff] %v4919_v1  ;;  %1803 = vst [vmem:[#allocation2 + $0x38] sm:$0xff] %v4919_v1  ;;  %4130 = vmatprep.subr.bf16.mxu1 %v4919_v1  ;;  %4144 = vmatprep.mubr.msk.bf16.mxu1 %vm4920_vm0, %v4919_v1  ;;  %v4764_v10 = vld [vmem:[%s6176_s2 + $0x18] sm:$0xff]   ;;  %v4765_v11 = vld [vmem:[%s6176_s2 + $0x50] sm:$0xff]   ;;  %s6135_s25 = scalar_lea.vmem %s6180_s6, %s4741_s20 }
  0x10   : > { %1804 = vst [vmem:[#allocation2 + $0x40] sm:$0xff] %v4919_v1  ;;  %1805 = vst [vmem:[#allocation2 + $0x48] sm:$0xff] %v4919_v1  ;;  %v4766_v12 = vld [vmem:[%s6176_s2 + $0x10] sm:$0xff]   ;;  %v4767_v13 = vld [vmem:[%s6176_s2 + $0x48] sm:$0xff]  }
  0x11   : > { %1806 = vst [vmem:[#allocation2 + $0x50] sm:$0xff] %v4919_v1  ;;  %1807 = vst [vmem:[#allocation2 + $0x58] sm:$0xff] %v4919_v1  ;;  %4095 = vmatpush3.bf16.msra.mxu0 %v4757_v3  ;;  %v4768_v14 = vld [vmem:[%s6176_s2 + $0x8] sm:$0xff]   ;;  %v4769_v15 = vld [vmem:[%s6176_s2 + $0x40] sm:$0xff]  }
  0x12   : > { %1808 = vst [vmem:[#allocation2 + $0x60] sm:$0xff] %v4919_v1  ;;  %4131 = vmatpush3.bf16.msra.mxu1 %v4758_v4  ;;  %4096 = vmatprep.subr.bf16.mxu0 %v4919_v1  ;;  %v284_v16 = vld [vmem:[%s5040_s28 + $0x1] sm:$0xff]  ;;  %v285_v18 = vld [vmem:[%s5040_s28 + $0x9] sm:$0xff]  ;;  %v4771_v23 = vld [vmem:[%s6176_s2 + $0xb8] sm:$0xff]  }
  0x13   : > { %4132 = vmatprep.subr.bf16.mxu1 %v4919_v1  ;;  %v4770_v17 = vld [vmem:[%s6176_s2] sm:$0xff]   ;;  %v254_v20 = vld [vmem:[%s5040_s28 + $0x8] sm:$0xff]  ;;  %v294_v21 = vpack.c.bf16 %v285_v18, %v284_v16  ;;  %v4774_v24 = vld [vmem:[%s6176_s2 + $0xf8] sm:$0xff]  }
  0x14   : > { %v253_v19 = vld [vmem:[%s5040_s28] sm:$0xff]  ;;  %v4772_v25 = vld [vmem:[%s6176_s2 + $0xb0] sm:$0xff]   ;;  %v256_v29 = vld [vmem:[%s5040_s28 + $0x18] sm:$0xff] }
  0x15   : > { %4097 = vmatpush3.bf16.msra.mxu0 %v4759_v5  ;;  %v263_v22 = vpack.c.bf16 %v254_v20, %v253_v19  ;;  %v286_v26 = vld [vmem:[%s5040_s28 + $0x11] sm:$0xff]  ;;  %v287_v27 = vld [vmem:[%s5040_s28 + $0x19] sm:$0xff]  ;;  %v4773_v33 = vld [vmem:[%s6176_s2 + $0xa8] sm:$0xff]  }
  0x16   : > { %4133 = vmatpush3.bf16.msra.mxu1 %v4760_v6  ;;  %4098 = vmatprep.subr.bf16.mxu0 %v4919_v1  ;;  %v255_v28 = vld [vmem:[%s5040_s28 + $0x10] sm:$0xff]  ;;  %v295_v31 = vpack.c.bf16 %v287_v27, %v286_v26  ;;  %v288_v34 = vld [vmem:[%s5040_s28 + $0x21] sm:$0xff]  ;;  %v4778_v43 = vld [vmem:[%s6176_s2 + $0x98] sm:$0xff]  }
  0x17   : > { %4134 = vmatprep.subr.bf16.mxu1 %v4919_v1  ;;  %v4775_v30 = vld [vmem:[%s6176_s2 + $0xf0] sm:$0xff]   ;;  %v264_v32 = vpack.c.bf16 %v256_v29, %v255_v28  ;;  %v4777_v35 = vld [vmem:[%s6176_s2 + $0xe8] sm:$0xff]   ;;  %v257_v37 = vld [vmem:[%s5040_s28 + $0x20] sm:$0xff] }
  0x18   : > { %v289_v36 = vld [vmem:[%s5040_s28 + $0x29] sm:$0xff]  ;;  %v4776_v38 = vld [vmem:[%s6176_s2 + $0xa0] sm:$0xff]   ;;  %v290_v44 = vld [vmem:[%s5040_s28 + $0x31] sm:$0xff] }
  0x19   : > { %4099 = vmatpush3.bf16.msra.mxu0 %v4761_v7  ;;  %v258_v39 = vld [vmem:[%s5040_s28 + $0x28] sm:$0xff]  ;;  %v4779_v40 = vld [vmem:[%s6176_s2 + $0xe0] sm:$0xff]   ;;  %v296_v41 = vpack.c.bf16 %v289_v36, %v288_v34  ;;  %v4781_v45 = vld [vmem:[%s6176_s2 + $0xd8] sm:$0xff]  }
  0x1a   : > { %4135 = vmatpush3.bf16.msra.mxu1 %v4762_v8  ;;  %4100 = vmatprep.subr.bf16.mxu0 %v4919_v1  ;;  %v265_v42 = vpack.c.bf16 %v258_v39, %v257_v37  ;;  %v291_v46 = vld [vmem:[%s5040_s28 + $0x39] sm:$0xff]  ;;  %v259_v47 = vld [vmem:[%s5040_s28 + $0x30] sm:$0xff]  ;;  %v4782_v53 = vld [vmem:[%s6176_s2 + $0x88] sm:$0xff]  }
  0x1b   : > { %4136 = vmatprep.subr.bf16.mxu1 %v4919_v1  ;;  %v4780_v48 = vld [vmem:[%s6176_s2 + $0x90] sm:$0xff]   ;;  %v260_v49 = vld [vmem:[%s5040_s28 + $0x38] sm:$0xff]  ;;  %v297_v51 = vpack.c.bf16 %v291_v46, %v290_v44  ;;  %v4784_v54 = vld [vmem:[%s6176_s2 + $0xc8] sm:$0xff]  }
  0x1c   : > { %v4783_v50 = vld [vmem:[%s6176_s2 + $0xd0] sm:$0xff]   ;;  %v266_v52 = vpack.c.bf16 %v260_v49, %v259_v47  ;;  %v292_v55 = vld [vmem:[%s5040_s28 + $0x41] sm:$0xff]  ;;  %v4787_v4 = vld [vmem:[%s6176_s2 + $0x138] sm:$0xff]  }
  0x1d   : > { %4101 = vmatpush3.bf16.msra.mxu0 %v4763_v9  ;;  %v293_v56 = vld [vmem:[%s5040_s28 + $0x49] sm:$0xff]  ;;  %v261_v57 = vld [vmem:[%s5040_s28 + $0x40] sm:$0xff]  ;;  %v722_v2 = vld [vmem:[%s5040_s28 + $0x12] sm:$0xff] }
  0x1e   : > { %4137 = vmatpush3.bf16.msra.mxu1 %v4764_v10  ;;  %4102 = vmatprep.subr.bf16.mxu0 %v4919_v1  ;;  %v262_v58 = vld [vmem:[%s5040_s28 + $0x48] sm:$0xff]  ;;  %v4785_v59 = vld [vmem:[%s6176_s2 + $0x80] sm:$0xff]   ;;  %v298_v61 = vpack.c.bf16 %v293_v56, %v292_v55  ;;  %v4790_v6 = vld [vmem:[%s6176_s2 + $0x178] sm:$0xff]  }
  0x1f   : > { %4138 = vmatprep.subr.bf16.mxu1 %v4919_v1  ;;  %v4786_v60 = vld [vmem:[%s6176_s2 + $0xc0] sm:$0xff]   ;;  %v267_v62 = vpack.c.bf16 %v262_v58, %v261_v57  ;;  %v559_v0 = vld [vmem:[%s5040_s28 + $0xa] sm:$0xff]  ;;  %v4806_v44 = vld [vmem:[%s6176_s2 + $0x1f8] sm:$0xff]  }
  0x20   : > { %v558_v63 = vld [vmem:[%s5040_s28 + $0x2] sm:$0xff]  ;;  %v731_v5 = vpack.c.bf16 %v722_v2, %v559_v0  ;;  %v4788_v7 = vld [vmem:[%s6176_s2 + $0x130] sm:$0xff]   ;;  %v561_v8 = vld [vmem:[%s5040_s28 + $0x1a] sm:$0xff] }
  0x21   : > { %4103 = vmatpush3.bf16.msra.mxu0 %v4765_v11  ;;  %v568_v3 = vpack.c.bf16 %v559_v0, %v558_v63  ;;  %v724_v9 = vld [vmem:[%s5040_s28 + $0x22] sm:$0xff]  ;;  %v4791_v10 = vld [vmem:[%s6176_s2 + $0x170] sm:$0xff]   ;;  %v569_v11 = vpack.c.bf16 %v561_v8, %v722_v2  ;;  %v4921_v0 = vmov 0  }
  0x22   : > { %4139 = vmatpush3.bf16.msra.mxu1 %v4766_v12  ;;  %4104 = vmatprep.subr.bf16.mxu0 %v4919_v1  ;;  %v732_v12 = vpack.c.bf16 %v724_v9, %v561_v8  ;;  %v4792_v16 = vld [vmem:[%s6176_s2 + $0x120] sm:$0xff]   ;;  %v4799_v26 = vld [vmem:[%s6176_s2 + $0x150] sm:$0xff]   ;;  %v4798_v29 = vld [vmem:[%s6176_s2 + $0x108] sm:$0xff]  }
  0x23   : > { %4140 = vmatprep.subr.bf16.mxu1 %v4919_v1  ;;  %v4795_v18 = vld [vmem:[%s6176_s2 + $0x160] sm:$0xff]   ;;  %v884_v37 = vld [vmem:[%s5040_s28 + $0xb] sm:$0xff]  ;;  %v889_v56 = vld [vmem:[%s5040_s28 + $0x33] sm:$0xff]  ;;  %4753 = vset.pattern.permute.xlu0 %v4921_v0 }
  0x24   : > { %v4802_v34 = vld [vmem:[%s6176_s2 + $0x140] sm:$0xff]   ;;  %v1047_v39 = vld [vmem:[%s5040_s28 + $0xc] sm:$0xff]  ;;  %4754 = vset.pattern.permute.xlu1 %v4921_v0 }
  0x25   : > { %4105 = vmatpush3.bf16.msra.mxu0 %v4767_v13  ;;  %v4789_v13 = vld [vmem:[%s6176_s2 + $0x128] sm:$0xff]   ;;  %v886_v46 = vld [vmem:[%s5040_s28 + $0x1b] sm:$0xff] }
  0x26   : > { %4141 = vmatpush3.bf16.msra.mxu1 %v4768_v14  ;;  %4106 = vmatprep.subr.bf16.mxu0 %v4919_v1  ;;  %v4793_v14 = vld [vmem:[%s6176_s2 + $0x168] sm:$0xff]   ;;  %v4808_v57 = vld [vmem:[%s6176_s2 + $0x1a0] sm:$0xff]  }
  0x27   : > { %4142 = vmatprep.subr.bf16.mxu1 %v4919_v1  ;;  %v887_v47 = vld [vmem:[%s5040_s28 + $0x23] sm:$0xff]  ;;  %v888_v55 = vld [vmem:[%s5040_s28 + $0x2b] sm:$0xff] }
  0x28   : > { %v5281_v49 = vld [vmem:[%s5040_s28 + $0x24] sm:$0xff]  ;;  %v5307_v58 = vld [vmem:[%s5040_s28 + $0x2c] sm:$0xff]  ;;  %v896_v63 = vpack.c.bf16 %v889_v56, %v888_v55  ;;  %v5345_v8 = vld [vmem:[%s5040_s28 + $0x3c] sm:$0xff] }
  0x29   : > { %4107 = vmatpush3.bf16.msra.mxu0 %v4769_v15  ;;  %v563_v15 = vld [vmem:[%s5040_s28 + $0x2a] sm:$0xff]  ;;  %v1381_v55 = vld [vmem:[%s5040_s28 + $0x55] sm:$0xff]  ;;  %v1382_v56 = vld [vmem:[%s5040_s28 + $0x5d] sm:$0xff] }
  0x2a   : > { %4143 = vmatpush3.bf16.msra.mxu1 %v4770_v17  ;;  %4164 = vmatprep.subr.bf16.mxu0 %v4919_v1  ;;  %v726_v17 = vld [vmem:[%s5040_s28 + $0x32] sm:$0xff]  ;;  %v570_v19 = vpack.c.bf16 %v563_v15, %v724_v9  ;;  %v5348_v9 = vld [vmem:[%s5040_s28 + $0x44] sm:$0xff] }
  0x2b   : > { %4200 = vmatprep.subr.bf16.mxu1 %v4919_v1  ;;  %v733_v20 = vpack.c.bf16 %v726_v17, %v563_v15  ;;  %v4816_v15 = vld [vmem:[%s6176_s2 + $0x1c8] sm:$0xff]  }
  0x2c   : > { %4109 = vmatmul.mubr.bf16.vlgmr.msra.gmra.mxu0 %v294_v21  ;;  %v4794_v21 = vld [vmem:[%s6176_s2 + $0x118] sm:$0xff]   ;;  %v1539_v0 = vld [vmem:[%s5040_s28 + $0x2e] sm:$0xff] }
  0x2d   : > { %4145 = vmatmul.mubr.bf16.vlgmr.msra.gmra.mxu1 %v263_v22  ;;  %4165 = vmatpush3.bf16.msra.mxu0 %v4771_v23  ;;  %v4797_v22 = vld [vmem:[%s6176_s2 + $0x158] sm:$0xff]  }
  0x2e   : > { %4166 = vmatprep.subr.bf16.mxu0 %v4919_v1  ;;  %4112 = vmatprep.mubr.msk.bf16.mxu0 %vm4920_vm0, %v4919_v1  ;;  %v565_v23 = vld [vmem:[%s5040_s28 + $0x3a] sm:$0xff] }
  0x2f   : > { %4148 = vmatprep.mubr.msk.bf16.mxu1 %vm4920_vm0, %v4919_v1  ;;  %4201 = vmatpush3.bf16.msra.mxu1 %v4774_v24  ;;  %v4796_v24 = vld [vmem:[%s6176_s2 + $0x110] sm:$0xff]   ;;  %v571_v27 = vpack.c.bf16 %v565_v23, %v726_v17 }
  0x30   : > { %4202 = vmatprep.subr.bf16.mxu1 %v4919_v1  ;;  %v893_v17 = vld [vmem:[%s5040_s28 + $0x53] sm:$0xff] }
  0x31   : > { %4167 = vmatpush3.bf16.msra.mxu0 %v4772_v25  ;;  %v728_v25 = vld [vmem:[%s5040_s28 + $0x42] sm:$0xff] }
  0x32   : > { %4168 = vmatprep.subr.bf16.mxu0 %v4919_v1  ;;  %v734_v28 = vpack.c.bf16 %v728_v25, %v565_v23  ;;  %v4818_v23 = vld [vmem:[%s6176_s2 + $0x1c0] sm:$0xff]  }
  0x33   : > { %4203 = vmatpush3.bf16.msra.mxu1 %v4775_v30  ;;  %v4800_v30 = vld [vmem:[%s6176_s2 + $0x148] sm:$0xff]  }
  0x34   : > { %4113 = vmatmul.mubr.bf16.gmra.mxu0 %v295_v31  ;;  %4204 = vmatprep.subr.bf16.mxu1 %v4919_v1  ;;  %v567_v31 = vld [vmem:[%s5040_s28 + $0x4a] sm:$0xff] }
  0x35   : > { %4149 = vmatmul.mubr.bf16.gmra.mxu1 %v264_v32  ;;  %4169 = vmatpush3.bf16.msra.mxu0 %v4773_v33  ;;  %v730_v32 = vld [vmem:[%s5040_s28 + $0x52] sm:$0xff]  ;;  %v4801_v33 = vld [vmem:[%s6176_s2 + $0x100] sm:$0xff]  }
  0x36   : > { %4116 = vmatprep.mubr.msk.bf16.mxu0 %vm4920_vm0, %v4919_v1  ;;  %4152 = vmatprep.mubr.msk.bf16.mxu1 %vm4920_vm0, %v4919_v1  ;;  %v735_v36 = vpack.c.bf16 %v730_v32, %v567_v31 }
  0x37   : > { %4170 = vmatprep.subr.bf16.mxu0 %v4919_v1  ;;  %4205 = vmatpush3.bf16.msra.mxu1 %v4777_v35  ;;  %v572_v35 = vpack.c.bf16 %v567_v31, %v728_v25  ;;  %v1733_v31 = vld [vmem:[%s6175_s1 + $0x38] sm:$0xff] }
  0x38   : > { %4206 = vmatprep.subr.bf16.mxu1 %v4919_v1 }
  0x39   : > { %4171 = vmatpush3.bf16.msra.mxu0 %v4776_v38  ;;  %v885_v38 = vld [vmem:[%s5040_s28 + $0x13] sm:$0xff] }
  0x3a   : > { %4172 = vmatprep.subr.bf16.mxu0 %v4919_v1 }
  0x3b   : > { %4207 = vmatpush3.bf16.msra.mxu1 %v4779_v40  ;;  %v5258_v40 = vld [vmem:[%s5040_s28 + $0x14] sm:$0xff] }
  0x3c   : > { %4117 = vmatmul.mubr.bf16.gmra.mxu0 %v296_v41  ;;  %4208 = vmatprep.subr.bf16.mxu1 %v4919_v1  ;;  %v4803_v41 = vld [vmem:[%s6176_s2 + $0x1b8] sm:$0xff]  }
  0x3d   : > { %4153 = vmatmul.mubr.bf16.gmra.mxu1 %v265_v42  ;;  %4173 = vmatpush3.bf16.msra.mxu0 %v4778_v43  ;;  %v894_v42 = vpack.c.bf16 %v885_v38, %v884_v37  ;;  %v1057_v43 = vpack.c.bf16 %v5258_v40, %v1047_v39  ;;  %v1375_v37 = vld [vmem:[%s5040_s28 + $0x25] sm:$0xff]  ;;  %v1376_v38 = vld [vmem:[%s5040_s28 + $0x2d] sm:$0xff]  ;;  %v1221_v39 = vpack.c.bf16 %v5307_v58, %v5281_v49 }
  0x3e   : > { %4120 = vmatprep.mubr.msk.bf16.mxu0 %vm4920_vm0, %v4919_v1  ;;  %4156 = vmatprep.mubr.msk.bf16.mxu1 %vm4920_vm0, %v4919_v1 }
  0x3f   : > { %4174 = vmatprep.subr.bf16.mxu0 %v4919_v1  ;;  %4209 = vmatpush3.bf16.msra.mxu1 %v4781_v45  ;;  %v4804_v45 = vld [vmem:[%s6176_s2 + $0x1b0] sm:$0xff]  }
  0x40   : > { %4210 = vmatprep.subr.bf16.mxu1 %v4919_v1 }
  0x41   : > { %4175 = vmatpush3.bf16.msra.mxu0 %v4780_v48  ;;  %v5278_v48 = vld [vmem:[%s5040_s28 + $0x1c] sm:$0xff] }
  0x42   : > { %4176 = vmatprep.subr.bf16.mxu0 %v4919_v1  ;;  %v1220_v32 = vpack.c.bf16 %v5278_v48, %v5258_v40  ;;  %v1384_v40 = vpack.c.bf16 %v1376_v38, %v1375_v37 }
  0x43   : > { %4211 = vmatpush3.bf16.msra.mxu1 %v4783_v50  ;;  %v4807_v50 = vld [vmem:[%s6176_s2 + $0x1f0] sm:$0xff]  }
  0x44   : > { %4121 = vmatmul.mubr.bf16.gmra.mxu0 %v297_v51  ;;  %4212 = vmatprep.subr.bf16.mxu1 %v4919_v1  ;;  %v4805_v51 = vld [vmem:[%s6176_s2 + $0x1a8] sm:$0xff]  }
  0x45   : > { %4157 = vmatmul.mubr.bf16.gmra.mxu1 %v266_v52  ;;  %4124 = vmatprep.mubr.msk.bf16.mxu0 %vm4920_vm0, %v4919_v1  ;;  %v895_v52 = vpack.c.bf16 %v887_v47, %v886_v46  ;;  %v4823_v47 = vld [vmem:[%s6176_s2 + $0x218] sm:$0xff]  }
  0x46   : > { %4160 = vmatprep.mubr.msk.bf16.mxu1 %vm4920_vm0, %v4919_v1  ;;  %4177 = vmatpush3.bf16.msra.mxu0 %v4782_v53  ;;  %v1058_v53 = vpack.c.bf16 %v5281_v49, %v5278_v48  ;;  %v4824_v48 = vld [vmem:[%s6176_s2 + $0x210] sm:$0xff]   ;;  %v1379_v49 = vld [vmem:[%s5040_s28 + $0x45] sm:$0xff] }
  0x47   : > { %4178 = vmatprep.subr.bf16.mxu0 %v4919_v1  ;;  %4213 = vmatpush3.bf16.msra.mxu1 %v4784_v54  ;;  %v4809_v54 = vld [vmem:[%s6176_s2 + $0x1e8] sm:$0xff]  }
  0x48   : > { %4214 = vmatprep.subr.bf16.mxu1 %v4919_v1 }
  0x4a   : > { %4179 = vmatpush3.bf16.msra.mxu0 %v4785_v59  ;;  %v5310_v59 = vld [vmem:[%s5040_s28 + $0x34] sm:$0xff] }
  0x4b   : > { %4215 = vmatpush3.bf16.msra.mxu1 %v4786_v60  ;;  %4236 = vmatprep.subr.bf16.mxu0 %v4919_v1  ;;  %v5313_v60 = vld [vmem:[#allocation2] sm:$0xff]  ;;  %v1059_v2 = vpack.c.bf16 %v5310_v59, %v5307_v58 }
  0x4c   : > { %4125 = vmatmul.mubr.bf16.gmra.mxu0 %v298_v61  ;;  %4272 = vmatprep.subr.bf16.mxu1 %v4919_v1  ;;  %v4811_v61 = vld [vmem:[%s6176_s2 + $0x1e0] sm:$0xff]  }
  0x4d   : > { %4161 = vmatmul.mubr.bf16.gmra.mxu1 %v267_v62  ;;  %4180 = vmatprep.mubr.msk.bf16.mxu0 %vm4920_vm0, %v4919_v1  ;;  %v1726_v62 = vld [vmem:[%s6175_s1] sm:$0xff] }
  0x4e   : > { %4216 = vmatprep.mubr.msk.bf16.mxu1 %vm4920_vm0, %v4919_v1  ;;  %1738 = vperm.xlu0 %4753, %v1726_v62  }
  0x54   : > { %4181 = vmatmul.mubr.bf16.vlgmr.msra.gmra.mxu0 %v568_v3  ;;  %v4813_v3 = vld [vmem:[%s6176_s2 + $0x1d8] sm:$0xff]  }
  0x55   : > { %4237 = vmatpush3.bf16.msra.mxu0 %v4787_v4  ;;  %4217 = vmatmul.mubr.bf16.vlgmr.msra.gmra.mxu1 %v731_v5  ;;  %v890_v4 = vld [vmem:[%s5040_s28 + $0x3b] sm:$0xff]  ;;  %v891_v5 = vld [vmem:[%s5040_s28 + $0x43] sm:$0xff] }
  0x56   : > { %4238 = vmatprep.subr.bf16.mxu0 %v4919_v1  ;;  %4184 = vmatprep.mubr.msk.bf16.mxu0 %vm4920_vm0, %v4919_v1 }
  0x57   : > { %4220 = vmatprep.mubr.msk.bf16.mxu1 %vm4920_vm0, %v4919_v1  ;;  %4273 = vmatpush3.bf16.msra.mxu1 %v4790_v6  ;;  %v4812_v6 = vld [vmem:[%s6176_s2 + $0x190] sm:$0xff]  }
  0x58   : > { %4274 = vmatprep.subr.bf16.mxu1 %v4919_v1 }
  0x59   : > { %4239 = vmatpush3.bf16.msra.mxu0 %v4788_v7  ;;  %v1727_v7 = vld [vmem:[%s6175_s1 + $0x8] sm:$0xff] }
  0x5a   : > { %4240 = vmatprep.subr.bf16.mxu0 %v4919_v1  ;;  %1743 = vperm.xlu0 %4753, %v1727_v7   ;;  %v1543_v7 = vld [vmem:[%s5040_s28 + $0x4e] sm:$0xff] }
  0x5b   : > { %4275 = vmatpush3.bf16.msra.mxu1 %v4791_v10  ;;  %v4815_v10 = vld [vmem:[%s6176_s2 + $0x1d0] sm:$0xff]  }
  0x5c   : > { %4185 = vmatmul.mubr.bf16.gmra.mxu0 %v569_v11  ;;  %4276 = vmatprep.subr.bf16.mxu1 %v4919_v1  ;;  %v1728_v11 = vld [vmem:[%s6175_s1 + $0x10] sm:$0xff] }
  0x5d   : > { %4221 = vmatmul.mubr.bf16.gmra.mxu1 %v732_v12  ;;  %4241 = vmatpush3.bf16.msra.mxu0 %v4789_v13  ;;  %v897_v12 = vpack.c.bf16 %v891_v5, %v890_v4  ;;  %v1060_v13 = vpack.c.bf16 %v5348_v9, %v5345_v8  ;;  %v1541_v4 = vld [vmem:[%s5040_s28 + $0x3e] sm:$0xff] }
  0x5e   : > { %4188 = vmatprep.mubr.msk.bf16.mxu0 %vm4920_vm0, %v4919_v1  ;;  %4242 = vmatprep.subr.bf16.mxu0 %v4919_v1 }
  0x5f   : > { %4224 = vmatprep.mubr.msk.bf16.mxu1 %vm4920_vm0, %v4919_v1  ;;  %4277 = vmatpush3.bf16.msra.mxu1 %v4793_v14  ;;  %v4814_v14 = vld [vmem:[%s6176_s2 + $0x188] sm:$0xff]  }
  0x60   : > { %4278 = vmatprep.subr.bf16.mxu1 %v4919_v1  ;;  %1748 = vperm.xlu1 %4754, %v1728_v11  }
  0x61   : > { %4243 = vmatpush3.bf16.msra.mxu0 %v4792_v16  ;;  %v892_v16 = vld [vmem:[%s5040_s28 + $0x4b] sm:$0xff] }
  0x62   : > { %4244 = vmatprep.subr.bf16.mxu0 %v4919_v1  ;;  %v898_v25 = vpack.c.bf16 %v893_v17, %v892_v16 }
  0x63   : > { %4279 = vmatpush3.bf16.msra.mxu1 %v4795_v18  ;;  %v1730_v18 = vld [vmem:[%s6175_s1 + $0x20] sm:$0xff] }
  0x64   : > { %4189 = vmatmul.mubr.bf16.gmra.mxu0 %v570_v19  ;;  %4280 = vmatprep.subr.bf16.mxu1 %v4919_v1  ;;  %v5378_v19 = vld [vmem:[%s5040_s28 + $0x4c] sm:$0xff] }
  0x65   : > { %4225 = vmatmul.mubr.bf16.gmra.mxu1 %v733_v20  ;;  %4245 = vmatpush3.bf16.msra.mxu0 %v4794_v21  ;;  %v5381_v20 = vld [vmem:[%s5040_s28 + $0x54] sm:$0xff]  ;;  %v4817_v21 = vld [vmem:[%s6176_s2 + $0x180] sm:$0xff]  }
  0x66   : > { %4192 = vmatprep.mubr.msk.bf16.mxu0 %vm4920_vm0, %v4919_v1  ;;  %4228 = vmatprep.mubr.msk.bf16.mxu1 %vm4920_vm0, %v4919_v1 }
  0x67   : > { %4246 = vmatprep.subr.bf16.mxu0 %v4919_v1  ;;  %4281 = vmatpush3.bf16.msra.mxu1 %v4797_v22  ;;  %v1729_v22 = vld [vmem:[%s6175_s1 + $0x18] sm:$0xff] }
  0x68   : > { %4282 = vmatprep.subr.bf16.mxu1 %v4919_v1  ;;  %1758 = vperm.xlu0 %4753, %v1730_v18  }
  0x69   : > { %4247 = vmatpush3.bf16.msra.mxu0 %v4796_v24  ;;  %v1732_v24 = vld [vmem:[%s6175_s1 + $0x30] sm:$0xff]  ;;  %1753 = vperm.xlu1 %4754, %v1729_v22  }
  0x6a   : > { %4248 = vmatprep.subr.bf16.mxu0 %v4919_v1 }
  0x6b   : > { %4283 = vmatpush3.bf16.msra.mxu1 %v4799_v26  ;;  %v1061_v26 = vpack.c.bf16 %v5381_v20, %v5378_v19 }
  0x6c   : > { %4193 = vmatmul.mubr.bf16.gmra.mxu0 %v571_v27  ;;  %4284 = vmatprep.subr.bf16.mxu1 %v4919_v1  ;;  %v1731_v27 = vld [vmem:[%s6175_s1 + $0x28] sm:$0xff] }
  0x6d   : > { %4229 = vmatmul.mubr.bf16.gmra.mxu1 %v734_v28  ;;  %4196 = vmatprep.mubr.msk.bf16.mxu0 %vm4920_vm0, %v4919_v1  ;;  %v1734_v28 = vld [vmem:[%s6175_s1 + $0x40] sm:$0xff] }
  0x6e   : > { %4249 = vmatpush3.bf16.msra.mxu0 %v4798_v29  ;;  %4232 = vmatprep.mubr.msk.bf16.mxu1 %vm4920_vm0, %v4919_v1  ;;  %v1373_v29 = vld [vmem:[%s5040_s28 + $0x15] sm:$0xff] }
  0x6f   : > { %4250 = vmatprep.subr.bf16.mxu0 %v4919_v1  ;;  %4285 = vmatpush3.bf16.msra.mxu1 %v4800_v30  ;;  %v1374_v30 = vld [vmem:[%s5040_s28 + $0x1d] sm:$0xff] }
  0x70   : > { %4286 = vmatprep.subr.bf16.mxu1 %v4919_v1  ;;  %1768 = vperm.xlu0 %4753, %v1732_v24  }
  0x71   : > { %1763 = vperm.xlu1 %4754, %v1731_v27  }
  0x72   : > { %4251 = vmatpush3.bf16.msra.mxu0 %v4801_v33  ;;  %v4819_v33 = vld [vmem:[%s6176_s2 + $0x238] sm:$0xff]  }
  0x73   : > { %4287 = vmatpush3.bf16.msra.mxu1 %v4802_v34  ;;  %4308 = vmatprep.subr.bf16.mxu0 %v4919_v1  ;;  %v1383_v34 = vpack.c.bf16 %v1374_v30, %v1373_v29  ;;  %v4827_v29 = vld [vmem:[%s6178_s4 + $0x78] sm:$0xff]  }
  0x74   : > { %4197 = vmatmul.mubr.bf16.gmra.mxu0 %v572_v35  ;;  %4344 = vmatprep.subr.bf16.mxu1 %v4919_v1  ;;  %v1735_v35 = vld [vmem:[%s6175_s1 + $0x48] sm:$0xff] }
  0x75   : > { %4233 = vmatmul.mubr.bf16.gmra.mxu1 %v735_v36  ;;  %4252 = vmatprep.mubr.msk.bf16.mxu0 %vm4920_vm0, %v4919_v1  ;;  %v4820_v36 = vld [vmem:[%s6176_s2 + $0x230] sm:$0xff]  }
  0x76   : > { %4288 = vmatprep.mubr.msk.bf16.mxu1 %vm4920_vm0, %v4919_v1  ;;  %1778 = vperm.xlu0 %4753, %v1734_v28  }
  0x77   : > { %1773 = vperm.xlu1 %4754, %v1733_v31  }
  0x7b   : > { %1783 = vperm.xlu1 %4754, %v1735_v35   ;;  %v4828_v35 = vld [vmem:[%s6178_s4 + $0x70] sm:$0xff]  }
  0x7c   : > { %4253 = vmatmul.mubr.bf16.vlgmr.msra.gmra.mxu0 %v894_v42  ;;  %v4822_v42 = vld [vmem:[%s6176_s2 + $0x220] sm:$0xff]  }
  0x7d   : > { %4309 = vmatpush3.bf16.msra.mxu0 %v4803_v41  ;;  %4289 = vmatmul.mubr.bf16.vlgmr.msra.gmra.mxu1 %v1057_v43  ;;  %v4821_v41 = vld [vmem:[%s6176_s2 + $0x228] sm:$0xff]   ;;  %v1377_v43 = vld [vmem:[%s5040_s28 + $0x35] sm:$0xff] }
  0x7e   : > { %4310 = vmatprep.subr.bf16.mxu0 %v4919_v1  ;;  %4256 = vmatprep.mubr.msk.bf16.mxu0 %vm4920_vm0, %v4919_v1 }
  0x7f   : > { %4292 = vmatprep.mubr.msk.bf16.mxu1 %vm4920_vm0, %v4919_v1  ;;  %4345 = vmatpush3.bf16.msra.mxu1 %v4806_v44  ;;  %v1378_v44 = vld [vmem:[%s5040_s28 + $0x3d] sm:$0xff] }
  0x80   : > { %4346 = vmatprep.subr.bf16.mxu1 %v4919_v1  ;;  %v1385_v46 = vpack.c.bf16 %v1378_v44, %v1377_v43 }
  0x81   : > { %4311 = vmatpush3.bf16.msra.mxu0 %v4804_v45  ;;  %v1222_v45 = vpack.c.bf16 %v5345_v8, %v5310_v59  ;;  %v1387_v59 = vpack.c.bf16 %v1382_v56, %v1381_v55 }
  0x82   : > { %4312 = vmatprep.subr.bf16.mxu0 %v4919_v1 }
  0x83   : > { %4347 = vmatpush3.bf16.msra.mxu1 %v4807_v50  ;;  %v1380_v50 = vld [vmem:[%s5040_s28 + $0x4d] sm:$0xff] }
  0x84   : > { %4257 = vmatmul.mubr.bf16.gmra.mxu0 %v895_v52  ;;  %4348 = vmatprep.subr.bf16.mxu1 %v4919_v1  ;;  %v4810_v1 = vld [vmem:[%s6176_s2 + $0x198] sm:$0xff]   ;;  %v1386_v52 = vpack.c.bf16 %v1380_v50, %v1379_v49 }
  0x85   : > { %4293 = vmatmul.mubr.bf16.gmra.mxu1 %v1058_v53  ;;  %4313 = vmatpush3.bf16.msra.mxu0 %v4805_v51  ;;  %v1223_v51 = vpack.c.bf16 %v5378_v19, %v5348_v9  ;;  %v4825_v53 = vld [vmem:[%s6176_s2 + $0x208] sm:$0xff]   ;;  %v1544_v9 = vld [vmem:[%s5040_s28 + $0x56] sm:$0xff] }
  0x86   : > { %4260 = vmatprep.mubr.msk.bf16.mxu0 %vm4920_vm0, %v5313_v60  ;;  %4314 = vmatprep.subr.bf16.mxu0 %v5313_v60 }
  0x87   : > { %4296 = vmatprep.mubr.msk.bf16.mxu1 %vm4920_vm0, %v5313_v60  ;;  %4349 = vmatpush3.bf16.msra.mxu1 %v4809_v54  ;;  %v1219_v54 = vld [vmem:[%s5040_s28 + $0x5c] sm:$0xff] }
  0x88   : > { %4350 = vmatprep.subr.bf16.mxu1 %v5313_v60  ;;  %v1224_v58 = vpack.c.bf16 %v1219_v54, %v5381_v20 }
  0x89   : > { %4315 = vmatpush3.bf16.msra.mxu0 %v4808_v57  ;;  %v4826_v57 = vld [vmem:[%s6176_s2 + $0x200] sm:$0xff]  }
  0x8a   : > { %4316 = vmatprep.subr.bf16.mxu0 %v5313_v60 }
  0x8b   : > { %4351 = vmatpush3.bf16.msra.mxu1 %v4811_v61  ;;  %v1536_v61 = vld [vmem:[%s5040_s28 + $0x16] sm:$0xff] }
  0x8c   : > { %4261 = vmatmul.mubr.bf16.gmra.mxu0 %v896_v63  ;;  %4352 = vmatprep.subr.bf16.mxu1 %v5313_v60  ;;  %v1538_v63 = vld [vmem:[%s5040_s28 + $0x26] sm:$0xff] }
  0x8d   : > { %4297 = vmatmul.mubr.bf16.gmra.mxu1 %v1059_v2  ;;  %4317 = vmatpush3.bf16.msra.mxu0 %v4810_v1  ;;  %v1537_v1 = vld [vmem:[%s5040_s28 + $0x1e] sm:$0xff]  ;;  %v1547_v2 = vpack.c.bf16 %v1539_v0, %v1538_v63 }
  0x8e   : > { %4264 = vmatprep.mubr.msk.bf16.mxu0 %vm4920_vm0, %v5313_v60  ;;  %4300 = vmatprep.mubr.msk.bf16.mxu1 %vm4920_vm0, %v5313_v60  ;;  %v1546_v62 = vpack.c.bf16 %v1537_v1, %v1536_v61 }
  0x8f   : > { %4318 = vmatprep.subr.bf16.mxu0 %v5313_v60  ;;  %4353 = vmatpush3.bf16.msra.mxu1 %v4813_v3  ;;  %v1540_v3 = vld [vmem:[%s5040_s28 + $0x36] sm:$0xff] }
  0x90   : > { %4354 = vmatprep.subr.bf16.mxu1 %v5313_v60  ;;  %v1548_v5 = vpack.c.bf16 %v1541_v4, %v1540_v3  ;;  %v4836_v3 = vld [vmem:[%s6178_s4 + $0x18] sm:$0xff]  }
  0x91   : > { %4319 = vmatpush3.bf16.msra.mxu0 %v4812_v6  ;;  %v1542_v6 = vld [vmem:[%s5040_s28 + $0x46] sm:$0xff] }
  0x92   : > { %4320 = vmatprep.subr.bf16.mxu0 %v5313_v60  ;;  %v1549_v8 = vpack.c.bf16 %v1543_v7, %v1542_v6 }
  0x93   : > { %4355 = vmatpush3.bf16.msra.mxu1 %v4815_v10  ;;  %v1545_v10 = vld [vmem:[%s5040_s28 + $0x5e] sm:$0xff] }
  0x94   : > { %4265 = vmatmul.mubr.bf16.gmra.mxu0 %v897_v12  ;;  %4356 = vmatprep.subr.bf16.mxu1 %v5313_v60  ;;  %v1550_v11 = vpack.c.bf16 %v1545_v10, %v1544_v9  ;;  %v4837_v9 = vld [vmem:[%s6178_s4 + $0x50] sm:$0xff]  }
  0x95   : > { %4301 = vmatmul.mubr.bf16.gmra.mxu1 %v1060_v13  ;;  %4268 = vmatprep.mubr.msk.bf16.mxu0 %vm4920_vm0, %v5313_v60  ;;  %v4838_v10 = vld [vmem:[%s6178_s4 + $0x10] sm:$0xff]  }
  0x96   : > { %4321 = vmatpush3.bf16.msra.mxu0 %v4814_v14  ;;  %4304 = vmatprep.mubr.msk.bf16.mxu1 %vm4920_vm0, %v5313_v60 }
  0x97   : > { %4322 = vmatprep.subr.bf16.mxu0 %v5313_v60  ;;  %4357 = vmatpush3.bf16.msra.mxu1 %v4816_v15 }
  0x98   : > { %4358 = vmatprep.subr.bf16.mxu1 %v5313_v60 }
  0x9a   : > { %4323 = vmatpush3.bf16.msra.mxu0 %v4817_v21 }
  0x9b   : > { %4359 = vmatpush3.bf16.msra.mxu1 %v4818_v23  ;;  %4380 = vmatprep.subr.bf16.mxu0 %v5313_v60 }
  0x9c   : > { %4269 = vmatmul.mubr.bf16.gmra.mxu0 %v898_v25  ;;  %4416 = vmatprep.subr.bf16.mxu1 %v5313_v60 }
  0x9d   : > { %4305 = vmatmul.mubr.bf16.gmra.mxu1 %v1061_v26  ;;  %4324 = vmatprep.mubr.msk.bf16.mxu0 %vm4920_vm0, %v5313_v60 }
  0x9e   : > { %4360 = vmatprep.mubr.msk.bf16.mxu1 %vm4920_vm0, %v5313_v60 }
  0xa4   : > { %4325 = vmatmul.mubr.bf16.vlgmr.msra.gmra.mxu0 %v1220_v32 }
  0xa5   : > { %4381 = vmatpush3.bf16.msra.mxu0 %v4819_v33  ;;  %4361 = vmatmul.mubr.bf16.vlgmr.msra.gmra.mxu1 %v1383_v34 }
  0xa6   : > { %4382 = vmatprep.subr.bf16.mxu0 %v5313_v60  ;;  %4328 = vmatprep.mubr.msk.bf16.mxu0 %vm4920_vm0, %v5313_v60 }
  0xa7   : > { %4364 = vmatprep.mubr.msk.bf16.mxu1 %vm4920_vm0, %v5313_v60  ;;  %4417 = vmatpush3.bf16.msra.mxu1 %v4827_v29 }
  0xa8   : > { %4418 = vmatprep.subr.bf16.mxu1 %v5313_v60 }
  0xa9   : > { %4383 = vmatpush3.bf16.msra.mxu0 %v4820_v36 }
  0xaa   : > { %4384 = vmatprep.subr.bf16.mxu0 %v5313_v60 }
  0xab   : > { %4419 = vmatpush3.bf16.msra.mxu1 %v4828_v35 }
  0xac   : > { %4329 = vmatmul.mubr.bf16.gmra.mxu0 %v1221_v39  ;;  %v4829_v39 = vld [vmem:[%s6178_s4 + $0x38] sm:$0xff]   ;;  %4420 = vmatprep.subr.bf16.mxu1 %v5313_v60 }
  0xad   : > { %4365 = vmatmul.mubr.bf16.gmra.mxu1 %v1384_v40  ;;  %4385 = vmatpush3.bf16.msra.mxu0 %v4821_v41 }
  0xae   : > { %4332 = vmatprep.mubr.msk.bf16.mxu0 %vm4920_vm0, %v5313_v60  ;;  %4386 = vmatprep.subr.bf16.mxu0 %v5313_v60 }
  0xaf   : > { %4368 = vmatprep.mubr.msk.bf16.mxu1 %vm4920_vm0, %v5313_v60 }
  0xb1   : > { %4387 = vmatpush3.bf16.msra.mxu0 %v4822_v42 }
  0xb2   : > { %4388 = vmatprep.subr.bf16.mxu0 %v5313_v60 }
  0xb4   : > { %4333 = vmatmul.mubr.bf16.gmra.mxu0 %v1222_v45  ;;  %v4830_v45 = vld [vmem:[%s6178_s4 + $0x68] sm:$0xff]  }
  0xb5   : > { %4369 = vmatmul.mubr.bf16.gmra.mxu1 %v1385_v46  ;;  %4389 = vmatpush3.bf16.msra.mxu0 %v4823_v47  ;;  %v4831_v46 = vld [vmem:[%s6178_s4 + $0x30] sm:$0xff]  }
  0xb6   : > { %4336 = vmatprep.mubr.msk.bf16.mxu0 %vm4920_vm0, %v5313_v60  ;;  %4372 = vmatprep.mubr.msk.bf16.mxu1 %vm4920_vm0, %v5313_v60 }
  0xb7   : > { %4390 = vmatprep.subr.bf16.mxu0 %v5313_v60  ;;  %4421 = vmatpush3.bf16.msra.mxu1 %v4830_v45 }
  0xb8   : > { %4422 = vmatprep.subr.bf16.mxu1 %v5313_v60 }
  0xb9   : > { %4391 = vmatpush3.bf16.msra.mxu0 %v4824_v48 }
  0xba   : > { %4392 = vmatprep.subr.bf16.mxu0 %v5313_v60 }
  0xbc   : > { %4337 = vmatmul.mubr.bf16.gmra.mxu0 %v1223_v51 }
  0xbd   : > { %4373 = vmatmul.mubr.bf16.gmra.mxu1 %v1386_v52  ;;  %4340 = vmatprep.mubr.msk.bf16.mxu0 %vm4920_vm0, %v5313_v60  ;;  %v4832_v52 = vld [vmem:[%s6178_s4 + $0x60] sm:$0xff]  }
  0xbe   : > { %4393 = vmatpush3.bf16.msra.mxu0 %v4825_v53  ;;  %4376 = vmatprep.mubr.msk.bf16.mxu1 %vm4920_vm0, %v5313_v60  ;;  %v4833_v53 = vld [vmem:[%s6178_s4 + $0x28] sm:$0xff]  }
  0xbf   : > { %4394 = vmatprep.subr.bf16.mxu0 %v5313_v60  ;;  %4423 = vmatpush3.bf16.msra.mxu1 %v4832_v52 }
  0xc0   : > { %4424 = vmatprep.subr.bf16.mxu1 %v5313_v60 }
  0xc2   : > { %4395 = vmatpush3.bf16.msra.mxu0 %v4826_v57 }
  0xc3   : > { %4452 = vmatprep.subr.bf16.mxu0 %v5313_v60 }
  0xc4   : > { %4341 = vmatmul.mubr.bf16.gmra.mxu0 %v1224_v58 }
  0xc5   : > { %4377 = vmatmul.mubr.bf16.gmra.mxu1 %v1387_v59  ;;  %4396 = vmatprep.mubr.msk.bf16.mxu0 %vm4920_vm0, %v5313_v60  ;;  %v4835_v59 = vld [vmem:[%s6178_s4 + $0x20] sm:$0xff]  }
  0xc6   : > { %4432 = vmatprep.mubr.msk.bf16.mxu1 %vm4920_vm0, %v5313_v60 }
  0xcc   : > { %4397 = vmatmul.mubr.bf16.vlgmr.msra.gmra.mxu0 %v1546_v62 }
  0xcd   : > { %4400 = vmatprep.mubr.msk.bf16.mxu0 %vm4920_vm0, %v5313_v60  ;;  %4453 = vmatpush3.bf16.msra.mxu0 %v4829_v39 }
  0xce   : > { %4454 = vmatprep.subr.bf16.mxu0 %v5313_v60 }
  0xd1   : > { %4455 = vmatpush3.bf16.msra.mxu0 %v4831_v46 }
  0xd2   : > { %4456 = vmatprep.subr.bf16.mxu0 %v5313_v60 }
  0xd4   : > { %4401 = vmatmul.mubr.bf16.gmra.mxu0 %v1547_v2  ;;  %v4834_v2 = vld [vmem:[%s6178_s4 + $0x58] sm:$0xff]  }
  0xd5   : > { %4404 = vmatprep.mubr.msk.bf16.mxu0 %vm4920_vm0, %v5313_v60  ;;  %4457 = vmatpush3.bf16.msra.mxu0 %v4833_v53 }
  0xd6   : > { %4458 = vmatprep.subr.bf16.mxu0 %v5313_v60  ;;  %4425 = vmatpush3.bf16.msra.mxu1 %v4834_v2 }
  0xd7   : > { %4426 = vmatprep.subr.bf16.mxu1 %v5313_v60 }
  0xd9   : > { %4459 = vmatpush3.bf16.msra.mxu0 %v4835_v59 }
  0xda   : > { %4460 = vmatprep.subr.bf16.mxu0 %v5313_v60  ;;  %4427 = vmatpush3.bf16.msra.mxu1 %v4837_v9 }
  0xdb   : > { %4428 = vmatprep.subr.bf16.mxu1 %v5313_v60 }
  0xdc   : > { %4405 = vmatmul.mubr.bf16.gmra.mxu0 %v1548_v5 }
  0xdd   : > { %4408 = vmatprep.mubr.msk.bf16.mxu0 %vm4920_vm0, %v5313_v60  ;;  %4461 = vmatpush3.bf16.msra.mxu0 %v4836_v3 }
  0xde   : > { %4462 = vmatprep.subr.bf16.mxu0 %v5313_v60 }
  0xe1   : > { %4463 = vmatpush3.bf16.msra.mxu0 %v4838_v10 }
  0xe2   : > { %4464 = vmatprep.subr.bf16.mxu0 %v5313_v60 }
  0xe4   : > { %4409 = vmatmul.mubr.bf16.gmra.mxu0 %v1549_v8 }
  0xe5   : > { %4412 = vmatprep.mubr.msk.bf16.mxu0 %vm4920_vm0, %v5313_v60 }
  0xec   : > { %v398_v12 = vpop.f32.mrf.mxu0  ;;  %4413 = vmatmul.mubr.bf16.gmra.mxu0 %v1550_v11 }
  0xed   : > { %v519_v13 = vpop.f32.mrf.mxu1  ;;  %4468 = vmatprep.mubr.msk.bf16.mxu0 %vm4920_vm0, %v5313_v60 }
  0xee   : > { %v5514_v14 = vadd.f32 %v519_v13, %v398_v12  ;;  %v4110_v15 = vpop.f32.mrf.mxu0 }
  0xef   : > { %v4146_v16 = vpop.f32.mrf.mxu1 }
  0xf0   : > { %v401_v17 = vpop.f32.mrf.mxu0 }
  0xf1   : > { %v522_v18 = vpop.f32.mrf.mxu1 }
  0xf2   : > { %v5516_v19 = vadd.f32 %v522_v18, %v401_v17  ;;  %v4111_v20 = vpop.f32.mrf.mxu0  ;;  %v4839_v18 = vld [vmem:[%s6178_s4 + $0x48] sm:$0xff]  }
  0xf3   : > { %v4147_v21 = vpop.f32.mrf.mxu1  ;;  %v4840_v20 = vld [vmem:[%s6178_s4 + $0x8] sm:$0xff]   ;;  %4429 = vmatpush3.bf16.msra.mxu1 %v4839_v18 }
  0xf4   : > { %v406_v22 = vpop.f32.mrf.mxu0  ;;  %4465 = vmatpush3.bf16.msra.mxu0 %v4840_v20  ;;  %4430 = vmatprep.subr.bf16.mxu1 %v5313_v60 }
  0xf5   : > { %v527_v23 = vpop.f32.mrf.mxu1  ;;  %4466 = vmatprep.subr.bf16.mxu0 %v5313_v60 }
  0xf6   : > { %v5518_v24 = vadd.f32 %v527_v23, %v406_v22  ;;  %v4114_v25 = vpop.f32.mrf.mxu0 }
  0xf7   : > { %v4150_v26 = vpop.f32.mrf.mxu1 }
  0xf8   : > { %v409_v27 = vpop.f32.mrf.mxu0 }
  0xf9   : > { %v530_v28 = vpop.f32.mrf.mxu1 }
  0xfa   : > { %v5523_v30 = vadd.f32 %v530_v28, %v409_v27  ;;  %v4115_v31 = vpop.f32.mrf.mxu0  ;;  %v4841_v27 = vld [vmem:[%s6178_s4 + $0x40] sm:$0xff]  }
  0xfb   : > { %v4151_v32 = vpop.f32.mrf.mxu1  ;;  %v4842_v28 = vld [vmem:[%s6178_s4] sm:$0xff]   ;;  %4431 = vmatpush3.bf16.msra.mxu1 %v4841_v27 }
  0xfc   : > { %v414_v33 = vpop.f32.mrf.mxu0  ;;  %4467 = vmatpush3.bf16.msra.mxu0 %v4842_v28  ;;  %4488 = vmatprep.subr.bf16.mxu1 %v5313_v60 }
  0xfd   : > { %v535_v34 = vpop.f32.mrf.mxu1  ;;  %4524 = vmatprep.subr.bf16.mxu0 %v5313_v60 }
  0xfe   : > { %v5529_v36 = vadd.f32 %v535_v34, %v414_v33  ;;  %v4118_v37 = vpop.f32.mrf.mxu0 }
  0xff   : > { %v4154_v38 = vpop.f32.mrf.mxu1 }
 0x100   : > { %v417_v40 = vpop.f32.mrf.mxu0 }
 0x101   : > { %v538_v41 = vpop.f32.mrf.mxu1 }
 0x102   : > { %v5535_v42 = vadd.f32 %v538_v41, %v417_v40  ;;  %v4119_v43 = vpop.f32.mrf.mxu0 }
 0x103   : > { %v4155_v44 = vpop.f32.mrf.mxu1 }
 0x104   : > { %v422_v47 = vpop.f32.mrf.mxu0 }
 0x105   : > { %v543_v48 = vpop.f32.mrf.mxu1 }
 0x106   : > { %v5544_v49 = vadd.f32 %v543_v48, %v422_v47  ;;  %v4122_v50 = vpop.f32.mrf.mxu0 }
 0x107   : > { %v4158_v51 = vpop.f32.mrf.mxu1 }
 0x108   : > { %v425_v54 = vpop.f32.mrf.mxu0 }
 0x109   : > { %v546_v55 = vpop.f32.mrf.mxu1 }
 0x10a   : > { %v5554_v56 = vadd.f32 %v546_v55, %v425_v54  ;;  %v4123_v57 = vpop.f32.mrf.mxu0 }
 0x10b   : > { %v4159_v58 = vpop.f32.mrf.mxu1 }
 0x10c   : > { %v430_v61 = vpop.f32.mrf.mxu0 }
 0x10d   : > { %v551_v1 = vpop.f32.mrf.mxu1 }
 0x10e   : > { %v5561_v62 = vadd.f32 %v551_v1, %v430_v61  ;;  %v4126_v63 = vpop.f32.mrf.mxu0 }
 0x10f   : > { %v4162_v0 = vpop.f32.mrf.mxu1 }
 0x110   : > { %v433_v4 = vpop.f32.mrf.mxu0 }
 0x111   : > { %v554_v5 = vpop.f32.mrf.mxu1 }
 0x112   : > { %v5570_v6 = vadd.f32 %v554_v5, %v433_v4  ;;  %v4127_v7 = vpop.f32.mrf.mxu0 }
 0x113   : > { %v4163_v8 = vpop.f32.mrf.mxu1 }
 0x114   : > { %v672_v11 = vpop.f32.mrf.mxu0 }
 0x115   : > { %v711_v12 = vadd.f32 %v672_v11, %v5514_v14  ;;  %v835_v13 = vpop.f32.mrf.mxu1 }
 0x116   : > { %v4182_v15 = vpop.f32.mrf.mxu0 }
 0x117   : > { %v5583_v16 = vadd.f32 %v835_v13, %v711_v12  ;;  %v4218_v17 = vpop.f32.mrf.mxu1 }
 0x118   : > { %v675_v14 = vpop.f32.mrf.mxu0 }
 0x119   : > { %v712_v21 = vadd.f32 %v675_v14, %v5516_v19  ;;  %v838_v22 = vpop.f32.mrf.mxu1 }
 0x11a   : > { %v4183_v23 = vpop.f32.mrf.mxu0 }
 0x11b   : > { %v5594_v25 = vadd.f32 %v838_v22, %v712_v21  ;;  %v4219_v26 = vpop.f32.mrf.mxu1 }
 0x11c   : > { %v680_v19 = vpop.f32.mrf.mxu0 }
 0x11d   : > { %v713_v29 = vadd.f32 %v680_v19, %v5518_v24  ;;  %v843_v31 = vpop.f32.mrf.mxu1 }
 0x11e   : > { %v4186_v32 = vpop.f32.mrf.mxu0 }
 0x11f   : > { %v876_v33 = vadd.f32 %v843_v31, %v713_v29  ;;  %v4222_v34 = vpop.f32.mrf.mxu1 }
 0x120   : > { %v683_v35 = vpop.f32.mrf.mxu0 }
 0x121   : > { %v714_v37 = vadd.f32 %v683_v35, %v5523_v30  ;;  %v846_v38 = vpop.f32.mrf.mxu1 }
 0x122   : > { %v4187_v39 = vpop.f32.mrf.mxu0 }
 0x123   : > { %v877_v40 = vadd.f32 %v846_v38, %v714_v37  ;;  %v4223_v41 = vpop.f32.mrf.mxu1 }
 0x124   : > { %v688_v43 = vpop.f32.mrf.mxu0 }
 0x125   : > { %v715_v24 = vadd.f32 %v688_v43, %v5529_v36  ;;  %v851_v44 = vpop.f32.mrf.mxu1 }
 0x126   : > { %v4190_v45 = vpop.f32.mrf.mxu0 }
 0x127   : > { %v878_v46 = vadd.f32 %v851_v44, %v715_v24  ;;  %v4226_v47 = vpop.f32.mrf.mxu1 }
 0x128   : > { %v691_v48 = vpop.f32.mrf.mxu0 }
 0x129   : > { %v716_v50 = vadd.f32 %v691_v48, %v5535_v42  ;;  %v854_v60 = vpop.f32.mrf.mxu1 }
 0x12a   : > { %v4191_v51 = vpop.f32.mrf.mxu0 }
 0x12b   : > { %v879_v52 = vadd.f32 %v854_v60, %v716_v50  ;;  %v4227_v53 = vpop.f32.mrf.mxu1 }
 0x12c   : > { %v696_v54 = vpop.f32.mrf.mxu0 }
 0x12d   : > { %v717_v30 = vadd.f32 %v696_v54, %v5544_v49  ;;  %v859_v55 = vpop.f32.mrf.mxu1 }
 0x12e   : > { %v4194_v57 = vpop.f32.mrf.mxu0 }
 0x12f   : > { %v880_v58 = vadd.f32 %v859_v55, %v717_v30  ;;  %v4230_v59 = vpop.f32.mrf.mxu1 }
 0x130   : > { %v699_v61 = vpop.f32.mrf.mxu0 }
 0x131   : > { %v718_v36 = vadd.f32 %v699_v61, %v5554_v56  ;;  %v862_v1 = vpop.f32.mrf.mxu1 }
 0x132   : > { %v4195_v63 = vpop.f32.mrf.mxu0 }
 0x133   : > { %v881_v0 = vadd.f32 %v862_v1, %v718_v36  ;;  %v4231_v2 = vpop.f32.mrf.mxu1 }
 0x134   : > { %v704_v3 = vpop.f32.mrf.mxu0 }
 0x135   : > { %v719_v42 = vadd.f32 %v704_v3, %v5561_v62  ;;  %v867_v4 = vpop.f32.mrf.mxu1 }
 0x136   : > { %v4198_v5 = vpop.f32.mrf.mxu0 }
 0x137   : > { %v882_v7 = vadd.f32 %v867_v4, %v719_v42  ;;  %v4234_v8 = vpop.f32.mrf.mxu1 }
 0x138   : > { %v707_v9 = vpop.f32.mrf.mxu0 }
 0x139   : > { %v720_v49 = vadd.f32 %v707_v9, %v5570_v6  ;;  %v870_v10 = vpop.f32.mrf.mxu1 }
 0x13a   : > { %v4199_v11 = vpop.f32.mrf.mxu0 }
 0x13b   : > { %v883_v12 = vadd.f32 %v870_v10, %v720_v49  ;;  %v4235_v13 = vpop.f32.mrf.mxu1 }
 0x13c   : > { %v998_v15 = vpop.f32.mrf.mxu0 }
 0x13d   : > { %v1037_v56 = vadd.f32 %v998_v15, %v5583_v16  ;;  %v1161_v17 = vpop.f32.mrf.mxu1 }
 0x13e   : > { %v4254_v18 = vpop.f32.mrf.mxu0 }
 0x13f   : > { %v5613_v20 = vadd.f32 %v1161_v17, %v1037_v56  ;;  %v4290_v14 = vpop.f32.mrf.mxu1 }
 0x140   : > { %v1001_v62 = vpop.f32.mrf.mxu0 }
 0x141   : > { %v1038_v21 = vadd.f32 %v1001_v62, %v5594_v25  ;;  %v1164_v22 = vpop.f32.mrf.mxu1 }
 0x142   : > { %v4255_v23 = vpop.f32.mrf.mxu0 }
 0x143   : > { %v5616_v26 = vadd.f32 %v1164_v22, %v1038_v21  ;;  %v4291_v6 = vpop.f32.mrf.mxu1 }
 0x144   : > { %v1006_v27 = vpop.f32.mrf.mxu0 }
 0x145   : > { %v1039_v28 = vadd.f32 %v1006_v27, %v876_v33  ;;  %v1169_v19 = vpop.f32.mrf.mxu1 }
 0x146   : > { %v4258_v29 = vpop.f32.mrf.mxu0 }
 0x147   : > { %v5618_v31 = vadd.f32 %v1169_v19, %v1039_v28  ;;  %v4294_v16 = vpop.f32.mrf.mxu1 }
 0x148   : > { %v1009_v32 = vpop.f32.mrf.mxu0 }
 0x149   : > { %v1040_v34 = vadd.f32 %v1009_v32, %v877_v40  ;;  %v1172_v35 = vpop.f32.mrf.mxu1 }
 0x14a   : > { %v4259_v37 = vpop.f32.mrf.mxu0 }
 0x14b   : > { %v5620_v38 = vadd.f32 %v1172_v35, %v1040_v34  ;;  %v4295_v39 = vpop.f32.mrf.mxu1 }
 0x14c   : > { %v1014_v25 = vpop.f32.mrf.mxu0 }
 0x14d   : > { %v1041_v41 = vadd.f32 %v1014_v25, %v878_v46  ;;  %v1177_v43 = vpop.f32.mrf.mxu1 }
 0x14e   : > { %v4262_v24 = vpop.f32.mrf.mxu0 }
 0x14f   : > { %v5622_v44 = vadd.f32 %v1177_v43, %v1041_v41  ;;  %v4298_v45 = vpop.f32.mrf.mxu1 }
 0x150   : > { %v1017_v33 = vpop.f32.mrf.mxu0 }
 0x151   : > { %v1042_v47 = vadd.f32 %v1017_v33, %v879_v52  ;;  %v1180_v48 = vpop.f32.mrf.mxu1 }
 0x152   : > { %v4263_v50 = vpop.f32.mrf.mxu0 }
 0x153   : > { %v5624_v60 = vadd.f32 %v1180_v48, %v1042_v47  ;;  %v4299_v51 = vpop.f32.mrf.mxu1 }
 0x154   : > { %v1022_v40 = vpop.f32.mrf.mxu0 }
 0x155   : > { %v1043_v53 = vadd.f32 %v1022_v40, %v880_v58  ;;  %v1185_v54 = vpop.f32.mrf.mxu1 }
 0x156   : > { %v4266_v30 = vpop.f32.mrf.mxu0 }
 0x157   : > { %v5626_v55 = vadd.f32 %v1185_v54, %v1043_v53  ;;  %v4302_v57 = vpop.f32.mrf.mxu1 }
 0x158   : > { %v1025_v46 = vpop.f32.mrf.mxu0 }
 0x159   : > { %v1044_v59 = vadd.f32 %v1025_v46, %v881_v0  ;;  %v1188_v61 = vpop.f32.mrf.mxu1 }
 0x15a   : > { %v4267_v36 = vpop.f32.mrf.mxu0 }
 0x15b   : > { %v5628_v1 = vadd.f32 %v1188_v61, %v1044_v59  ;;  %v4303_v63 = vpop.f32.mrf.mxu1 }
 0x15c   : > { %v1030_v52 = vpop.f32.mrf.mxu0 }
 0x15d   : > { %v1045_v2 = vadd.f32 %v1030_v52, %v882_v7  ;;  %v1193_v3 = vpop.f32.mrf.mxu1  ;;  %v5657_v52 = vld [vmem:[%s6177_s3] ss:$0 sm:$0xff] }
 0x15e   : > { %v4270_v42 = vpop.f32.mrf.mxu0 }
 0x15f   : > { %v5630_v4 = vadd.f32 %v1193_v3, %v1045_v2  ;;  %v4306_v5 = vpop.f32.mrf.mxu1 }
 0x160   : > { %v1033_v58 = vpop.f32.mrf.mxu0 }
 0x161   : > { %v1046_v8 = vadd.f32 %v1033_v58, %v883_v12  ;;  %v1196_v9 = vpop.f32.mrf.mxu1  ;;  %v1739_v58 = vpop.permute.xlu0 %1738 }
 0x162   : > { %v4271_v49 = vpop.f32.mrf.mxu0 }
 0x163   : > { %v5632_v10 = vadd.f32 %v1196_v9, %v1046_v8  ;;  %v4307_v11 = vpop.f32.mrf.mxu1 }
 0x164   : > { %v1324_v0 = vpop.f32.mrf.mxu0 }
 0x165   : > { %v1487_v13 = vpop.f32.mrf.mxu1  ;;  %v1363_v53 = vadd.f32 %v1324_v0, %v5613_v20 }
 0x166   : > { %v4326_v15 = vpop.f32.mrf.mxu0 }
 0x167   : > { %v4362_v56 = vpop.f32.mrf.mxu1  ;;  %v1526_v59 = vadd.f32 %v1487_v13, %v1363_v53 }
 0x168   : > { %v1327_v17 = vpop.f32.mrf.mxu0 }
 0x169   : > { %v1490_v18 = vpop.f32.mrf.mxu1  ;;  %v1364_v61 = vadd.f32 %v1327_v17, %v5616_v26 }
 0x16a   : > { %v4327_v14 = vpop.f32.mrf.mxu0 }
 0x16b   : > { %v4363_v7 = vpop.f32.mrf.mxu1  ;;  %v1527_v42 = vadd.f32 %v1490_v18, %v1364_v61 }
 0x16c   : > { %v1332_v62 = vpop.f32.mrf.mxu0 }
 0x16d   : > { %v1495_v21 = vpop.f32.mrf.mxu1  ;;  %v1365_v20 = vadd.f32 %v1332_v62, %v5618_v31  ;;  %v1744_v31 = vpop.permute.xlu0 %1743 }
 0x16e   : > { %v4330_v22 = vpop.f32.mrf.mxu0 }
 0x16f   : > { %v4366_v23 = vpop.f32.mrf.mxu1  ;;  %v1528_v26 = vadd.f32 %v1495_v21, %v1365_v20 }
 0x170   : > { %v1335_v6 = vpop.f32.mrf.mxu0  ;;  %v1749_v23 = vpop.permute.xlu1 %1748 }
 0x171   : > { %v1498_v27 = vpop.f32.mrf.mxu1  ;;  %v1366_v0 = vadd.f32 %v1335_v6, %v5620_v38  ;;  %v1759_v20 = vpop.permute.xlu0 %1758 }
 0x172   : > { %v4331_v12 = vpop.f32.mrf.mxu0 }
 0x173   : > { %v4367_v28 = vpop.f32.mrf.mxu1  ;;  %v1529_v7 = vadd.f32 %v1498_v27, %v1366_v0 }
 0x174   : > { %v1340_v19 = vpop.f32.mrf.mxu0 }
 0x175   : > { %v1503_v29 = vpop.f32.mrf.mxu1  ;;  %v1367_v62 = vadd.f32 %v1340_v19, %v5622_v44 }
 0x176   : > { %v4334_v16 = vpop.f32.mrf.mxu0 }
 0x177   : > { %v4370_v32 = vpop.f32.mrf.mxu1  ;;  %v1530_v27 = vadd.f32 %v1503_v29, %v1367_v62 }
 0x178   : > { %v1343_v34 = vpop.f32.mrf.mxu0 }
 0x179   : > { %v5634_v35 = vpop.f32.mrf.mxu1  ;;  %v1368_v16 = vadd.f32 %v1343_v34, %v5624_v60  ;;  %v5681_v60 = vld [vmem:[#allocation2] sm:$0xff] }
 0x17a   : > { %v4335_v37 = vpop.f32.mrf.mxu0 }
 0x17b   : > { %v4371_v39 = vpop.f32.mrf.mxu1  ;;  %v1851_v37 = vld [vmem:[#allocation2 + $0x1] sm:$0xff]  ;;  %v1531_v34 = vadd.f32 %v5634_v35, %v1368_v16  ;;  %v4844_v35 = vld [vmem:[%s6178_s4 + $0xb0] sm:$0xff]   ;;  %v1769_v16 = vpop.permute.xlu0 %1768 }
 0x17c   : > { %v5636_v25 = vpop.f32.mrf.mxu0 }
 0x17d   : > { %v5638_v41 = vpop.f32.mrf.mxu1  ;;  %v1369_v61 = vadd.f32 %v5636_v25, %v5626_v55 }
 0x17e   : > { %v4338_v43 = vpop.f32.mrf.mxu0 }
 0x17f   : > { %v4374_v24 = vpop.f32.mrf.mxu1 }
 0x180   : > { %v5640_v45 = vpop.f32.mrf.mxu0 }
 0x181   : > { %v5642_v33 = vpop.f32.mrf.mxu1  ;;  %v1370_v25 = vadd.f32 %v5640_v45, %v5628_v1 }
 0x182   : > { %v4339_v47 = vpop.f32.mrf.mxu0 }
 0x183   : > { %v4375_v48 = vpop.f32.mrf.mxu1  ;;  %v4843_v47 = vld [vmem:[%s6178_s4 + $0xb8] sm:$0xff]  }
 0x184   : > { %v5644_v50 = vpop.f32.mrf.mxu0 }
 0x185   : > { %v5646_v51 = vpop.f32.mrf.mxu1  ;;  %v1371_v62 = vadd.f32 %v5644_v50, %v5630_v4 }
 0x186   : > { %v4342_v40 = vpop.f32.mrf.mxu0 }
 0x187   : > { %v4378_v54 = vpop.f32.mrf.mxu1 }
 0x188   : > { %v5649_v30 = vpop.f32.mrf.mxu0  ;;  %v1754_v54 = vpop.permute.xlu1 %1753 }
 0x189   : > { %v5651_v57 = vpop.f32.mrf.mxu1 }
 0x18a   : > { %v4343_v46 = vpop.f32.mrf.mxu0 }
 0x18b   : > { %v4379_v36 = vpop.f32.mrf.mxu1 }
 0x18c   : > { %v1650_v63 = vpop.f32.mrf.mxu0 }
 0x18d   : > { %v1689_v2 = vadd.f32 %v1650_v63, %v1526_v59  ;;  %v4845_v59 = vld [vmem:[%s6178_s4 + $0xf8] sm:$0xff]  }
 0x18e   : > { %v4398_v3 = vpop.f32.mrf.mxu0 }
 0x18f   : > { %v1706_v5 = vadd.f32 %v5657_v52, %v1689_v2 }
 0x190   : > { %v1653_v8 = vpop.f32.mrf.mxu0 }
 0x191   : > { %v1716_v9 = vmax.f32 %v1706_v5, 0.0  ;;  %v1690_v49 = vadd.f32 %v1653_v8, %v1527_v42  ;;  %v1532_v8 = vadd.f32 %v5638_v41, %v1369_v61 }
 0x192   : > { %v4399_v11 = vpop.f32.mrf.mxu0 }
 0x193   : > { %v5662_v13 = vmul.f32 %v1739_v58, %v1716_v9  ;;  %v1707_v15 = vadd.f32 %v5657_v52, %v1690_v49  ;;  %v4847_v58 = vld [vmem:[%s6178_s4 + $0xf0] sm:$0xff]  }
 0x194   : > { %v1658_v56 = vpop.f32.mrf.mxu0 }
 0x195   : > { %1810 = vst [vmem:[#allocation2 + $0xb] sm:$0xff] %v5662_v13  ;;  %v1717_v17 = vmax.f32 %v1707_v15, 0.0  ;;  %v1691_v18 = vadd.f32 %v1658_v56, %v1528_v26  ;;  %v4846_v26 = vld [vmem:[%s6178_s4 + $0xa8] sm:$0xff]  }
 0x196   : > { %v4402_v14 = vpop.f32.mrf.mxu0 }
 0x197   : > { %v5667_v22 = vmul.f32 %v1744_v31, %v1717_v17  ;;  %v1708_v21 = vadd.f32 %v5657_v52, %v1691_v18  ;;  %v1533_v31 = vadd.f32 %v5642_v33, %v1370_v25  ;;  %v1764_v14 = vpop.permute.xlu1 %1763  ;;  %v4848_v33 = vld [vmem:[%s6178_s4 + $0xa0] sm:$0xff]  }
 0x198   : > { %v1661_v38 = vpop.f32.mrf.mxu0 }
 0x199   : > { %1811 = vst [vmem:[#allocation2 + $0x13] sm:$0xff] %v5667_v22  ;;  %v1718_v6 = vmax.f32 %v1708_v21, 0.0  ;;  %v1692_v12 = vadd.f32 %v1661_v38, %v1529_v7  ;;  %v2461_v28 = vpack.c.bf16 %v5667_v22, %v5662_v13  ;;  %v4849_v38 = vld [vmem:[%s6178_s4 + $0xe8] sm:$0xff]   ;;  %v4879_v13 = vld [vmem:[%s6178_s4 + $0x1f0] sm:$0xff]  }
 0x19a   : > { %v4403_v32 = vpop.f32.mrf.mxu0 }
 0x19b   : > { %v5674_v39 = vmul.f32 %v1749_v23, %v1718_v6  ;;  %v1709_v44 = vadd.f32 %v5657_v52, %v1692_v12 }
 0x19c   : > { %v1666_v19 = vpop.f32.mrf.mxu0  ;;  %v1852_v43 = vld [vmem:[#allocation2 + $0x9] sm:$0xff] }
 0x19d   : > { %v1821_v24 = vld [vmem:[#allocation2 + $0x8] sm:$0xff]  ;;  %1812 = vst [vmem:[#allocation2 + $0x1b] sm:$0xff] %v5674_v39  ;;  %v1719_v48 = vmax.f32 %v1709_v44, 0.0  ;;  %v1693_v40 = vadd.f32 %v1666_v19, %v1530_v27  ;;  %v1861_v53 = vpack.c.bf16 %v1852_v43, %v1851_v37  ;;  %v1534_v37 = vadd.f32 %v5646_v51, %v1371_v62  ;;  %v4858_v62 = vld [vmem:[%s6178_s4 + $0xc0] sm:$0xff]  }
 0x19e   : > { %v1830_v29 = vpack.c.bf16 %v1821_v24, %v5681_v60  ;;  %v4406_v46 = vpop.f32.mrf.mxu0  ;;  %v1372_v27 = vadd.f32 %v5649_v30, %v5632_v10  ;;  %v4850_v24 = vld [vmem:[%s6178_s4 + $0x98] sm:$0xff]  }
 0x19f   : > { %v5690_v36 = vmul.f32 %v1754_v54, %v1719_v48  ;;  %v1710_v63 = vadd.f32 %v5657_v52, %v1693_v40  ;;  %4433 = vmatmul.mubr.bf16.vlgmr.msra.gmra.mxu1 %v1861_v53  ;;  %v1774_v54 = vpop.permute.xlu1 %1773 }
 0x1a0   : > { %4469 = vmatmul.mubr.bf16.vlgmr.msra.gmra.mxu0 %v1830_v29  ;;  %v1669_v2 = vpop.f32.mrf.mxu0  ;;  %4489 = vmatpush3.bf16.msra.mxu1 %v4843_v47  ;;  %v1853_v11 = vld [vmem:[#allocation2 + $0x11] sm:$0xff]  ;;  %v4851_v47 = vld [vmem:[%s6178_s4 + $0xe0] sm:$0xff]  }
 0x1a1   : > { %4436 = vmatprep.mubr.msk.bf16.mxu1 %vm4920_vm0, %v5681_v60  ;;  %1813 = vst [vmem:[#allocation2 + $0x23] sm:$0xff] %v5690_v36  ;;  %v1720_v3 = vmax.f32 %v1710_v63, 0.0  ;;  %v1694_v42 = vadd.f32 %v1669_v2, %v1531_v34  ;;  %4490 = vmatprep.subr.bf16.mxu1 %v5681_v60  ;;  %v2462_v55 = vpack.c.bf16 %v5690_v36, %v5674_v39  ;;  %v1822_v0 = vld [vmem:[#allocation2 + $0x10] sm:$0xff] }
 0x1a2   : > { %4472 = vmatprep.mubr.msk.bf16.mxu0 %vm4920_vm0, %v5681_v60  ;;  %v4407_v5 = vpop.f32.mrf.mxu0  ;;  %4525 = vmatpush3.bf16.msra.mxu0 %v4845_v59  ;;  %v1535_v59 = vadd.f32 %v5651_v57, %v1372_v27 }
 0x1a3   : > { %v5710_v9 = vmul.f32 %v1759_v20, %v1720_v3  ;;  %v1711_v49 = vadd.f32 %v5657_v52, %v1694_v42  ;;  %4526 = vmatprep.subr.bf16.mxu0 %v5681_v60  ;;  %v4853_v3 = vld [vmem:[%s6178_s4 + $0x90] sm:$0xff]   ;;  %v1779_v20 = vpop.permute.xlu0 %1778 }
 0x1a4   : > { %v1674_v1 = vpop.f32.mrf.mxu0  ;;  %4491 = vmatpush3.bf16.msra.mxu1 %v4844_v35  ;;  %v1854_v45 = vld [vmem:[#allocation2 + $0x19] sm:$0xff] }
 0x1a5   : > { %v1823_v15 = vld [vmem:[#allocation2 + $0x18] sm:$0xff]  ;;  %1814 = vst [vmem:[#allocation2 + $0x2b] sm:$0xff] %v5710_v9  ;;  %v1721_v56 = vmax.f32 %v1711_v49, 0.0  ;;  %v1695_v41 = vadd.f32 %v1674_v1, %v1532_v8  ;;  %v1862_v17 = vpack.c.bf16 %v1854_v45, %v1853_v11  ;;  %4492 = vmatprep.subr.bf16.mxu1 %v5681_v60  ;;  %v4854_v11 = vld [vmem:[%s6178_s4 + $0xd0] sm:$0xff]  }
 0x1a6   : > { %v1831_v18 = vpack.c.bf16 %v1823_v15, %v1822_v0  ;;  %v4410_v7 = vpop.f32.mrf.mxu0  ;;  %4527 = vmatpush3.bf16.msra.mxu0 %v4847_v58  ;;  %v4852_v35 = vld [vmem:[%s6178_s4 + $0xd8] sm:$0xff]  }
 0x1a7   : > { %v5722_v21 = vmul.f32 %v1764_v14, %v1721_v56  ;;  %v1712_v23 = vadd.f32 %v5657_v52, %v1695_v41  ;;  %4437 = vmatmul.mubr.bf16.gmra.mxu1 %v1862_v17  ;;  %4528 = vmatprep.subr.bf16.mxu0 %v5681_v60  ;;  %v1784_v41 = vpop.permute.xlu1 %1783 }
 0x1a8   : > { %4473 = vmatmul.mubr.bf16.gmra.mxu0 %v1831_v18  ;;  %v1677_v6 = vpop.f32.mrf.mxu0  ;;  %4493 = vmatpush3.bf16.msra.mxu1 %v4846_v26  ;;  %v1855_v43 = vld [vmem:[#allocation2 + $0x21] sm:$0xff] }
 0x1a9   : > { %4440 = vmatprep.mubr.msk.bf16.mxu1 %vm4920_vm0, %v5681_v60  ;;  %1815 = vst [vmem:[#allocation2 + $0x33] sm:$0xff] %v5722_v21  ;;  %v1722_v4 = vmax.f32 %v1712_v23, 0.0  ;;  %v1696_v50 = vadd.f32 %v1677_v6, %v1533_v31  ;;  %4476 = vmatprep.mubr.msk.bf16.mxu0 %vm4920_vm0, %v5681_v60  ;;  %v2463_v12 = vpack.c.bf16 %v5722_v21, %v5710_v9  ;;  %v1824_v51 = vld [vmem:[#allocation2 + $0x20] sm:$0xff]  ;;  %v4856_v18 = vld [vmem:[%s6178_s4 + $0xc8] sm:$0xff]   ;;  %v4886_v21 = vld [vmem:[%s6178_s4 + $0x1d0] sm:$0xff]  }
 0x1aa   : > { %4494 = vmatprep.subr.bf16.mxu1 %v5681_v60  ;;  %v4411_v32 = vpop.f32.mrf.mxu0  ;;  %4529 = vmatpush3.bf16.msra.mxu0 %v4849_v38  ;;  %v4857_v31 = vld [vmem:[%s6178_s4 + $0x80] sm:$0xff]  }
 0x1ab   : > { %v5743_v44 = vmul.f32 %v1769_v16, %v1722_v4  ;;  %v1713_v19 = vadd.f32 %v5657_v52, %v1696_v50  ;;  %4530 = vmatprep.subr.bf16.mxu0 %v5681_v60  ;;  %v2125_v50 = vld [vmem:[#allocation2 + $0x2] sm:$0xff]  ;;  %v2126_v16 = vld [vmem:[#allocation2 + $0xa] sm:$0xff]  ;;  %v2289_v32 = vld [vmem:[#allocation2 + $0x12] sm:$0xff] }
 0x1ac   : > { %v1682_v48 = vpop.f32.mrf.mxu0  ;;  %v1856_v40 = vld [vmem:[#allocation2 + $0x29] sm:$0xff]  ;;  %4495 = vmatpush3.bf16.msra.mxu1 %v4848_v33  ;;  %v2135_v27 = vpack.c.bf16 %v2126_v16, %v2125_v50  ;;  %v5923_v22 = vld [vmem:[#allocation2 + $0x1c] sm:$0xff] }
 0x1ad   : > { %v1825_v53 = vld [vmem:[#allocation2 + $0x28] sm:$0xff]  ;;  %1816 = vst [vmem:[#allocation2 + $0x3b] sm:$0xff] %v5743_v44  ;;  %v1723_v10 = vmax.f32 %v1713_v19, 0.0  ;;  %v1697_v30 = vadd.f32 %v1682_v48, %v1534_v37  ;;  %v1863_v29 = vpack.c.bf16 %v1856_v40, %v1855_v43  ;;  %4496 = vmatprep.subr.bf16.mxu1 %v5681_v60  ;;  %v4859_v37 = vld [vmem:[%s6178_s4 + $0x138] sm:$0xff]   ;;  %v2298_v19 = vpack.c.bf16 %v2289_v32, %v2126_v16  ;;  %v4863_v40 = vld [vmem:[%s6178_s4 + $0x170] sm:$0xff]  }
 0x1ae   : > { %v1832_v34 = vpack.c.bf16 %v1825_v53, %v1824_v51  ;;  %v4414_v46 = vpop.f32.mrf.mxu0  ;;  %4531 = vmatpush3.bf16.msra.mxu0 %v4851_v47  ;;  %v4861_v43 = vld [vmem:[%s6178_s4 + $0x178] sm:$0xff]   ;;  %v2291_v48 = vld [vmem:[#allocation2 + $0x22] sm:$0xff] }
 0x1af   : > { %v5756_v61 = vmul.f32 %v1774_v54, %v1723_v10  ;;  %v1714_v63 = vadd.f32 %v5657_v52, %v1697_v30  ;;  %4441 = vmatmul.mubr.bf16.gmra.mxu1 %v1863_v29  ;;  %4532 = vmatprep.subr.bf16.mxu0 %v5681_v60  ;;  %v2128_v47 = vld [vmem:[#allocation2 + $0x1a] sm:$0xff]  ;;  %v4862_v51 = vld [vmem:[%s6178_s4 + $0x128] sm:$0xff]  }
 0x1b0   : > { %4477 = vmatmul.mubr.bf16.gmra.mxu0 %v1832_v34  ;;  %v1685_v2 = vpop.f32.mrf.mxu0  ;;  %4497 = vmatpush3.bf16.msra.mxu1 %v4850_v24  ;;  %v1857_v49 = vld [vmem:[#allocation2 + $0x31] sm:$0xff]  ;;  %v2136_v53 = vpack.c.bf16 %v2128_v47, %v2289_v32  ;;  %v2299_v10 = vpack.c.bf16 %v2291_v48, %v2128_v47  ;;  %v4865_v30 = vld [vmem:[%s6178_s4 + $0x168] sm:$0xff]   ;;  %v4864_v29 = vld [vmem:[%s6178_s4 + $0x120] sm:$0xff]  }
 0x1b1   : > { %1817 = vst [vmem:[#allocation2 + $0x43] sm:$0xff] %v5756_v61  ;;  %v1724_v57 = vmax.f32 %v1714_v63, 0.0  ;;  %v1698_v42 = vadd.f32 %v1685_v2, %v1535_v59  ;;  %4444 = vmatprep.mubr.msk.bf16.mxu1 %vm4920_vm0, %v5681_v60  ;;  %4480 = vmatprep.mubr.msk.bf16.mxu0 %vm4920_vm0, %v5681_v60  ;;  %v2464_v25 = vpack.c.bf16 %v5756_v61, %v5743_v44  ;;  %v1826_v1 = vld [vmem:[#allocation2 + $0x30] sm:$0xff]  ;;  %v4866_v46 = vld [vmem:[%s6178_s4 + $0x118] sm:$0xff]   ;;  %v4867_v59 = vld [vmem:[%s6178_s4 + $0x160] sm:$0xff]  }
 0x1b2   : > { %v4415_v5 = vpop.f32.mrf.mxu0  ;;  %4498 = vmatprep.subr.bf16.mxu1 %v5681_v60  ;;  %4533 = vmatpush3.bf16.msra.mxu0 %v4852_v35  ;;  %v4860_v24 = vld [vmem:[%s6178_s4 + $0x130] sm:$0xff]   ;;  %v4868_v35 = vld [vmem:[%s6178_s4 + $0x158] sm:$0xff]   ;;  %v4890_v61 = vld [vmem:[%s6178_s4 + $0x1c0] sm:$0xff]  }
 0x1b3   : > { %v5774_v58 = vmul.f32 %v1779_v20, %v1724_v57  ;;  %v1715_v8 = vadd.f32 %v5657_v52, %v1698_v42  ;;  %4534 = vmatprep.subr.bf16.mxu0 %v5681_v60  ;;  %v4855_v52 = vld [vmem:[%s6178_s4 + $0x88] sm:$0xff]   ;;  %v2293_v54 = vld [vmem:[#allocation2 + $0x32] sm:$0xff]  ;;  %v2941_v47 = vld [vmem:[#allocation2 + $0x1d] sm:$0xff] }
 0x1b4   : > { %v1858_v26 = vld [vmem:[#allocation2 + $0x39] sm:$0xff]  ;;  %4499 = vmatpush3.bf16.msra.mxu1 %v4853_v3  ;;  %v2130_v34 = vld [vmem:[#allocation2 + $0x2a] sm:$0xff] }
 0x1b5   : > { %v1827_v45 = vld [vmem:[#allocation2 + $0x38] sm:$0xff]  ;;  %1818 = vst [vmem:[#allocation2 + $0x4b] sm:$0xff] %v5774_v58  ;;  %v1725_v0 = vmax.f32 %v1715_v8, 0.0  ;;  %v1864_v15 = vpack.c.bf16 %v1858_v26, %v1857_v49  ;;  %4500 = vmatprep.subr.bf16.mxu1 %v5681_v60  ;;  %v2137_v63 = vpack.c.bf16 %v2130_v34, %v2291_v48  ;;  %v2300_v2 = vpack.c.bf16 %v2293_v54, %v2130_v34  ;;  %v4869_v3 = vld [vmem:[%s6178_s4 + $0x110] sm:$0xff]   ;;  %v4871_v49 = vld [vmem:[%s6178_s4 + $0x108] sm:$0xff]  }
 0x1b6   : > { %v1833_v56 = vpack.c.bf16 %v1827_v45, %v1826_v1  ;;  %4535 = vmatpush3.bf16.msra.mxu0 %v4854_v11  ;;  %v2132_v57 = vld [vmem:[#allocation2 + $0x3a] sm:$0xff]  ;;  %v4870_v20 = vld [vmem:[%s6178_s4 + $0x150] sm:$0xff]   ;;  %v4872_v11 = vld [vmem:[%s6178_s4 + $0x148] sm:$0xff]  }
 0x1b7   : > { %v5786_v17 = vmul.f32 %v1784_v41, %v1725_v0  ;;  %4445 = vmatmul.mubr.bf16.gmra.mxu1 %v1864_v15  ;;  %4536 = vmatprep.subr.bf16.mxu0 %v5681_v60  ;;  %v2138_v5 = vpack.c.bf16 %v2132_v57, %v2293_v54  ;;  %v4873_v26 = vld [vmem:[%s6178_s4 + $0x100] sm:$0xff]   ;;  %v2614_v41 = vld [vmem:[#allocation2 + $0xc] sm:$0xff]  ;;  %v5945_v39 = vld [vmem:[#allocation2 + $0x34] sm:$0xff] }
 0x1b8   : > { %4481 = vmatmul.mubr.bf16.gmra.mxu0 %v1833_v56  ;;  %4448 = vmatprep.mubr.msk.bf16.mxu1 %vm4920_vm0, %v5681_v60  ;;  %v1859_v7 = vld [vmem:[#allocation2 + $0x41] sm:$0xff]  ;;  %v5948_v36 = vld [vmem:[#allocation2 + $0x2c] sm:$0xff]  ;;  %v4884_v16 = vld [vmem:[%s6178_s4 + $0x1d8] sm:$0xff]  }
 0x1b9   : > { %1819 = vst [vmem:[#allocation2 + $0x53] sm:$0xff] %v5786_v17  ;;  %4484 = vmatprep.mubr.msk.bf16.mxu0 %vm4920_vm0, %v5681_v60  ;;  %4501 = vmatpush3.bf16.msra.mxu1 %v4855_v52  ;;  %v2465_v14 = vpack.c.bf16 %v5786_v17, %v5774_v58  ;;  %v1828_v38 = vld [vmem:[#allocation2 + $0x40] sm:$0xff]  ;;  %v5897_v52 = vld [vmem:[#allocation2 + $0x14] sm:$0xff]  ;;  %v2626_v50 = vpack.c.bf16 %v5945_v39, %v5948_v36 }
 0x1ba   : > { %4502 = vmatprep.subr.bf16.mxu1 %v5681_v60  ;;  %4537 = vmatpush3.bf16.msra.mxu0 %v4856_v18  ;;  %v2295_v42 = vld [vmem:[#allocation2 + $0x42] sm:$0xff]  ;;  %v4875_v18 = vld [vmem:[%s6178_s4 + $0x1b8] sm:$0xff]   ;;  %v4885_v32 = vld [vmem:[%s6178_s4 + $0x190] sm:$0xff]  }
 0x1bb   : > { %4538 = vmatprep.subr.bf16.mxu0 %v5681_v60  ;;  %v2301_v8 = vpack.c.bf16 %v2295_v42, %v2132_v57  ;;  %v4874_v0 = vld [vmem:[%s6178_s4 + $0x140] sm:$0xff]   ;;  %v2940_v48 = vld [vmem:[#allocation2 + $0x15] sm:$0xff]  ;;  %v2943_v17 = vld [vmem:[#allocation2 + $0x2d] sm:$0xff] }
 0x1bc   : > { %v1860_v23 = vld [vmem:[#allocation2 + $0x49] sm:$0xff]  ;;  %v5977_v9 = vld [vmem:[#allocation2 + $0x3c] sm:$0xff] }
 0x1bd   : > { %v1829_v6 = vld [vmem:[#allocation2 + $0x48] sm:$0xff]  ;;  %v1865_v33 = vpack.c.bf16 %v1860_v23, %v1859_v7  ;;  %4503 = vmatpush3.bf16.msra.mxu1 %v4857_v31  ;;  %v2624_v31 = vpack.c.bf16 %v5897_v52, %v2614_v41  ;;  %v4877_v7 = vld [vmem:[%s6178_s4 + $0x1f8] sm:$0xff]   ;;  %v4892_v58 = vld [vmem:[%s6178_s4 + $0x230] sm:$0xff]  }
 0x1be   : > { %v1834_v4 = vpack.c.bf16 %v1829_v6, %v1828_v38  ;;  %4560 = vmatprep.subr.bf16.mxu1 %v5681_v60  ;;  %4539 = vmatpush3.bf16.msra.mxu0 %v4858_v62  ;;  %v2134_v1 = vld [vmem:[#allocation2 + $0x4a] sm:$0xff]  ;;  %v4894_v34 = vld [vmem:[%s6178_s4 + $0x220] sm:$0xff]  }
 0x1bf   : > { %4449 = vmatmul.mubr.bf16.gmra.mxu1 %v1865_v33  ;;  %4596 = vmatprep.subr.bf16.mxu0 %v5681_v60  ;;  %v2139_v15 = vpack.c.bf16 %v2134_v1, %v2295_v42  ;;  %v4876_v62 = vld [vmem:[%s6178_s4 + $0x1b0] sm:$0xff]   ;;  %v5917_v23 = vld [vmem:[#allocation2 + $0x24] sm:$0xff] }
 0x1c0   : > { %4485 = vmatmul.mubr.bf16.gmra.mxu0 %v1834_v4  ;;  %4504 = vmatprep.mubr.msk.bf16.mxu1 %vm4920_vm0, %v5681_v60  ;;  %v2297_v45 = vld [vmem:[#allocation2 + $0x52] sm:$0xff]  ;;  %v2625_v38 = vpack.c.bf16 %v5917_v23, %v5923_v22  ;;  %v4881_v6 = vld [vmem:[%s6178_s4 + $0x1e8] sm:$0xff]   ;;  %v4880_v33 = vld [vmem:[%s6178_s4 + $0x1a0] sm:$0xff]  }
 0x1c1   : > { %4540 = vmatprep.mubr.msk.bf16.mxu0 %vm4920_vm0, %v5681_v60  ;;  %v2302_v56 = vpack.c.bf16 %v2297_v45, %v2134_v1  ;;  %v4883_v4 = vld [vmem:[%s6178_s4 + $0x1e0] sm:$0xff]   ;;  %v6002_v44 = vld [vmem:[#allocation2 + $0x54] sm:$0xff] }
 0x1c2   : > { %v2945_v54 = vld [vmem:[#allocation2 + $0x3d] sm:$0xff]  ;;  %v2946_v57 = vld [vmem:[#allocation2 + $0x45] sm:$0xff] }
 0x1c3   : > { %v3105_v41 = vld [vmem:[#allocation2 + $0x26] sm:$0xff] }
 0x1c7   : > { %4505 = vmatmul.mubr.bf16.vlgmr.msra.gmra.mxu1 %v2135_v27  ;;  %v4887_v27 = vld [vmem:[%s6178_s4 + $0x188] sm:$0xff]  }
 0x1c8   : > { %4541 = vmatmul.mubr.bf16.vlgmr.msra.gmra.mxu0 %v2298_v19  ;;  %4561 = vmatpush3.bf16.msra.mxu1 %v4859_v37  ;;  %v5973_v37 = vld [vmem:[#allocation2 + $0x44] sm:$0xff] }
 0x1c9   : > { %4508 = vmatprep.mubr.msk.bf16.mxu1 %vm4920_vm0, %v5681_v60  ;;  %4562 = vmatprep.subr.bf16.mxu1 %v5681_v60  ;;  %v4888_v19 = vld [vmem:[%s6178_s4 + $0x1c8] sm:$0xff]  }
 0x1ca   : > { %4544 = vmatprep.mubr.msk.bf16.mxu0 %vm4920_vm0, %v5681_v60  ;;  %4597 = vmatpush3.bf16.msra.mxu0 %v4861_v43  ;;  %v4889_v43 = vld [vmem:[%s6178_s4 + $0x180] sm:$0xff]  }
 0x1cb   : > { %4598 = vmatprep.subr.bf16.mxu0 %v5681_v60 }
 0x1cc   : > { %4563 = vmatpush3.bf16.msra.mxu1 %v4860_v24  ;;  %v2622_v24 = vld [vmem:[#allocation2 + $0x4c] sm:$0xff] }
 0x1cd   : > { %4564 = vmatprep.subr.bf16.mxu1 %v5681_v60  ;;  %v2790_v42 = vpack.c.bf16 %v2622_v24, %v5973_v37 }
 0x1ce   : > { %4599 = vmatpush3.bf16.msra.mxu0 %v4863_v40  ;;  %v4891_v40 = vld [vmem:[%s6178_s4 + $0x238] sm:$0xff]  }
 0x1cf   : > { %4509 = vmatmul.mubr.bf16.gmra.mxu1 %v2136_v53  ;;  %4600 = vmatprep.subr.bf16.mxu0 %v5681_v60  ;;  %v2950_v53 = vpack.c.bf16 %v2941_v47, %v2940_v48 }
 0x1d0   : > { %4545 = vmatmul.mubr.bf16.gmra.mxu0 %v2299_v10  ;;  %4565 = vmatpush3.bf16.msra.mxu1 %v4862_v51  ;;  %v2787_v51 = vpack.c.bf16 %v5923_v22, %v5897_v52  ;;  %v4893_v10 = vld [vmem:[%s6178_s4 + $0x228] sm:$0xff]  }
 0x1d1   : > { %4512 = vmatprep.mubr.msk.bf16.mxu1 %vm4920_vm0, %v5681_v60  ;;  %4548 = vmatprep.mubr.msk.bf16.mxu0 %vm4920_vm0, %v5681_v60  ;;  %v3106_v52 = vld [vmem:[#allocation2 + $0x2e] sm:$0xff] }
 0x1d2   : > { %4566 = vmatprep.subr.bf16.mxu1 %v5681_v60  ;;  %4601 = vmatpush3.bf16.msra.mxu0 %v4865_v30  ;;  %v2788_v30 = vpack.c.bf16 %v5948_v36, %v5917_v23  ;;  %v3110_v23 = vld [vmem:[#allocation2 + $0x4e] sm:$0xff] }
 0x1d3   : > { %4602 = vmatprep.subr.bf16.mxu0 %v5681_v60 }
 0x1d4   : > { %4567 = vmatpush3.bf16.msra.mxu1 %v4864_v29 }
 0x1d5   : > { %4568 = vmatprep.subr.bf16.mxu1 %v5681_v60 }
 0x1d6   : > { %4603 = vmatpush3.bf16.msra.mxu0 %v4867_v59  ;;  %v4895_v59 = vld [vmem:[%s6178_s4 + $0x218] sm:$0xff]  }
 0x1d7   : > { %4513 = vmatmul.mubr.bf16.gmra.mxu1 %v2137_v63  ;;  %4604 = vmatprep.subr.bf16.mxu0 %v5681_v60  ;;  %v2789_v63 = vpack.c.bf16 %v5977_v9, %v5945_v39 }
 0x1d8   : > { %4549 = vmatmul.mubr.bf16.gmra.mxu0 %v2300_v2  ;;  %4569 = vmatpush3.bf16.msra.mxu1 %v4866_v46  ;;  %v2944_v46 = vld [vmem:[#allocation2 + $0x35] sm:$0xff] }
 0x1d9   : > { %4516 = vmatprep.mubr.msk.bf16.mxu1 %vm4920_vm0, %v5681_v60  ;;  %4552 = vmatprep.mubr.msk.bf16.mxu0 %vm4920_vm0, %v5681_v60  ;;  %v2952_v2 = vpack.c.bf16 %v2945_v54, %v2944_v46 }
 0x1da   : > { %4570 = vmatprep.subr.bf16.mxu1 %v5681_v60  ;;  %4605 = vmatpush3.bf16.msra.mxu0 %v4868_v35  ;;  %v4896_v35 = vld [vmem:[%s6178_s4 + $0x210] sm:$0xff]  }
 0x1db   : > { %4606 = vmatprep.subr.bf16.mxu0 %v5681_v60 }
 0x1dc   : > { %4571 = vmatpush3.bf16.msra.mxu1 %v4869_v3  ;;  %v2947_v3 = vld [vmem:[#allocation2 + $0x4d] sm:$0xff] }
 0x1dd   : > { %4572 = vmatprep.subr.bf16.mxu1 %v5681_v60 }
 0x1de   : > { %4607 = vmatpush3.bf16.msra.mxu0 %v4870_v20  ;;  %v2953_v20 = vpack.c.bf16 %v2947_v3, %v2946_v57 }
 0x1df   : > { %4517 = vmatmul.mubr.bf16.gmra.mxu1 %v2138_v5  ;;  %4608 = vmatprep.subr.bf16.mxu0 %v5681_v60  ;;  %v4897_v5 = vld [vmem:[%s6178_s4 + $0x208] sm:$0xff]  }
 0x1e0   : > { %4553 = vmatmul.mubr.bf16.gmra.mxu0 %v2301_v8  ;;  %4520 = vmatprep.mubr.msk.bf16.mxu1 %vm4920_vm0, %v5681_v60  ;;  %v4898_v8 = vld [vmem:[%s6178_s4 + $0x200] sm:$0xff]  }
 0x1e1   : > { %4556 = vmatprep.mubr.msk.bf16.mxu0 %vm4920_vm0, %v5681_v60  ;;  %4573 = vmatpush3.bf16.msra.mxu1 %v4871_v49  ;;  %v2786_v49 = vld [vmem:[#allocation2 + $0x5c] sm:$0xff] }
 0x1e2   : > { %4574 = vmatprep.subr.bf16.mxu1 %v5681_v60  ;;  %4609 = vmatpush3.bf16.msra.mxu0 %v4872_v11  ;;  %v2948_v11 = vld [vmem:[#allocation2 + $0x55] sm:$0xff]  ;;  %v2791_v1 = vpack.c.bf16 %v2786_v49, %v6002_v44 }
 0x1e3   : > { %4610 = vmatprep.subr.bf16.mxu0 %v5681_v60 }
 0x1e5   : > { %4575 = vmatpush3.bf16.msra.mxu1 %v4873_v26  ;;  %v2949_v26 = vld [vmem:[#allocation2 + $0x5d] sm:$0xff] }
 0x1e6   : > { %4632 = vmatprep.subr.bf16.mxu1 %v5681_v60  ;;  %4611 = vmatpush3.bf16.msra.mxu0 %v4874_v0  ;;  %v2954_v45 = vpack.c.bf16 %v2949_v26, %v2948_v11  ;;  %v3104_v0 = vld [vmem:[#allocation2 + $0x1e] sm:$0xff] }
 0x1e7   : > { %4521 = vmatmul.mubr.bf16.gmra.mxu1 %v2139_v15  ;;  %4668 = vmatprep.subr.bf16.mxu0 %v5681_v60  ;;  %v3103_v15 = vld [vmem:[#allocation2 + $0x16] sm:$0xff] }
 0x1e8   : > { %4557 = vmatmul.mubr.bf16.gmra.mxu0 %v2302_v56  ;;  %4576 = vmatprep.mubr.msk.bf16.mxu1 %vm4920_vm0, %v5681_v60  ;;  %v3113_v56 = vpack.c.bf16 %v3104_v0, %v3103_v15 }
 0x1e9   : > { %4612 = vmatprep.mubr.msk.bf16.mxu0 %vm4920_vm0, %v5681_v60 }
 0x1ef   : > { %4577 = vmatmul.mubr.bf16.vlgmr.msra.gmra.mxu1 %v2461_v28  ;;  %v4878_v28 = vld [vmem:[%s6178_s4 + $0x1a8] sm:$0xff]  }
 0x1f0   : > { %4613 = vmatmul.mubr.bf16.vlgmr.msra.gmra.mxu0 %v2624_v31  ;;  %4633 = vmatpush3.bf16.msra.mxu1 %v4875_v18  ;;  %v3114_v18 = vpack.c.bf16 %v3106_v52, %v3105_v41  ;;  %v3108_v31 = vld [vmem:[#allocation2 + $0x3e] sm:$0xff] }
 0x1f1   : > { %4580 = vmatprep.mubr.msk.bf16.mxu1 %vm4920_vm0, %v5681_v60  ;;  %4634 = vmatprep.subr.bf16.mxu1 %v5681_v60 }
 0x1f2   : > { %4616 = vmatprep.mubr.msk.bf16.mxu0 %vm4920_vm0, %v5681_v60  ;;  %4669 = vmatpush3.bf16.msra.mxu0 %v4877_v7  ;;  %v3107_v7 = vld [vmem:[#allocation2 + $0x36] sm:$0xff] }
 0x1f3   : > { %4670 = vmatprep.subr.bf16.mxu0 %v5681_v60 }
 0x1f4   : > { %4635 = vmatpush3.bf16.msra.mxu1 %v4876_v62  ;;  %v3115_v62 = vpack.c.bf16 %v3108_v31, %v3107_v7 }
 0x1f5   : > { %4636 = vmatprep.subr.bf16.mxu1 %v5681_v60 }
 0x1f6   : > { %4671 = vmatpush3.bf16.msra.mxu0 %v4879_v13  ;;  %v3109_v13 = vld [vmem:[#allocation2 + $0x46] sm:$0xff] }
 0x1f7   : > { %4581 = vmatmul.mubr.bf16.gmra.mxu1 %v2462_v55  ;;  %4672 = vmatprep.subr.bf16.mxu0 %v5681_v60  ;;  %v4882_v55 = vld [vmem:[%s6178_s4 + $0x198] sm:$0xff]   ;;  %v3116_v22 = vpack.c.bf16 %v3110_v23, %v3109_v13 }
 0x1f8   : > { %4617 = vmatmul.mubr.bf16.gmra.mxu0 %v2625_v38  ;;  %4637 = vmatpush3.bf16.msra.mxu1 %v4878_v28  ;;  %v3111_v28 = vld [vmem:[#allocation2 + $0x56] sm:$0xff]  ;;  %v3112_v38 = vld [vmem:[#allocation2 + $0x5e] sm:$0xff] }
 0x1f9   : > { %4584 = vmatprep.mubr.msk.bf16.mxu1 %vm4920_vm0, %v5681_v60  ;;  %4620 = vmatprep.mubr.msk.bf16.mxu0 %vm4920_vm0, %v5681_v60 }
 0x1fa   : > { %4638 = vmatprep.subr.bf16.mxu1 %v5681_v60  ;;  %4673 = vmatpush3.bf16.msra.mxu0 %v4881_v6  ;;  %v3117_v6 = vpack.c.bf16 %v3112_v38, %v3111_v28 }
 0x1fb   : > { %4674 = vmatprep.subr.bf16.mxu0 %v5681_v60 }
 0x1fc   : > { %4639 = vmatpush3.bf16.msra.mxu1 %v4880_v33 }
 0x1fd   : > { %4640 = vmatprep.subr.bf16.mxu1 %v5681_v60 }
 0x1fe   : > { %4675 = vmatpush3.bf16.msra.mxu0 %v4883_v4 }
 0x1ff   : > { %4585 = vmatmul.mubr.bf16.gmra.mxu1 %v2463_v12  ;;  %4676 = vmatprep.subr.bf16.mxu0 %v5681_v60  ;;  %v2627_v12 = vpack.c.bf16 %v5973_v37, %v5977_v9 }
 0x200   : > { %4621 = vmatmul.mubr.bf16.gmra.mxu0 %v2626_v50  ;;  %4641 = vmatpush3.bf16.msra.mxu1 %v4882_v55 }
 0x201   : > { %4588 = vmatprep.mubr.msk.bf16.mxu1 %vm4920_vm0, %v5681_v60  ;;  %4624 = vmatprep.mubr.msk.bf16.mxu0 %vm4920_vm0, %v5681_v60 }
 0x202   : > { %4642 = vmatprep.subr.bf16.mxu1 %v5681_v60  ;;  %4677 = vmatpush3.bf16.msra.mxu0 %v4884_v16 }
 0x203   : > { %4678 = vmatprep.subr.bf16.mxu0 %v5681_v60 }
 0x204   : > { %4643 = vmatpush3.bf16.msra.mxu1 %v4885_v32 }
 0x205   : > { %4644 = vmatprep.subr.bf16.mxu1 %v5681_v60 }
 0x206   : > { %4679 = vmatpush3.bf16.msra.mxu0 %v4886_v21 }
 0x207   : > { %4589 = vmatmul.mubr.bf16.gmra.mxu1 %v2464_v25  ;;  %4680 = vmatprep.subr.bf16.mxu0 %v5681_v60  ;;  %v2628_v25 = vpack.c.bf16 %v6002_v44, %v2622_v24 }
 0x208   : > { %4625 = vmatmul.mubr.bf16.gmra.mxu0 %v2627_v12  ;;  %4592 = vmatprep.mubr.msk.bf16.mxu1 %vm4920_vm0, %v5681_v60 }
 0x209   : > { %4628 = vmatprep.mubr.msk.bf16.mxu0 %vm4920_vm0, %v5681_v60  ;;  %4645 = vmatpush3.bf16.msra.mxu1 %v4887_v27 }
 0x20a   : > { %4646 = vmatprep.subr.bf16.mxu1 %v5681_v60  ;;  %4681 = vmatpush3.bf16.msra.mxu0 %v4888_v19 }
 0x20b   : > { %4682 = vmatprep.subr.bf16.mxu0 %v5681_v60 }
 0x20d   : > { %4647 = vmatpush3.bf16.msra.mxu1 %v4889_v43 }
 0x20e   : > { %4704 = vmatprep.subr.bf16.mxu1 %v5681_v60  ;;  %4683 = vmatpush3.bf16.msra.mxu0 %v4890_v61 }
 0x20f   : > { %4593 = vmatmul.mubr.bf16.gmra.mxu1 %v2465_v14  ;;  %v2942_v14 = vld [vmem:[#allocation2 + $0x25] sm:$0xff] }
 0x210   : > { %4629 = vmatmul.mubr.bf16.gmra.mxu0 %v2628_v25  ;;  %4648 = vmatprep.mubr.msk.bf16.mxu1 %vm4920_vm0, %v5681_v60  ;;  %v2951_v29 = vpack.c.bf16 %v2943_v17, %v2942_v14 }
 0x211   : > { %4684 = vmatprep.mubr.msk.bf16.mxu0 %vm4920_vm0, %v5681_v60 }
 0x217   : > { %4649 = vmatmul.mubr.bf16.vlgmr.msra.gmra.mxu1 %v2787_v51 }
 0x218   : > { %4685 = vmatmul.mubr.bf16.vlgmr.msra.gmra.mxu0 %v2950_v53  ;;  %4705 = vmatpush3.bf16.msra.mxu1 %v4891_v40 }
 0x219   : > { %4652 = vmatprep.mubr.msk.bf16.mxu1 %vm4920_vm0, %v5681_v60  ;;  %4706 = vmatprep.subr.bf16.mxu1 %v5681_v60 }
 0x21a   : > { %4688 = vmatprep.mubr.msk.bf16.mxu0 %vm4920_vm0, %v5681_v60 }
 0x21c   : > { %4707 = vmatpush3.bf16.msra.mxu1 %v4892_v58 }
 0x21d   : > { %4708 = vmatprep.subr.bf16.mxu1 %v5681_v60 }
 0x21f   : > { %4653 = vmatmul.mubr.bf16.gmra.mxu1 %v2788_v30 }
 0x220   : > { %4689 = vmatmul.mubr.bf16.gmra.mxu0 %v2951_v29  ;;  %4709 = vmatpush3.bf16.msra.mxu1 %v4893_v10 }
 0x221   : > { %4656 = vmatprep.mubr.msk.bf16.mxu1 %vm4920_vm0, %v5681_v60  ;;  %4692 = vmatprep.mubr.msk.bf16.mxu0 %vm4920_vm0, %v5681_v60 }
 0x222   : > { %4710 = vmatprep.subr.bf16.mxu1 %v5681_v60 }
 0x224   : > { %4711 = vmatpush3.bf16.msra.mxu1 %v4894_v34 }
 0x225   : > { %4712 = vmatprep.subr.bf16.mxu1 %v5681_v60 }
 0x227   : > { %4657 = vmatmul.mubr.bf16.gmra.mxu1 %v2789_v63 }
 0x228   : > { %4693 = vmatmul.mubr.bf16.gmra.mxu0 %v2952_v2  ;;  %4713 = vmatpush3.bf16.msra.mxu1 %v4895_v59 }
 0x229   : > { %4660 = vmatprep.mubr.msk.bf16.mxu1 %vm4920_vm0, %v5681_v60  ;;  %4696 = vmatprep.mubr.msk.bf16.mxu0 %vm4920_vm0, %v5681_v60 }
 0x22a   : > { %4714 = vmatprep.subr.bf16.mxu1 %v5681_v60 }
 0x22c   : > { %4715 = vmatpush3.bf16.msra.mxu1 %v4896_v35 }
 0x22d   : > { %4716 = vmatprep.subr.bf16.mxu1 %v5681_v60 }
 0x22f   : > { %4661 = vmatmul.mubr.bf16.gmra.mxu1 %v2790_v42 }
 0x230   : > { %4697 = vmatmul.mubr.bf16.gmra.mxu0 %v2953_v20  ;;  %4664 = vmatprep.mubr.msk.bf16.mxu1 %vm4920_vm0, %v5681_v60 }
 0x231   : > { %4700 = vmatprep.mubr.msk.bf16.mxu0 %vm4920_vm0, %v5681_v60  ;;  %4717 = vmatpush3.bf16.msra.mxu1 %v4897_v5 }
 0x232   : > { %4718 = vmatprep.subr.bf16.mxu1 %v5681_v60 }
 0x235   : > { %4719 = vmatpush3.bf16.msra.mxu1 %v4898_v8 }
 0x237   : > { %4665 = vmatmul.mubr.bf16.gmra.mxu1 %v2791_v1 }
 0x238   : > { %4701 = vmatmul.mubr.bf16.gmra.mxu0 %v2954_v45  ;;  %4720 = vmatprep.mubr.msk.bf16.mxu1 %vm4920_vm0, %v5681_v60 }
 0x23f   : > { %4721 = vmatmul.mubr.bf16.vlgmr.msra.gmra.mxu1 %v3113_v56 }
 0x240   : > { %4724 = vmatprep.mubr.msk.bf16.mxu1 %vm4920_vm0, %v5681_v60 }
 0x247   : > { %4725 = vmatmul.mubr.bf16.gmra.mxu1 %v3114_v18 }
 0x248   : > { %4728 = vmatprep.mubr.msk.bf16.mxu1 %vm4920_vm0, %v5681_v60 }
 0x24f   : > { %4729 = vmatmul.mubr.bf16.gmra.mxu1 %v3115_v62 }
 0x250   : > { %4732 = vmatprep.mubr.msk.bf16.mxu1 %vm4920_vm0, %v5681_v60 }
 0x257   : > { %4733 = vmatmul.mubr.bf16.gmra.mxu1 %v3116_v22 }
 0x258   : > { %4736 = vmatprep.mubr.msk.bf16.mxu1 %vm4920_vm0, %v5681_v60 }
 0x25f   : > { %v1965_v33 = vpop.f32.mrf.mxu1  ;;  %4737 = vmatmul.mubr.bf16.gmra.mxu1 %v3117_v6 }
 0x260   : > { %v2086_v39 = vpop.f32.mrf.mxu0 }
 0x261   : > { %v2087_v36 = vadd.f32 %v2086_v39, %v1965_v33  ;;  %v4434_v55 = vpop.f32.mrf.mxu1 }
 0x262   : > { %v4470_v4 = vpop.f32.mrf.mxu0 }
 0x263   : > { %v1968_v50 = vpop.f32.mrf.mxu1 }
 0x264   : > { %v2089_v16 = vpop.f32.mrf.mxu0 }
 0x265   : > { %v2090_v32 = vadd.f32 %v2089_v16, %v1968_v50  ;;  %v4435_v37 = vpop.f32.mrf.mxu1 }
 0x266   : > { %v4471_v9 = vpop.f32.mrf.mxu0 }
 0x267   : > { %v1973_v21 = vpop.f32.mrf.mxu1 }
 0x268   : > { %v2094_v12 = vpop.f32.mrf.mxu0 }
 0x269   : > { %v2095_v27 = vadd.f32 %v2094_v12, %v1973_v21  ;;  %v4438_v19 = vpop.f32.mrf.mxu1 }
 0x26a   : > { %v4474_v43 = vpop.f32.mrf.mxu0 }
 0x26b   : > { %v1976_v60 = vpop.f32.mrf.mxu1 }
 0x26c   : > { %v2097_v24 = vpop.f32.mrf.mxu0 }
 0x26d   : > { %v2098_v44 = vadd.f32 %v2097_v24, %v1976_v60  ;;  %v4439_v61 = vpop.f32.mrf.mxu1 }
 0x26e   : > { %v4475_v25 = vpop.f32.mrf.mxu0 }
 0x26f   : > { %v1981_v47 = vpop.f32.mrf.mxu1 }
 0x270   : > { %v2102_v48 = vpop.f32.mrf.mxu0 }
 0x271   : > { %v2103_v40 = vadd.f32 %v2102_v48, %v1981_v47  ;;  %v4442_v51 = vpop.f32.mrf.mxu1 }
 0x272   : > { %v4478_v53 = vpop.f32.mrf.mxu0 }
 0x273   : > { %v1984_v58 = vpop.f32.mrf.mxu1 }
 0x274   : > { %v2105_v17 = vpop.f32.mrf.mxu0 }
 0x275   : > { %v2106_v14 = vadd.f32 %v2105_v17, %v1984_v58  ;;  %v4443_v10 = vpop.f32.mrf.mxu1 }
 0x276   : > { %v4479_v30 = vpop.f32.mrf.mxu0 }
 0x277   : > { %v1989_v29 = vpop.f32.mrf.mxu1 }
 0x278   : > { %v2110_v34 = vpop.f32.mrf.mxu0 }
 0x279   : > { %v2111_v54 = vadd.f32 %v2110_v34, %v1989_v29  ;;  %v4446_v46 = vpop.f32.mrf.mxu1 }
 0x27a   : > { %v4482_v59 = vpop.f32.mrf.mxu0 }
 0x27b   : > { %v1992_v63 = vpop.f32.mrf.mxu1 }
 0x27c   : > { %v2113_v2 = vpop.f32.mrf.mxu0 }
 0x27d   : > { %v2114_v35 = vadd.f32 %v2113_v2, %v1992_v63  ;;  %v4447_v3 = vpop.f32.mrf.mxu1 }
 0x27e   : > { %v4483_v57 = vpop.f32.mrf.mxu0 }
 0x27f   : > { %v1997_v42 = vpop.f32.mrf.mxu1 }
 0x280   : > { %v2118_v20 = vpop.f32.mrf.mxu0 }
 0x281   : > { %v2119_v5 = vadd.f32 %v2118_v20, %v1997_v42  ;;  %v4450_v8 = vpop.f32.mrf.mxu1 }
 0x282   : > { %v4486_v49 = vpop.f32.mrf.mxu0 }
 0x283   : > { %v2000_v11 = vpop.f32.mrf.mxu1 }
 0x284   : > { %v2121_v26 = vpop.f32.mrf.mxu0 }
 0x285   : > { %v2122_v1 = vadd.f32 %v2121_v26, %v2000_v11  ;;  %v4451_v45 = vpop.f32.mrf.mxu1 }
 0x286   : > { %v4487_v0 = vpop.f32.mrf.mxu0 }
 0x287   : > { %v2239_v15 = vpop.f32.mrf.mxu1 }
 0x288   : > { %v2402_v56 = vpop.f32.mrf.mxu0  ;;  %v2278_v52 = vadd.f32 %v2239_v15, %v2087_v36 }
 0x289   : > { %v4506_v41 = vpop.f32.mrf.mxu1 }
 0x28a   : > { %v4542_v18 = vpop.f32.mrf.mxu0  ;;  %v2441_v31 = vadd.f32 %v2402_v56, %v2278_v52 }
 0x28b   : > { %v2242_v7 = vpop.f32.mrf.mxu1 }
 0x28c   : > { %v2405_v62 = vpop.f32.mrf.mxu0  ;;  %v2279_v23 = vadd.f32 %v2242_v7, %v2090_v32 }
 0x28d   : > { %v4507_v13 = vpop.f32.mrf.mxu1 }
 0x28e   : > { %v4543_v22 = vpop.f32.mrf.mxu0  ;;  %v2442_v28 = vadd.f32 %v2405_v62, %v2279_v23 }
 0x28f   : > { %v2247_v38 = vpop.f32.mrf.mxu1 }
 0x290   : > { %v2410_v6 = vpop.f32.mrf.mxu0  ;;  %v2280_v33 = vadd.f32 %v2247_v38, %v2095_v27 }
 0x291   : > { %v4510_v39 = vpop.f32.mrf.mxu1 }
 0x292   : > { %v4546_v55 = vpop.f32.mrf.mxu0  ;;  %v2443_v4 = vadd.f32 %v2410_v6, %v2280_v33 }
 0x293   : > { %v2250_v50 = vpop.f32.mrf.mxu1 }
 0x294   : > { %v2413_v16 = vpop.f32.mrf.mxu0  ;;  %v2281_v37 = vadd.f32 %v2250_v50, %v2098_v44 }
 0x295   : > { %v4511_v9 = vpop.f32.mrf.mxu1 }
 0x296   : > { %v4547_v36 = vpop.f32.mrf.mxu0  ;;  %v2444_v21 = vadd.f32 %v2413_v16, %v2281_v37 }
 0x297   : > { %v2255_v12 = vpop.f32.mrf.mxu1 }
 0x298   : > { %v2418_v19 = vpop.f32.mrf.mxu0  ;;  %v2282_v43 = vadd.f32 %v2255_v12, %v2103_v40 }
 0x299   : > { %v4514_v60 = vpop.f32.mrf.mxu1 }
 0x29a   : > { %v4550_v32 = vpop.f32.mrf.mxu0  ;;  %v2445_v24 = vadd.f32 %v2418_v19, %v2282_v43 }
 0x29b   : > { %v2258_v61 = vpop.f32.mrf.mxu1 }
 0x29c   : > { %v2421_v25 = vpop.f32.mrf.mxu0  ;;  %v2283_v47 = vadd.f32 %v2258_v61, %v2106_v14 }
 0x29d   : > { %v4515_v48 = vpop.f32.mrf.mxu1 }
 0x29e   : > { %v4551_v27 = vpop.f32.mrf.mxu0  ;;  %v2446_v51 = vadd.f32 %v2421_v25, %v2283_v47 }
 0x29f   : > { %v2263_v53 = vpop.f32.mrf.mxu1 }
 0x2a0   : > { %v2426_v58 = vpop.f32.mrf.mxu0  ;;  %v2284_v17 = vadd.f32 %v2263_v53, %v2111_v54 }
 0x2a1   : > { %v4518_v10 = vpop.f32.mrf.mxu1 }
 0x2a2   : > { %v4554_v44 = vpop.f32.mrf.mxu0  ;;  %v2447_v30 = vadd.f32 %v2426_v58, %v2284_v17 }
 0x2a3   : > { %v2266_v29 = vpop.f32.mrf.mxu1 }
 0x2a4   : > { %v2429_v34 = vpop.f32.mrf.mxu0  ;;  %v2285_v46 = vadd.f32 %v2266_v29, %v2114_v35 }
 0x2a5   : > { %v4519_v59 = vpop.f32.mrf.mxu1 }
 0x2a6   : > { %v4555_v40 = vpop.f32.mrf.mxu0  ;;  %v2448_v63 = vadd.f32 %v2429_v34, %v2285_v46 }
 0x2a7   : > { %v2271_v2 = vpop.f32.mrf.mxu1 }
 0x2a8   : > { %v2434_v3 = vpop.f32.mrf.mxu0  ;;  %v2286_v57 = vadd.f32 %v2271_v2, %v2119_v5 }
 0x2a9   : > { %v4522_v42 = vpop.f32.mrf.mxu1 }
 0x2aa   : > { %v4558_v14 = vpop.f32.mrf.mxu0  ;;  %v2449_v20 = vadd.f32 %v2434_v3, %v2286_v57 }
 0x2ab   : > { %v2274_v8 = vpop.f32.mrf.mxu1 }
 0x2ac   : > { %v2437_v49 = vpop.f32.mrf.mxu0  ;;  %v2287_v11 = vadd.f32 %v2274_v8, %v2122_v1 }
 0x2ad   : > { %v4523_v26 = vpop.f32.mrf.mxu1 }
 0x2ae   : > { %v4559_v54 = vpop.f32.mrf.mxu0  ;;  %v2450_v45 = vadd.f32 %v2437_v49, %v2287_v11 }
 0x2af   : > { %v2565_v0 = vpop.f32.mrf.mxu1 }
 0x2b0   : > { %v2728_v15 = vpop.f32.mrf.mxu0  ;;  %v2604_v56 = vadd.f32 %v2565_v0, %v2441_v31 }
 0x2b1   : > { %v4578_v52 = vpop.f32.mrf.mxu1 }
 0x2b2   : > { %v4614_v35 = vpop.f32.mrf.mxu0  ;;  %v6084_v41 = vadd.f32 %v2728_v15, %v2604_v56 }
 0x2b3   : > { %v2568_v18 = vpop.f32.mrf.mxu1 }
 0x2b4   : > { %v2731_v7 = vpop.f32.mrf.mxu0  ;;  %v2605_v62 = vadd.f32 %v2568_v18, %v2442_v28 }
 0x2b5   : > { %v4579_v5 = vpop.f32.mrf.mxu1 }
 0x2b6   : > { %v4615_v23 = vpop.f32.mrf.mxu0  ;;  %v6086_v13 = vadd.f32 %v2731_v7, %v2605_v62 }
 0x2b7   : > { %v2573_v22 = vpop.f32.mrf.mxu1 }
 0x2b8   : > { %v2736_v38 = vpop.f32.mrf.mxu0  ;;  %v2606_v1 = vadd.f32 %v2573_v22, %v2443_v4 }
 0x2b9   : > { %v4582_v6 = vpop.f32.mrf.mxu1 }
 0x2ba   : > { %v4618_v33 = vpop.f32.mrf.mxu0  ;;  %v6088_v39 = vadd.f32 %v2736_v38, %v2606_v1 }
 0x2bb   : > { %v2576_v55 = vpop.f32.mrf.mxu1 }
 0x2bc   : > { %v2739_v31 = vpop.f32.mrf.mxu0  ;;  %v2607_v50 = vadd.f32 %v2576_v55, %v2444_v21 }
 0x2bd   : > { %v4583_v16 = vpop.f32.mrf.mxu1 }
 0x2be   : > { %v4619_v37 = vpop.f32.mrf.mxu0  ;;  %v6090_v9 = vadd.f32 %v2739_v31, %v2607_v50 }
 0x2bf   : > { %v2581_v36 = vpop.f32.mrf.mxu1 }
 0x2c0   : > { %v2744_v28 = vpop.f32.mrf.mxu0  ;;  %v2608_v12 = vadd.f32 %v2581_v36, %v2445_v24 }
 0x2c1   : > { %v4586_v19 = vpop.f32.mrf.mxu1 }
 0x2c2   : > { %v4622_v43 = vpop.f32.mrf.mxu0  ;;  %v6092_v60 = vadd.f32 %v2744_v28, %v2608_v12 }
 0x2c3   : > { %v2584_v32 = vpop.f32.mrf.mxu1 }
 0x2c4   : > { %v2747_v4 = vpop.f32.mrf.mxu0  ;;  %v2609_v61 = vadd.f32 %v2584_v32, %v2446_v51 }
 0x2c5   : > { %v4587_v25 = vpop.f32.mrf.mxu1 }
 0x2c6   : > { %v4623_v47 = vpop.f32.mrf.mxu0  ;;  %v6094_v48 = vadd.f32 %v2747_v4, %v2609_v61 }
 0x2c7   : > { %v2589_v27 = vpop.f32.mrf.mxu1 }
 0x2c8   : > { %v2752_v21 = vpop.f32.mrf.mxu0  ;;  %v2610_v53 = vadd.f32 %v2589_v27, %v2447_v30 }
 0x2c9   : > { %v4590_v58 = vpop.f32.mrf.mxu1 }
 0x2ca   : > { %v4626_v17 = vpop.f32.mrf.mxu0  ;;  %v6096_v10 = vadd.f32 %v2752_v21, %v2610_v53 }
 0x2cb   : > { %v2592_v44 = vpop.f32.mrf.mxu1 }
 0x2cc   : > { %v2755_v24 = vpop.f32.mrf.mxu0  ;;  %v2611_v29 = vadd.f32 %v2592_v44, %v2448_v63 }
 0x2cd   : > { %v4591_v34 = vpop.f32.mrf.mxu1 }
 0x2ce   : > { %v4627_v46 = vpop.f32.mrf.mxu0  ;;  %v6098_v59 = vadd.f32 %v2755_v24, %v2611_v29 }
 0x2cf   : > { %v2597_v40 = vpop.f32.mrf.mxu1 }
 0x2d0   : > { %v2760_v51 = vpop.f32.mrf.mxu0  ;;  %v2612_v2 = vadd.f32 %v2597_v40, %v2449_v20 }
 0x2d1   : > { %v4594_v3 = vpop.f32.mrf.mxu1 }
 0x2d2   : > { %v4630_v57 = vpop.f32.mrf.mxu0  ;;  %v6100_v42 = vadd.f32 %v2760_v51, %v2612_v2  ;;  %v6123_v51 = vld [vmem:[%s6179_s5] ss:$0 sm:$0xff] }
 0x2d3   : > { %v2600_v14 = vpop.f32.mrf.mxu1 }
 0x2d4   : > { %v2763_v30 = vpop.f32.mrf.mxu0  ;;  %v2613_v8 = vadd.f32 %v2600_v14, %v2450_v45 }
 0x2d5   : > { %v4595_v49 = vpop.f32.mrf.mxu1 }
 0x2d6   : > { %v4631_v11 = vpop.f32.mrf.mxu0  ;;  %v6102_v26 = vadd.f32 %v2763_v30, %v2613_v8 }
 0x2d7   : > { %v2891_v54 = vpop.f32.mrf.mxu1 }
 0x2d8   : > { %v3054_v63 = vpop.f32.mrf.mxu0  ;;  %v2930_v53 = vadd.f32 %v2891_v54, %v6084_v41 }
 0x2d9   : > { %v4650_v0 = vpop.f32.mrf.mxu1 }
 0x2da   : > { %v4686_v15 = vpop.f32.mrf.mxu0  ;;  %v3093_v29 = vadd.f32 %v3054_v63, %v2930_v53  ;;  %v4901_v63 = vld [vmem:[%s5040_s28 + $0xb] sm:$0xff] }
 0x2db   : > { %v2894_v56 = vpop.f32.mrf.mxu1  ;;  %v4902_v15 = vld [vmem:[%s5040_s28 + $0x13] sm:$0xff] }
 0x2dc   : > { %v3057_v52 = vpop.f32.mrf.mxu0  ;;  %v2931_v34 = vadd.f32 %v2894_v56, %v6086_v13 }
 0x2dd   : > { %v4651_v35 = vpop.f32.mrf.mxu1 }
 0x2de   : > { %v4687_v18 = vpop.f32.mrf.mxu0  ;;  %v3094_v2 = vadd.f32 %v3057_v52, %v2931_v34 }
 0x2df   : > { %v2899_v20 = vpop.f32.mrf.mxu1 }
 0x2e0   : > { %v3062_v7 = vpop.f32.mrf.mxu0  ;;  %v2932_v3 = vadd.f32 %v2899_v20, %v6088_v39 }
 0x2e1   : > { %v4654_v62 = vpop.f32.mrf.mxu1 }
 0x2e2   : > { %v4690_v5 = vpop.f32.mrf.mxu0  ;;  %v3095_v13 = vadd.f32 %v3062_v7, %v2932_v3 }
 0x2e3   : > { %v2902_v23 = vpop.f32.mrf.mxu1 }
 0x2e4   : > { %v3065_v22 = vpop.f32.mrf.mxu0  ;;  %v2933_v49 = vadd.f32 %v2902_v23, %v6090_v9 }
 0x2e5   : > { %v4655_v38 = vpop.f32.mrf.mxu1 }
 0x2e6   : > { %v4691_v45 = vpop.f32.mrf.mxu0  ;;  %v3096_v35 = vadd.f32 %v3065_v22, %v2933_v49 }
 0x2e7   : > { %v2907_v1 = vpop.f32.mrf.mxu1 }
 0x2e8   : > { %v3070_v6 = vpop.f32.mrf.mxu0  ;;  %v2934_v9 = vadd.f32 %v2907_v1, %v6092_v60 }
 0x2e9   : > { %v4658_v33 = vpop.f32.mrf.mxu1 }
 0x2ea   : > { %v4694_v55 = vpop.f32.mrf.mxu0  ;;  %v3097_v23 = vadd.f32 %v3070_v6, %v2934_v9 }
 0x2eb   : > { %v2910_v31 = vpop.f32.mrf.mxu1  ;;  %v4903_v55 = vld [vmem:[%s5040_s28 + $0x1b] sm:$0xff] }
 0x2ec   : > { %v3073_v50 = vpop.f32.mrf.mxu0  ;;  %v2935_v38 = vadd.f32 %v2910_v31, %v6094_v48 }
 0x2ed   : > { %v4659_v16 = vpop.f32.mrf.mxu1 }
 0x2ee   : > { %v4695_v37 = vpop.f32.mrf.mxu0 }
 0x2ef   : > { %v2915_v36 = vpop.f32.mrf.mxu1  ;;  %v4904_v37 = vld [vmem:[%s5040_s28 + $0x23] sm:$0xff] }
 0x2f0   : > { %v6104_v28 = vpop.f32.mrf.mxu0 }
 0x2f1   : > { %v4662_v12 = vpop.f32.mrf.mxu1 }
 0x2f2   : > { %v4698_v19 = vpop.f32.mrf.mxu0  ;;  %v3098_v12 = vadd.f32 %v3073_v50, %v2935_v38 }
 0x2f3   : > { %v6106_v43 = vpop.f32.mrf.mxu1  ;;  %v2936_v19 = vadd.f32 %v2915_v36, %v6096_v10 }
 0x2f4   : > { %v6108_v32 = vpop.f32.mrf.mxu0 }
 0x2f5   : > { %v4663_v4 = vpop.f32.mrf.mxu1 }
 0x2f6   : > { %v4699_v61 = vpop.f32.mrf.mxu0 }
 0x2f7   : > { %v6110_v25 = vpop.f32.mrf.mxu1 }
 0x2f8   : > { %v6112_v47 = vpop.f32.mrf.mxu0 }
 0x2f9   : > { %v4666_v27 = vpop.f32.mrf.mxu1 }
 0x2fa   : > { %v4702_v21 = vpop.f32.mrf.mxu0  ;;  %v3099_v27 = vadd.f32 %v6104_v28, %v2936_v19 }
 0x2fb   : > { %v6115_v58 = vpop.f32.mrf.mxu1  ;;  %v2937_v21 = vadd.f32 %v6106_v43, %v6098_v59 }
 0x2fc   : > { %v6117_v17 = vpop.f32.mrf.mxu0 }
 0x2fd   : > { %v4667_v44 = vpop.f32.mrf.mxu1 }
 0x2fe   : > { %v4703_v24 = vpop.f32.mrf.mxu0 }
 0x2ff   : > { %v3217_v46 = vpop.f32.mrf.mxu1  ;;  %v4905_v24 = vld [vmem:[%s5040_s28 + $0x2b] sm:$0xff] }
 0x300   : > { %v3256_v40 = vadd.f32 %v3217_v46, %v3093_v29  ;;  %v4906_v29 = vld [vmem:[%s5040_s28 + $0x33] sm:$0xff]  ;;  %v3100_v46 = vadd.f32 %v6108_v32, %v2937_v21 }
 0x301   : > { %v4722_v41 = vpop.f32.mrf.mxu1 }
 0x302   : > { %v3273_v14 = vadd.f32 %v6123_v51, %v3256_v40  ;;  %v2938_v40 = vadd.f32 %v6110_v25, %v6100_v42  ;;  %v4908_v25 = vld [vmem:[%s5040_s28 + $0x43] sm:$0xff] }
 0x303   : > { %v3220_v57 = vpop.f32.mrf.mxu1 }
 0x304   : > { %v3257_v30 = vadd.f32 %v3220_v57, %v3094_v2  ;;  %v3283_v0 = vadd.f32 %v4901_v63, %v3273_v14  ;;  %v3101_v3 = vadd.f32 %v6112_v47, %v2938_v40  ;;  %v2939_v57 = vadd.f32 %v6115_v58, %v6102_v26 }
 0x305   : > { %v4723_v8 = vpop.f32.mrf.mxu1 }
 0x306   : > { %v3274_v11 = vadd.f32 %v6123_v51, %v3257_v30  ;;  %v4907_v30 = vld [vmem:[%s5040_s28 + $0x3b] sm:$0xff] }
 0x307   : > { %v3225_v54 = vpop.f32.mrf.mxu1 }
 0x308   : > { %v3284_v56 = vadd.f32 %v4902_v15, %v3274_v11  ;;  %v3258_v52 = vadd.f32 %v3225_v54, %v3095_v13  ;;  %v3102_v11 = vadd.f32 %v6117_v17, %v2939_v57  ;;  %v4909_v15 = vld [vmem:[%s5040_s28 + $0x4b] sm:$0xff] }
 0x309   : > { %v4726_v39 = vpop.f32.mrf.mxu1 }
 0x30a   : > { %v3832_v18 = vpack.c.bf16 %v3284_v56, %v3283_v0  ;;  %v3275_v7 = vadd.f32 %v6123_v51, %v3258_v52  ;;  %v4910_v52 = vld [vmem:[%s5040_s28 + $0x53] sm:$0xff] }
 0x30b   : > { %v3228_v20 = vpop.f32.mrf.mxu1 }
 0x30c   : > { %3833 = vst [vmem:[%s6135_s25] sm:$0xff] %v3832_v18   ;;  %v3259_v62 = vadd.f32 %v3228_v20, %v3096_v35  ;;  %v3285_v16 = vadd.f32 %v4903_v55, %v3275_v7 }
 0x30d   : > { %v4727_v5 = vpop.f32.mrf.mxu1 }
 0x30e   : > { %v3276_v45 = vadd.f32 %v6123_v51, %v3259_v62 }
 0x30f   : > { %v3233_v33 = vpop.f32.mrf.mxu1 }
 0x310   : > { %v3286_v22 = vadd.f32 %v4904_v37, %v3276_v45  ;;  %v3260_v60 = vadd.f32 %v3233_v33, %v3097_v23 }
 0x311   : > { %v4730_v1 = vpop.f32.mrf.mxu1 }
 0x312   : > { %v3837_v4 = vpack.c.bf16 %v3286_v22, %v3285_v16  ;;  %v3277_v6 = vadd.f32 %v6123_v51, %v3260_v60 }
 0x313   : > { %v3236_v61 = vpop.f32.mrf.mxu1 }
 0x314   : > { %3854 = vst [vmem:[%s6135_s25 + $0x8] sm:$0xff] %v3837_v4   ;;  %v3261_v48 = vadd.f32 %v3236_v61, %v3098_v12  ;;  %v3287_v50 = vadd.f32 %v4905_v24, %v3277_v6 }
 0x315   : > { %v4731_v31 = vpop.f32.mrf.mxu1 }
 0x316   : > { %v3278_v53 = vadd.f32 %v6123_v51, %v3261_v48 }
 0x317   : > { %v3241_v44 = vpop.f32.mrf.mxu1 }
 0x318   : > { %v3288_v10 = vadd.f32 %v4906_v29, %v3278_v53  ;;  %v3262_v36 = vadd.f32 %v3241_v44, %v3099_v27 }
 0x319   : > { %v4734_v34 = vpop.f32.mrf.mxu1 }
 0x31a   : > { %v3842_v28 = vpack.c.bf16 %v3288_v10, %v3287_v50  ;;  %v3279_v59 = vadd.f32 %v6123_v51, %v3262_v36 }
 0x31b   : > { %v3244_v41 = vpop.f32.mrf.mxu1 }
 0x31c   : > { %3855 = vst [vmem:[%s6135_s25 + $0x10] sm:$0xff] %v3842_v28   ;;  %v3263_v43 = vadd.f32 %v3244_v41, %v3100_v46  ;;  %v3289_v42 = vadd.f32 %v4907_v30, %v3279_v59 }
 0x31d   : > { %v4735_v2 = vpop.f32.mrf.mxu1 }
 0x31e   : > { %v3280_v14 = vadd.f32 %v6123_v51, %v3263_v43 }
 0x31f   : > { %v3249_v32 = vpop.f32.mrf.mxu1 }
 0x320   : > { %v3290_v8 = vadd.f32 %v4908_v25, %v3280_v14  ;;  %v3264_v13 = vadd.f32 %v3249_v32, %v3101_v3 }
 0x321   : > { %v4738_v49 = vpop.f32.mrf.mxu1 }
 0x322   : > { %v3847_v54 = vpack.c.bf16 %v3290_v8, %v3289_v42  ;;  %v3281_v47 = vadd.f32 %v6123_v51, %v3264_v13 }
 0x323   : > { %v3252_v63 = vpop.f32.mrf.mxu1 }
 0x324   : > { %3856 = vst [vmem:[%s6135_s25 + $0x18] sm:$0xff] %v3847_v54   ;;  %v3265_v26 = vadd.f32 %v3252_v63, %v3102_v11  ;;  %v3291_v56 = vadd.f32 %v4909_v15, %v3281_v47 }
 0x325   : > { %v4739_v58 = vpop.f32.mrf.mxu1 }
 0x326   : > { %v3282_v0 = vadd.f32 %v6123_v51, %v3265_v26 }
 0x328   : > { %v3292_v39 = vadd.f32 %v4910_v52, %v3282_v0 }
 0x32a   : > { %v3852_v35 = vpack.c.bf16 %v3292_v39, %v3291_v56 }
 0x32c   : > { %3857 = vst [vmem:[%s6135_s25 + $0x20] sm:$0xff] %v3852_v35  }
 0x32d PF: > { %s16_s21 = sadd.s32 1, %s4917_s21  }
 0x32e   : > { %p13_p4 = scmp.ge.s32.totalorder %s16_s21, 4  }
 0x330   :  { %15 = sbr.rel (!%p13_p4) target bundleno = 1 (0x1), region = 90 }

</bundles_post_ra>
